<compile_context>
chip_gen: v7x
topology: tpu7x:2x2x1
jax: 0.10.0
libtpu: 0.0.40
codegen_flags: <defaults>
</compile_context>

<pallas_src>
import functools

import jax
import jax.numpy as jnp
from jax.experimental import pallas as pl
from jax.experimental.pallas import tpu as pltpu


# ----------------------------------------------------------------------------
# Fused Pallas kernel (whole network, one image per grid step)
# ----------------------------------------------------------------------------
def _make_fused_kernel(k, Hp1, Wp1, Ho2, Hp2, Wp2, C1, C2, C3):
    W2 = Wp1                 # flat row width of the layer-1 pooled image (14)
    P2 = Ho2 * W2            # conv2 output rows held in scratch, incl. junk cols (140)
    A1 = Hp1 * Wp1           # real rows of the layer-1 pooled activation (196)

    def kernel(x1_ref, w1_ref, b1_ref, w2_ref, b2_ref, w3_ref, b3_ref,
               o_ref, a1_ref, z2_ref):
        # ------------------- layer 1: conv1 + bn1 + 2x2 maxpool + relu ----------------
        # x1 is pre-im2col'd with rows ordered by pool quadrant, so the conv is 4 MXU
        # matmuls and the pool is an elementwise max of the 4 quadrant results.
        m = jnp.dot(x1_ref[0, 0, :, :], w1_ref[...],
                    preferred_element_type=jnp.float32)
        for q in range(1, 4):
            m = jnp.maximum(
                m, jnp.dot(x1_ref[0, q, :, :], w1_ref[...],
                           preferred_element_type=jnp.float32))
        # BN1 scale is folded into w1; bias + ReLU applied on the pooled (A1, C1) tile.
        a1_ref[...] = jnp.zeros_like(a1_ref)              # also zeroes the k-1 pad rows
        a1_ref[pl.ds(0, A1), :] = jnp.maximum(m + b1_ref[...], 0.0)

        # ------------------- layer 2: conv2 (25 shifted matmuls, register acc) --------
        acc2 = None
        for kh in range(k):
            for kw in range(k):
                off = kh * W2 + kw
                xs = a1_ref[pl.ds(off, P2), :].astype(jnp.bfloat16)      # (P2, C1)
                t = jnp.dot(xs, w2_ref[kh * k + kw, :, :],
                            preferred_element_type=jnp.float32)          # (P2, C2)
                acc2 = t if acc2 is None else acc2 + t
        z2_ref[...] = acc2        # columns with w >= Wo2 are junk and are never read

        # --------- layer 2 pool/relu fused with layer 3 (1x1-spatial conv == FC) ------
        acc3 = None
        for hp in range(Hp2):
            r0 = (2 * hp) * W2
            r1 = (2 * hp + 1) * W2
            a = z2_ref[pl.ds(r0, Wp2, stride=2), :]
            b = z2_ref[pl.ds(r0 + 1, Wp2, stride=2), :]
            c = z2_ref[pl.ds(r1, Wp2, stride=2), :]
            d = z2_ref[pl.ds(r1 + 1, Wp2, stride=2), :]
            pooled = jnp.maximum(jnp.maximum(a, b), jnp.maximum(c, d)) + b2_ref[...]
            pooled = jnp.maximum(pooled, 0.0).astype(jnp.bfloat16)       # (Wp2, C2)
            for wp in range(Wp2):
                t = jnp.dot(pooled[wp:wp + 1, :], w3_ref[hp * Wp2 + wp, :, :],
                            preferred_element_type=jnp.float32)          # (1, C3)
                acc3 = t if acc3 is None else acc3 + t

        # ------------------- bn3 bias + numerically stable sigmoid --------------------
        z = acc3 + b3_ref[...]
        e = jnp.exp(-jnp.abs(z))
        o_ref[0, :, :] = jnp.where(z >= 0.0, 1.0 / (1.0 + e), e / (1.0 + e))

    return kernel


# ----------------------------------------------------------------------------
# Wrapper: im2col (quadrant-ordered) + single fused pallas_call
# ----------------------------------------------------------------------------
def small_cnn_feature(x_nchw, pparams, kernel_size=5):
    k = kernel_size
    N, C, H, W = x_nchw.shape
    Ho1, Wo1 = H - k + 1, W - k + 1
    assert Ho1 % 2 == 0 and Wo1 % 2 == 0, "2x2 max-pool needs even conv1 output"
    Hp1, Wp1 = Ho1 // 2, Wo1 // 2
    Ho2, Wo2 = Hp1 - k + 1, Wp1 - k + 1
    assert Ho2 % 2 == 0 and Wo2 % 2 == 0, "2x2 max-pool needs even conv2 output"
    Hp2, Wp2 = Ho2 // 2, Wo2 // 2
    assert Hp2 == k and Wp2 == k, "conv3 must reduce spatial dims to 1x1 (32x32 input)"

    w1, b1, w2, b2, w3, b3 = pparams
    K1p, C1 = w1.shape
    C2 = w2.shape[-1]
    C3 = w3.shape[-1]
    K1 = k * k * C
    A1 = Hp1 * Wp1
    P2 = Ho2 * Wp1

    # im2col in the wrapper (~118 KB/image in bf16), rows ordered by pool quadrant
    # (h%2, w%2) so the in-kernel 2x2 max-pool is 3 elementwise maxes.
    x = jnp.transpose(x_nchw, (0, 2, 3, 1)).astype(jnp.float32)          # NHWC
    cols = [x[:, kh:kh + Ho1, kw:kw + Wo1, :] for kh in range(k) for kw in range(k)]
    p = jnp.concatenate(cols, axis=-1)                                    # (N,Ho1,Wo1,K1)
    p = p.reshape(N, Hp1, 2, Wp1, 2, K1)
    p = jnp.transpose(p, (0, 2, 4, 1, 3, 5)).reshape(N, 4, A1, K1)
    p = jnp.pad(p, ((0, 0), (0, 0), (0, 0), (0, K1p - K1))).astype(jnp.bfloat16)

    out = pl.pallas_call(
        _make_fused_kernel(k, Hp1, Wp1, Ho2, Hp2, Wp2, C1, C2, C3),
        out_shape=jax.ShapeDtypeStruct((N, 1, C3), jnp.float32),
        grid=(N,),
        in_specs=[
            pl.BlockSpec((1, 4, A1, K1p), lambda n: (n, 0, 0, 0)),   # im2col patches
            pl.BlockSpec((K1p, C1), lambda n: (0, 0)),               # w1 (scale-folded)
            pl.BlockSpec((1, C1), lambda n: (0, 0)),                 # bn1 bias
            pl.BlockSpec((k * k, C1, C2), lambda n: (0, 0, 0)),      # w2 (scale-folded)
            pl.BlockSpec((1, C2), lambda n: (0, 0)),                 # bn2 bias
            pl.BlockSpec((k * k, C2, C3), lambda n: (0, 0, 0)),      # w3 (scale-folded)
            pl.BlockSpec((1, C3), lambda n: (0, 0)),                 # bn3 bias
        ],
        out_specs=pl.BlockSpec((1, 1, C3), lambda n: (n, 0, 0)),
        scratch_shapes=[
            pltpu.VMEM((A1 + k - 1, C1), jnp.float32),   # layer-1 activation (+pad rows)
            pltpu.VMEM((P2, C2), jnp.float32),           # layer-2 conv output
        ],
        compiler_params=pltpu.CompilerParams(dimension_semantics=("parallel",)),
    )(p, w1, b1, w2, b2, w3, b3)
    return out.reshape(N, C3)


# ----------------------------------------------------------------------------
# Parameter preparation (plain JAX, done once): fold BN scale into bf16 weights
# ----------------------------------------------------------------------------
def prepare_pallas_params(params, kernel_size=5, eps=1e-5):
    k = kernel_size

    def fold(conv_b, bn):
        gamma, beta, mean, var = bn
        s = gamma / jnp.sqrt(var + eps)
        return s, s * (conv_b - mean) + beta

    w1, cb1 = params["conv1"]
    w2, cb2 = params["conv2"]
    w3, cb3 = params["conv3"]
    s1, bias1 = fold(cb1, params["bn1"])
    s2, bias2 = fold(cb2, params["bn2"])
    s3, bias3 = fold(cb3, params["bn3"])

    co1, ci1 = w1.shape[0], w1.shape[1]
    K1 = k * k * ci1
    K1p = ((K1 + 127) // 128) * 128
    w1p = jnp.transpose(w1, (2, 3, 1, 0)).reshape(K1, co1) * s1[None, :]
    w1p = jnp.pad(w1p, ((0, K1p - K1), (0, 0))).astype(jnp.bfloat16)

    co2, ci2 = w2.shape[0], w2.shape[1]
    w2p = (jnp.transpose(w2, (2, 3, 1, 0)) * s2[None, None, None, :]
           ).reshape(k * k, ci2, co2).astype(jnp.bfloat16)

    co3, ci3 = w3.shape[0], w3.shape[1]
    w3p = (jnp.transpose(w3, (2, 3, 1, 0)) * s3[None, None, None, :]
           ).reshape(k * k, ci3, co3).astype(jnp.bfloat16)

    return (w1p, bias1.reshape(1, co1).astype(jnp.float32),
            w2p, bias2.reshape(1, co2).astype(jnp.float32),
            w3p, bias3.reshape(1, co3).astype(jnp.float32))


# ----------------------------------------------------------------------------
# Raw (PyTorch-layout) parameters; BN uses running statistics (inference mode)
# ----------------------------------------------------------------------------
def init_params(key, num_channels=3, kernel_size=5):
    def conv_init(kk, cin, cout, ks):
        kw_, kb_ = jax.random.split(kk)
        bound = 1.0 / float(cin * ks * ks) ** 0.5
        w = jax.random.uniform(kw_, (cout, cin, ks, ks), jnp.float32, -bound, bound)
        b = jax.random.uniform(kb_, (cout,), jnp.float32, -bound, bound)
        return w, b

    def bn_init(kk, c):
        k1, k2, k3, k4 = jax.random.split(kk, 4)
        gamma = 1.0 + 0.1 * jax.random.normal(k1, (c,), jnp.float32)
        beta = 0.1 * jax.random.normal(k2, (c,), jnp.float32)
        mean = 0.1 * jax.random.normal(k3, (c,), jnp.float32)
        var = 0.5 + jnp.abs(jax.random.normal(k4, (c,), jnp.float32))
        return gamma, beta, mean, var

    ks = jax.random.split(key, 6)
    return {
        "conv1": conv_init(ks[0], num_channels, 64, kernel_size),
        "bn1": bn_init(ks[1], 64),
        "conv2": conv_init(ks[2], 64, 64, kernel_size),
        "bn2": bn_init(ks[3], 64),
        "conv3": conv_init(ks[4], 64, 128, kernel_size),
        "bn3": bn_init(ks[5], 128),
    }


# ----------------------------------------------------------------------------
# Pure-JAX reference (XLA) for correctness checking
# ----------------------------------------------------------------------------
def reference_forward(x_nchw, params, eps=1e-5):
    def conv(x, w, b):
        y = jax.lax.conv_general_dilated(
            x, w, window_strides=(1, 1), padding="VALID",
            dimension_numbers=("NCHW", "OIHW", "NCHW"))
        return y + b[None, :, None, None]

    def bn(y, p):
        g, be, m, v = p
        s = g / jnp.sqrt(v + eps)
        return (y - m[None, :, None, None]) * s[None, :, None, None] + be[None, :, None, None]

    def pool_relu(y):
        y = jax.lax.reduce_window(y, -jnp.inf, jax.lax.max,
                                  (1, 1, 2, 2), (1, 1, 2, 2), "VALID")
        return jnp.maximum(y, 0.0)

    w1, b1 = params["conv1"]
    w2, b2 = params["conv2"]
    w3, b3 = params["conv3"]
    y = pool_relu(bn(conv(x_nchw, w1, b1), params["bn1"]))
    y = pool_relu(bn(conv(y, w2, b2), params["bn2"]))
    y = jax.nn.sigmoid(bn(conv(y, w3, b3), params["bn3"]))
    return y.reshape(y.shape[0], -1)


# ----------------------------------------------------------------------------
if __name__ == "__main__":
    key = jax.random.PRNGKey(0)
    k_x, k_p = jax.random.split(key)

    # SmallCNNFeature is built for 32x32 inputs (-> 128-dim feature vector).
    N, C, H, W = 2, 3, 32, 32
    x = jax.random.normal(k_x, (N, C, H, W), jnp.float32)

    params = init_params(k_p, num_channels=C, kernel_size=5)
    pparams = prepare_pallas_params(params, kernel_size=5)

    fwd = jax.jit(functools.partial(small_cnn_feature, kernel_size=5))
    out = jax.block_until_ready(fwd(x, pparams))

    assert out.shape == (N, 128), out.shape
    assert out.dtype == jnp.float32
    assert bool(jnp.all(jnp.isfinite(out)))
    assert bool(jnp.all((out >= 0.0) & (out <= 1.0)))

    # compare against the pure-JAX reference (bf16 MXU operands -> modest tolerance)
    ref = reference_forward(x, params)
    max_err = float(jnp.max(jnp.abs(out - ref)))
    assert max_err < 5e-2, max_err

    print("KERNEL_OK")
</pallas_src>

<mosaic_0001>
module attributes {stable_mosaic.version = 11 : i64} {
  func.func @kernel(%arg0: i32, %arg1: memref<1x4x196x128xbf16, #tpu.memory_space<vmem>>, %arg2: memref<128x64xbf16, #tpu.memory_space<vmem>>, %arg3: memref<1x64xf32, #tpu.memory_space<vmem>>, %arg4: memref<25x64x64xbf16, #tpu.memory_space<vmem>>, %arg5: memref<1x64xf32, #tpu.memory_space<vmem>>, %arg6: memref<25x64x128xbf16, #tpu.memory_space<vmem>>, %arg7: memref<1x128xf32, #tpu.memory_space<vmem>>, %arg8: memref<1x1x128xf32, #tpu.memory_space<vmem>>, %arg9: memref<200x64xf32, #tpu.memory_space<vmem>>, %arg10: memref<140x64xf32, #tpu.memory_space<vmem>>) attributes {dimension_semantics = [#tpu.dimension_semantics<parallel>], iteration_bounds = array<i64: 2>, scalar_prefetch = 0 : i64, scratch_operands = 2 : i64, tpu.core_type = #tpu.core_type<tc>, window_params = [{transform_indices = @transform_0, window_bounds = array<i64: 1, 4, 196, 128>}, {pipeline_mode = #tpu.pipeline_mode<synchronous>, transform_indices = @transform_1, window_bounds = array<i64: 128, 64>}, {pipeline_mode = #tpu.pipeline_mode<synchronous>, transform_indices = @transform_2, window_bounds = array<i64: 1, 64>}, {pipeline_mode = #tpu.pipeline_mode<synchronous>, transform_indices = @transform_3, window_bounds = array<i64: 25, 64, 64>}, {pipeline_mode = #tpu.pipeline_mode<synchronous>, transform_indices = @transform_4, window_bounds = array<i64: 1, 64>}, {pipeline_mode = #tpu.pipeline_mode<synchronous>, transform_indices = @transform_5, window_bounds = array<i64: 25, 64, 128>}, {pipeline_mode = #tpu.pipeline_mode<synchronous>, transform_indices = @transform_6, window_bounds = array<i64: 1, 128>}, {transform_indices = @transform_7, window_bounds = array<i64: 1, 1, 128>}]} {
    %c0 = arith.constant 0 : index
    %c0_0 = arith.constant 0 : index
    %c0_1 = arith.constant 0 : index
    %c0_2 = arith.constant 0 : index
    %0 = vector.load %arg1[%c0, %c0_0, %c0_1, %c0_2] : memref<1x4x196x128xbf16, #tpu.memory_space<vmem>>, vector<1x1x196x128xbf16>
    %1 = vector.shape_cast %0 : vector<1x1x196x128xbf16> to vector<196x128xbf16>
    %c0_3 = arith.constant 0 : index
    %c0_4 = arith.constant 0 : index
    %2 = vector.load %arg2[%c0_3, %c0_4] : memref<128x64xbf16, #tpu.memory_space<vmem>>, vector<128x64xbf16>
    %cst = arith.constant dense<0.000000e+00> : vector<196x64xf32>
    %3 = tpu.matmul %1, %2, %cst {dimension_numbers = #tpu.dot_dimension_numbers<[1], [0], [0], [1], [0, 0, 1, 1], [], []>} : vector<196x128xbf16>, vector<128x64xbf16>, vector<196x64xf32> -> vector<196x64xf32>
    %c0_5 = arith.constant 0 : index
    %c1 = arith.constant 1 : index
    %c0_6 = arith.constant 0 : index
    %c0_7 = arith.constant 0 : index
    %4 = vector.load %arg1[%c0_5, %c1, %c0_6, %c0_7] : memref<1x4x196x128xbf16, #tpu.memory_space<vmem>>, vector<1x1x196x128xbf16>
    %5 = vector.shape_cast %4 : vector<1x1x196x128xbf16> to vector<196x128xbf16>
    %c0_8 = arith.constant 0 : index
    %c0_9 = arith.constant 0 : index
    %6 = vector.load %arg2[%c0_8, %c0_9] : memref<128x64xbf16, #tpu.memory_space<vmem>>, vector<128x64xbf16>
    %cst_10 = arith.constant dense<0.000000e+00> : vector<196x64xf32>
    %7 = tpu.matmul %5, %6, %cst_10 {dimension_numbers = #tpu.dot_dimension_numbers<[1], [0], [0], [1], [0, 0, 1, 1], [], []>} : vector<196x128xbf16>, vector<128x64xbf16>, vector<196x64xf32> -> vector<196x64xf32>
    %8 = arith.maximumf %3, %7 : vector<196x64xf32>
    %c0_11 = arith.constant 0 : index
    %c2 = arith.constant 2 : index
    %c0_12 = arith.constant 0 : index
    %c0_13 = arith.constant 0 : index
    %9 = vector.load %arg1[%c0_11, %c2, %c0_12, %c0_13] : memref<1x4x196x128xbf16, #tpu.memory_space<vmem>>, vector<1x1x196x128xbf16>
    %10 = vector.shape_cast %9 : vector<1x1x196x128xbf16> to vector<196x128xbf16>
    %c0_14 = arith.constant 0 : index
    %c0_15 = arith.constant 0 : index
    %11 = vector.load %arg2[%c0_14, %c0_15] : memref<128x64xbf16, #tpu.memory_space<vmem>>, vector<128x64xbf16>
    %cst_16 = arith.constant dense<0.000000e+00> : vector<196x64xf32>
    %12 = tpu.matmul %10, %11, %cst_16 {dimension_numbers = #tpu.dot_dimension_numbers<[1], [0], [0], [1], [0, 0, 1, 1], [], []>} : vector<196x128xbf16>, vector<128x64xbf16>, vector<196x64xf32> -> vector<196x64xf32>
    %13 = arith.maximumf %8, %12 : vector<196x64xf32>
    %c0_17 = arith.constant 0 : index
    %c3 = arith.constant 3 : index
    %c0_18 = arith.constant 0 : index
    %c0_19 = arith.constant 0 : index
    %14 = vector.load %arg1[%c0_17, %c3, %c0_18, %c0_19] : memref<1x4x196x128xbf16, #tpu.memory_space<vmem>>, vector<1x1x196x128xbf16>
    %15 = vector.shape_cast %14 : vector<1x1x196x128xbf16> to vector<196x128xbf16>
    %c0_20 = arith.constant 0 : index
    %c0_21 = arith.constant 0 : index
    %16 = vector.load %arg2[%c0_20, %c0_21] : memref<128x64xbf16, #tpu.memory_space<vmem>>, vector<128x64xbf16>
    %cst_22 = arith.constant dense<0.000000e+00> : vector<196x64xf32>
    %17 = tpu.matmul %15, %16, %cst_22 {dimension_numbers = #tpu.dot_dimension_numbers<[1], [0], [0], [1], [0, 0, 1, 1], [], []>} : vector<196x128xbf16>, vector<128x64xbf16>, vector<196x64xf32> -> vector<196x64xf32>
    %18 = arith.maximumf %13, %17 : vector<196x64xf32>
    %cst_23 = arith.constant 0.000000e+00 : f32
    %19 = vector.broadcast %cst_23 : f32 to vector<200x64xf32>
    %c0_24 = arith.constant 0 : index
    %c0_25 = arith.constant 0 : index
    %20 = vector.load %arg9[%c0_24, %c0_25] : memref<200x64xf32, #tpu.memory_space<vmem>>, vector<200x64xf32>
    tpu.vector_store %arg9[%c0_24, %c0_25], %19 {strides = array<i32>} : memref<200x64xf32, #tpu.memory_space<vmem>>, vector<200x64xf32>,
    %c0_26 = arith.constant 0 : index
    %c0_27 = arith.constant 0 : index
    %21 = vector.load %arg3[%c0_26, %c0_27] : memref<1x64xf32, #tpu.memory_space<vmem>>, vector<1x64xf32>
    %22 = vector.broadcast %21 : vector<1x64xf32> to vector<196x64xf32>
    %23 = arith.addf %18, %22 : vector<196x64xf32>
    %cst_28 = arith.constant 0.000000e+00 : f32
    %24 = vector.broadcast %cst_28 : f32 to vector<196x64xf32>
    %25 = arith.maximumf %23, %24 : vector<196x64xf32>
    %c0_29 = arith.constant 0 : index
    %c0_30 = arith.constant 0 : index
    %26 = vector.load %arg9[%c0_29, %c0_30] : memref<200x64xf32, #tpu.memory_space<vmem>>, vector<196x64xf32>
    tpu.vector_store %arg9[%c0_29, %c0_30], %25 {strides = array<i32>} : memref<200x64xf32, #tpu.memory_space<vmem>>, vector<196x64xf32>,
    %c0_31 = arith.constant 0 : index
    %c0_32 = arith.constant 0 : index
    %27 = vector.load %arg9[%c0_31, %c0_32] : memref<200x64xf32, #tpu.memory_space<vmem>>, vector<140x64xf32>
    %28 = arith.truncf %27 : vector<140x64xf32> to vector<140x64xbf16>
    %c0_33 = arith.constant 0 : index
    %c0_34 = arith.constant 0 : index
    %c0_35 = arith.constant 0 : index
    %29 = vector.load %arg4[%c0_33, %c0_34, %c0_35] : memref<25x64x64xbf16, #tpu.memory_space<vmem>>, vector<1x64x64xbf16>
    %30 = vector.shape_cast %29 : vector<1x64x64xbf16> to vector<64x64xbf16>
    %cst_36 = arith.constant dense<0.000000e+00> : vector<140x64xf32>
    %31 = tpu.matmul %28, %30, %cst_36 {dimension_numbers = #tpu.dot_dimension_numbers<[1], [0], [0], [1], [0, 0, 1, 1], [], []>} : vector<140x64xbf16>, vector<64x64xbf16>, vector<140x64xf32> -> vector<140x64xf32>
    %c1_37 = arith.constant 1 : index
    %c0_38 = arith.constant 0 : index
    %32 = vector.load %arg9[%c1_37, %c0_38] : memref<200x64xf32, #tpu.memory_space<vmem>>, vector<140x64xf32>
    %33 = arith.truncf %32 : vector<140x64xf32> to vector<140x64xbf16>
    %c1_39 = arith.constant 1 : index
    %c0_40 = arith.constant 0 : index
    %c0_41 = arith.constant 0 : index
    %34 = vector.load %arg4[%c1_39, %c0_40, %c0_41] : memref<25x64x64xbf16, #tpu.memory_space<vmem>>, vector<1x64x64xbf16>
    %35 = vector.shape_cast %34 : vector<1x64x64xbf16> to vector<64x64xbf16>
    %cst_42 = arith.constant dense<0.000000e+00> : vector<140x64xf32>
    %36 = tpu.matmul %33, %35, %cst_42 {dimension_numbers = #tpu.dot_dimension_numbers<[1], [0], [0], [1], [0, 0, 1, 1], [], []>} : vector<140x64xbf16>, vector<64x64xbf16>, vector<140x64xf32> -> vector<140x64xf32>
    %37 = arith.addf %31, %36 : vector<140x64xf32>
    %c2_43 = arith.constant 2 : index
    %c0_44 = arith.constant 0 : index
    %38 = vector.load %arg9[%c2_43, %c0_44] : memref<200x64xf32, #tpu.memory_space<vmem>>, vector<140x64xf32>
    %39 = arith.truncf %38 : vector<140x64xf32> to vector<140x64xbf16>
    %c2_45 = arith.constant 2 : index
    %c0_46 = arith.constant 0 : index
    %c0_47 = arith.constant 0 : index
    %40 = vector.load %arg4[%c2_45, %c0_46, %c0_47] : memref<25x64x64xbf16, #tpu.memory_space<vmem>>, vector<1x64x64xbf16>
    %41 = vector.shape_cast %40 : vector<1x64x64xbf16> to vector<64x64xbf16>
    %cst_48 = arith.constant dense<0.000000e+00> : vector<140x64xf32>
    %42 = tpu.matmul %39, %41, %cst_48 {dimension_numbers = #tpu.dot_dimension_numbers<[1], [0], [0], [1], [0, 0, 1, 1], [], []>} : vector<140x64xbf16>, vector<64x64xbf16>, vector<140x64xf32> -> vector<140x64xf32>
    %43 = arith.addf %37, %42 : vector<140x64xf32>
    %c3_49 = arith.constant 3 : index
    %c0_50 = arith.constant 0 : index
    %44 = vector.load %arg9[%c3_49, %c0_50] : memref<200x64xf32, #tpu.memory_space<vmem>>, vector<140x64xf32>
    %45 = arith.truncf %44 : vector<140x64xf32> to vector<140x64xbf16>
    %c3_51 = arith.constant 3 : index
    %c0_52 = arith.constant 0 : index
    %c0_53 = arith.constant 0 : index
    %46 = vector.load %arg4[%c3_51, %c0_52, %c0_53] : memref<25x64x64xbf16, #tpu.memory_space<vmem>>, vector<1x64x64xbf16>
    %47 = vector.shape_cast %46 : vector<1x64x64xbf16> to vector<64x64xbf16>
    %cst_54 = arith.constant dense<0.000000e+00> : vector<140x64xf32>
    %48 = tpu.matmul %45, %47, %cst_54 {dimension_numbers = #tpu.dot_dimension_numbers<[1], [0], [0], [1], [0, 0, 1, 1], [], []>} : vector<140x64xbf16>, vector<64x64xbf16>, vector<140x64xf32> -> vector<140x64xf32>
    %49 = arith.addf %43, %48 : vector<140x64xf32>
    %c4 = arith.constant 4 : index
    %c0_55 = arith.constant 0 : index
    %50 = vector.load %arg9[%c4, %c0_55] : memref<200x64xf32, #tpu.memory_space<vmem>>, vector<140x64xf32>
    %51 = arith.truncf %50 : vector<140x64xf32> to vector<140x64xbf16>
    %c4_56 = arith.constant 4 : index
    %c0_57 = arith.constant 0 : index
    %c0_58 = arith.constant 0 : index
    %52 = vector.load %arg4[%c4_56, %c0_57, %c0_58] : memref<25x64x64xbf16, #tpu.memory_space<vmem>>, vector<1x64x64xbf16>
    %53 = vector.shape_cast %52 : vector<1x64x64xbf16> to vector<64x64xbf16>
    %cst_59 = arith.constant dense<0.000000e+00> : vector<140x64xf32>
    %54 = tpu.matmul %51, %53, %cst_59 {dimension_numbers = #tpu.dot_dimension_numbers<[1], [0], [0], [1], [0, 0, 1, 1], [], []>} : vector<140x64xbf16>, vector<64x64xbf16>, vector<140x64xf32> -> vector<140x64xf32>
    %55 = arith.addf %49, %54 : vector<140x64xf32>
    %c14 = arith.constant 14 : index
    %c0_60 = arith.constant 0 : index
    %56 = vector.load %arg9[%c14, %c0_60] : memref<200x64xf32, #tpu.memory_space<vmem>>, vector<140x64xf32>
    %57 = arith.truncf %56 : vector<140x64xf32> to vector<140x64xbf16>
    %c5 = arith.constant 5 : index
    %c0_61 = arith.constant 0 : index
    %c0_62 = arith.constant 0 : index
    %58 = vector.load %arg4[%c5, %c0_61, %c0_62] : memref<25x64x64xbf16, #tpu.memory_space<vmem>>, vector<1x64x64xbf16>
    %59 = vector.shape_cast %58 : vector<1x64x64xbf16> to vector<64x64xbf16>
    %cst_63 = arith.constant dense<0.000000e+00> : vector<140x64xf32>
    %60 = tpu.matmul %57, %59, %cst_63 {dimension_numbers = #tpu.dot_dimension_numbers<[1], [0], [0], [1], [0, 0, 1, 1], [], []>} : vector<140x64xbf16>, vector<64x64xbf16>, vector<140x64xf32> -> vector<140x64xf32>
    %61 = arith.addf %55, %60 : vector<140x64xf32>
    %c15 = arith.constant 15 : index
    %c0_64 = arith.constant 0 : index
    %62 = vector.load %arg9[%c15, %c0_64] : memref<200x64xf32, #tpu.memory_space<vmem>>, vector<140x64xf32>
    %63 = arith.truncf %62 : vector<140x64xf32> to vector<140x64xbf16>
    %c6 = arith.constant 6 : index
    %c0_65 = arith.constant 0 : index
    %c0_66 = arith.constant 0 : index
    %64 = vector.load %arg4[%c6, %c0_65, %c0_66] : memref<25x64x64xbf16, #tpu.memory_space<vmem>>, vector<1x64x64xbf16>
    %65 = vector.shape_cast %64 : vector<1x64x64xbf16> to vector<64x64xbf16>
    %cst_67 = arith.constant dense<0.000000e+00> : vector<140x64xf32>
    %66 = tpu.matmul %63, %65, %cst_67 {dimension_numbers = #tpu.dot_dimension_numbers<[1], [0], [0], [1], [0, 0, 1, 1], [], []>} : vector<140x64xbf16>, vector<64x64xbf16>, vector<140x64xf32> -> vector<140x64xf32>
    %67 = arith.addf %61, %66 : vector<140x64xf32>
    %c16 = arith.constant 16 : index
    %c0_68 = arith.constant 0 : index
    %68 = vector.load %arg9[%c16, %c0_68] : memref<200x64xf32, #tpu.memory_space<vmem>>, vector<140x64xf32>
    %69 = arith.truncf %68 : vector<140x64xf32> to vector<140x64xbf16>
    %c7 = arith.constant 7 : index
    %c0_69 = arith.constant 0 : index
    %c0_70 = arith.constant 0 : index
    %70 = vector.load %arg4[%c7, %c0_69, %c0_70] : memref<25x64x64xbf16, #tpu.memory_space<vmem>>, vector<1x64x64xbf16>
    %71 = vector.shape_cast %70 : vector<1x64x64xbf16> to vector<64x64xbf16>
    %cst_71 = arith.constant dense<0.000000e+00> : vector<140x64xf32>
    %72 = tpu.matmul %69, %71, %cst_71 {dimension_numbers = #tpu.dot_dimension_numbers<[1], [0], [0], [1], [0, 0, 1, 1], [], []>} : vector<140x64xbf16>, vector<64x64xbf16>, vector<140x64xf32> -> vector<140x64xf32>
    %73 = arith.addf %67, %72 : vector<140x64xf32>
    %c17 = arith.constant 17 : index
    %c0_72 = arith.constant 0 : index
    %74 = vector.load %arg9[%c17, %c0_72] : memref<200x64xf32, #tpu.memory_space<vmem>>, vector<140x64xf32>
    %75 = arith.truncf %74 : vector<140x64xf32> to vector<140x64xbf16>
    %c8 = arith.constant 8 : index
    %c0_73 = arith.constant 0 : index
    %c0_74 = arith.constant 0 : index
    %76 = vector.load %arg4[%c8, %c0_73, %c0_74] : memref<25x64x64xbf16, #tpu.memory_space<vmem>>, vector<1x64x64xbf16>
    %77 = vector.shape_cast %76 : vector<1x64x64xbf16> to vector<64x64xbf16>
    %cst_75 = arith.constant dense<0.000000e+00> : vector<140x64xf32>
    %78 = tpu.matmul %75, %77, %cst_75 {dimension_numbers = #tpu.dot_dimension_numbers<[1], [0], [0], [1], [0, 0, 1, 1], [], []>} : vector<140x64xbf16>, vector<64x64xbf16>, vector<140x64xf32> -> vector<140x64xf32>
    %79 = arith.addf %73, %78 : vector<140x64xf32>
    %c18 = arith.constant 18 : index
    %c0_76 = arith.constant 0 : index
    %80 = vector.load %arg9[%c18, %c0_76] : memref<200x64xf32, #tpu.memory_space<vmem>>, vector<140x64xf32>
    %81 = arith.truncf %80 : vector<140x64xf32> to vector<140x64xbf16>
    %c9 = arith.constant 9 : index
    %c0_77 = arith.constant 0 : index
    %c0_78 = arith.constant 0 : index
    %82 = vector.load %arg4[%c9, %c0_77, %c0_78] : memref<25x64x64xbf16, #tpu.memory_space<vmem>>, vector<1x64x64xbf16>
    %83 = vector.shape_cast %82 : vector<1x64x64xbf16> to vector<64x64xbf16>
    %cst_79 = arith.constant dense<0.000000e+00> : vector<140x64xf32>
    %84 = tpu.matmul %81, %83, %cst_79 {dimension_numbers = #tpu.dot_dimension_numbers<[1], [0], [0], [1], [0, 0, 1, 1], [], []>} : vector<140x64xbf16>, vector<64x64xbf16>, vector<140x64xf32> -> vector<140x64xf32>
    %85 = arith.addf %79, %84 : vector<140x64xf32>
    %c28 = arith.constant 28 : index
    %c0_80 = arith.constant 0 : index
    %86 = vector.load %arg9[%c28, %c0_80] : memref<200x64xf32, #tpu.memory_space<vmem>>, vector<140x64xf32>
    %87 = arith.truncf %86 : vector<140x64xf32> to vector<140x64xbf16>
    %c10 = arith.constant 10 : index
    %c0_81 = arith.constant 0 : index
    %c0_82 = arith.constant 0 : index
    %88 = vector.load %arg4[%c10, %c0_81, %c0_82] : memref<25x64x64xbf16, #tpu.memory_space<vmem>>, vector<1x64x64xbf16>
    %89 = vector.shape_cast %88 : vector<1x64x64xbf16> to vector<64x64xbf16>
    %cst_83 = arith.constant dense<0.000000e+00> : vector<140x64xf32>
    %90 = tpu.matmul %87, %89, %cst_83 {dimension_numbers = #tpu.dot_dimension_numbers<[1], [0], [0], [1], [0, 0, 1, 1], [], []>} : vector<140x64xbf16>, vector<64x64xbf16>, vector<140x64xf32> -> vector<140x64xf32>
    %91 = arith.addf %85, %90 : vector<140x64xf32>
    %c29 = arith.constant 29 : index
    %c0_84 = arith.constant 0 : index
    %92 = vector.load %arg9[%c29, %c0_84] : memref<200x64xf32, #tpu.memory_space<vmem>>, vector<140x64xf32>
    %93 = arith.truncf %92 : vector<140x64xf32> to vector<140x64xbf16>
    %c11 = arith.constant 11 : index
    %c0_85 = arith.constant 0 : index
    %c0_86 = arith.constant 0 : index
    %94 = vector.load %arg4[%c11, %c0_85, %c0_86] : memref<25x64x64xbf16, #tpu.memory_space<vmem>>, vector<1x64x64xbf16>
    %95 = vector.shape_cast %94 : vector<1x64x64xbf16> to vector<64x64xbf16>
    %cst_87 = arith.constant dense<0.000000e+00> : vector<140x64xf32>
    %96 = tpu.matmul %93, %95, %cst_87 {dimension_numbers = #tpu.dot_dimension_numbers<[1], [0], [0], [1], [0, 0, 1, 1], [], []>} : vector<140x64xbf16>, vector<64x64xbf16>, vector<140x64xf32> -> vector<140x64xf32>
    %97 = arith.addf %91, %96 : vector<140x64xf32>
    %c30 = arith.constant 30 : index
    %c0_88 = arith.constant 0 : index
    %98 = vector.load %arg9[%c30, %c0_88] : memref<200x64xf32, #tpu.memory_space<vmem>>, vector<140x64xf32>
    %99 = arith.truncf %98 : vector<140x64xf32> to vector<140x64xbf16>
    %c12 = arith.constant 12 : index
    %c0_89 = arith.constant 0 : index
    %c0_90 = arith.constant 0 : index
    %100 = vector.load %arg4[%c12, %c0_89, %c0_90] : memref<25x64x64xbf16, #tpu.memory_space<vmem>>, vector<1x64x64xbf16>
    %101 = vector.shape_cast %100 : vector<1x64x64xbf16> to vector<64x64xbf16>
    %cst_91 = arith.constant dense<0.000000e+00> : vector<140x64xf32>
    %102 = tpu.matmul %99, %101, %cst_91 {dimension_numbers = #tpu.dot_dimension_numbers<[1], [0], [0], [1], [0, 0, 1, 1], [], []>} : vector<140x64xbf16>, vector<64x64xbf16>, vector<140x64xf32> -> vector<140x64xf32>
    %103 = arith.addf %97, %102 : vector<140x64xf32>
    %c31 = arith.constant 31 : index
    %c0_92 = arith.constant 0 : index
    %104 = vector.load %arg9[%c31, %c0_92] : memref<200x64xf32, #tpu.memory_space<vmem>>, vector<140x64xf32>
    %105 = arith.truncf %104 : vector<140x64xf32> to vector<140x64xbf16>
    %c13 = arith.constant 13 : index
    %c0_93 = arith.constant 0 : index
    %c0_94 = arith.constant 0 : index
    %106 = vector.load %arg4[%c13, %c0_93, %c0_94] : memref<25x64x64xbf16, #tpu.memory_space<vmem>>, vector<1x64x64xbf16>
    %107 = vector.shape_cast %106 : vector<1x64x64xbf16> to vector<64x64xbf16>
    %cst_95 = arith.constant dense<0.000000e+00> : vector<140x64xf32>
    %108 = tpu.matmul %105, %107, %cst_95 {dimension_numbers = #tpu.dot_dimension_numbers<[1], [0], [0], [1], [0, 0, 1, 1], [], []>} : vector<140x64xbf16>, vector<64x64xbf16>, vector<140x64xf32> -> vector<140x64xf32>
    %109 = arith.addf %103, %108 : vector<140x64xf32>
    %c32 = arith.constant 32 : index
    %c0_96 = arith.constant 0 : index
    %110 = vector.load %arg9[%c32, %c0_96] : memref<200x64xf32, #tpu.memory_space<vmem>>, vector<140x64xf32>
    %111 = arith.truncf %110 : vector<140x64xf32> to vector<140x64xbf16>
    %c14_97 = arith.constant 14 : index
    %c0_98 = arith.constant 0 : index
    %c0_99 = arith.constant 0 : index
    %112 = vector.load %arg4[%c14_97, %c0_98, %c0_99] : memref<25x64x64xbf16, #tpu.memory_space<vmem>>, vector<1x64x64xbf16>
    %113 = vector.shape_cast %112 : vector<1x64x64xbf16> to vector<64x64xbf16>
    %cst_100 = arith.constant dense<0.000000e+00> : vector<140x64xf32>
    %114 = tpu.matmul %111, %113, %cst_100 {dimension_numbers = #tpu.dot_dimension_numbers<[1], [0], [0], [1], [0, 0, 1, 1], [], []>} : vector<140x64xbf16>, vector<64x64xbf16>, vector<140x64xf32> -> vector<140x64xf32>
    %115 = arith.addf %109, %114 : vector<140x64xf32>
    %c42 = arith.constant 42 : index
    %c0_101 = arith.constant 0 : index
    %116 = vector.load %arg9[%c42, %c0_101] : memref<200x64xf32, #tpu.memory_space<vmem>>, vector<140x64xf32>
    %117 = arith.truncf %116 : vector<140x64xf32> to vector<140x64xbf16>
    %c15_102 = arith.constant 15 : index
    %c0_103 = arith.constant 0 : index
    %c0_104 = arith.constant 0 : index
    %118 = vector.load %arg4[%c15_102, %c0_103, %c0_104] : memref<25x64x64xbf16, #tpu.memory_space<vmem>>, vector<1x64x64xbf16>
    %119 = vector.shape_cast %118 : vector<1x64x64xbf16> to vector<64x64xbf16>
    %cst_105 = arith.constant dense<0.000000e+00> : vector<140x64xf32>
    %120 = tpu.matmul %117, %119, %cst_105 {dimension_numbers = #tpu.dot_dimension_numbers<[1], [0], [0], [1], [0, 0, 1, 1], [], []>} : vector<140x64xbf16>, vector<64x64xbf16>, vector<140x64xf32> -> vector<140x64xf32>
    %121 = arith.addf %115, %120 : vector<140x64xf32>
    %c43 = arith.constant 43 : index
    %c0_106 = arith.constant 0 : index
    %122 = vector.load %arg9[%c43, %c0_106] : memref<200x64xf32, #tpu.memory_space<vmem>>, vector<140x64xf32>
    %123 = arith.truncf %122 : vector<140x64xf32> to vector<140x64xbf16>
    %c16_107 = arith.constant 16 : index
    %c0_108 = arith.constant 0 : index
    %c0_109 = arith.constant 0 : index
    %124 = vector.load %arg4[%c16_107, %c0_108, %c0_109] : memref<25x64x64xbf16, #tpu.memory_space<vmem>>, vector<1x64x64xbf16>
    %125 = vector.shape_cast %124 : vector<1x64x64xbf16> to vector<64x64xbf16>
    %cst_110 = arith.constant dense<0.000000e+00> : vector<140x64xf32>
    %126 = tpu.matmul %123, %125, %cst_110 {dimension_numbers = #tpu.dot_dimension_numbers<[1], [0], [0], [1], [0, 0, 1, 1], [], []>} : vector<140x64xbf16>, vector<64x64xbf16>, vector<140x64xf32> -> vector<140x64xf32>
    %127 = arith.addf %121, %126 : vector<140x64xf32>
    %c44 = arith.constant 44 : index
    %c0_111 = arith.constant 0 : index
    %128 = vector.load %arg9[%c44, %c0_111] : memref<200x64xf32, #tpu.memory_space<vmem>>, vector<140x64xf32>
    %129 = arith.truncf %128 : vector<140x64xf32> to vector<140x64xbf16>
    %c17_112 = arith.constant 17 : index
    %c0_113 = arith.constant 0 : index
    %c0_114 = arith.constant 0 : index
    %130 = vector.load %arg4[%c17_112, %c0_113, %c0_114] : memref<25x64x64xbf16, #tpu.memory_space<vmem>>, vector<1x64x64xbf16>
    %131 = vector.shape_cast %130 : vector<1x64x64xbf16> to vector<64x64xbf16>
    %cst_115 = arith.constant dense<0.000000e+00> : vector<140x64xf32>
    %132 = tpu.matmul %129, %131, %cst_115 {dimension_numbers = #tpu.dot_dimension_numbers<[1], [0], [0], [1], [0, 0, 1, 1], [], []>} : vector<140x64xbf16>, vector<64x64xbf16>, vector<140x64xf32> -> vector<140x64xf32>
    %133 = arith.addf %127, %132 : vector<140x64xf32>
    %c45 = arith.constant 45 : index
    %c0_116 = arith.constant 0 : index
    %134 = vector.load %arg9[%c45, %c0_116] : memref<200x64xf32, #tpu.memory_space<vmem>>, vector<140x64xf32>
    %135 = arith.truncf %134 : vector<140x64xf32> to vector<140x64xbf16>
    %c18_117 = arith.constant 18 : index
    %c0_118 = arith.constant 0 : index
    %c0_119 = arith.constant 0 : index
    %136 = vector.load %arg4[%c18_117, %c0_118, %c0_119] : memref<25x64x64xbf16, #tpu.memory_space<vmem>>, vector<1x64x64xbf16>
    %137 = vector.shape_cast %136 : vector<1x64x64xbf16> to vector<64x64xbf16>
    %cst_120 = arith.constant dense<0.000000e+00> : vector<140x64xf32>
    %138 = tpu.matmul %135, %137, %cst_120 {dimension_numbers = #tpu.dot_dimension_numbers<[1], [0], [0], [1], [0, 0, 1, 1], [], []>} : vector<140x64xbf16>, vector<64x64xbf16>, vector<140x64xf32> -> vector<140x64xf32>
    %139 = arith.addf %133, %138 : vector<140x64xf32>
    %c46 = arith.constant 46 : index
    %c0_121 = arith.constant 0 : index
    %140 = vector.load %arg9[%c46, %c0_121] : memref<200x64xf32, #tpu.memory_space<vmem>>, vector<140x64xf32>
    %141 = arith.truncf %140 : vector<140x64xf32> to vector<140x64xbf16>
    %c19 = arith.constant 19 : index
    %c0_122 = arith.constant 0 : index
    %c0_123 = arith.constant 0 : index
    %142 = vector.load %arg4[%c19, %c0_122, %c0_123] : memref<25x64x64xbf16, #tpu.memory_space<vmem>>, vector<1x64x64xbf16>
    %143 = vector.shape_cast %142 : vector<1x64x64xbf16> to vector<64x64xbf16>
    %cst_124 = arith.constant dense<0.000000e+00> : vector<140x64xf32>
    %144 = tpu.matmul %141, %143, %cst_124 {dimension_numbers = #tpu.dot_dimension_numbers<[1], [0], [0], [1], [0, 0, 1, 1], [], []>} : vector<140x64xbf16>, vector<64x64xbf16>, vector<140x64xf32> -> vector<140x64xf32>
    %145 = arith.addf %139, %144 : vector<140x64xf32>
    %c56 = arith.constant 56 : index
    %c0_125 = arith.constant 0 : index
    %146 = vector.load %arg9[%c56, %c0_125] : memref<200x64xf32, #tpu.memory_space<vmem>>, vector<140x64xf32>
    %147 = arith.truncf %146 : vector<140x64xf32> to vector<140x64xbf16>
    %c20 = arith.constant 20 : index
    %c0_126 = arith.constant 0 : index
    %c0_127 = arith.constant 0 : index
    %148 = vector.load %arg4[%c20, %c0_126, %c0_127] : memref<25x64x64xbf16, #tpu.memory_space<vmem>>, vector<1x64x64xbf16>
    %149 = vector.shape_cast %148 : vector<1x64x64xbf16> to vector<64x64xbf16>
    %cst_128 = arith.constant dense<0.000000e+00> : vector<140x64xf32>
    %150 = tpu.matmul %147, %149, %cst_128 {dimension_numbers = #tpu.dot_dimension_numbers<[1], [0], [0], [1], [0, 0, 1, 1], [], []>} : vector<140x64xbf16>, vector<64x64xbf16>, vector<140x64xf32> -> vector<140x64xf32>
    %151 = arith.addf %145, %150 : vector<140x64xf32>
    %c57 = arith.constant 57 : index
    %c0_129 = arith.constant 0 : index
    %152 = vector.load %arg9[%c57, %c0_129] : memref<200x64xf32, #tpu.memory_space<vmem>>, vector<140x64xf32>
    %153 = arith.truncf %152 : vector<140x64xf32> to vector<140x64xbf16>
    %c21 = arith.constant 21 : index
    %c0_130 = arith.constant 0 : index
    %c0_131 = arith.constant 0 : index
    %154 = vector.load %arg4[%c21, %c0_130, %c0_131] : memref<25x64x64xbf16, #tpu.memory_space<vmem>>, vector<1x64x64xbf16>
    %155 = vector.shape_cast %154 : vector<1x64x64xbf16> to vector<64x64xbf16>
    %cst_132 = arith.constant dense<0.000000e+00> : vector<140x64xf32>
    %156 = tpu.matmul %153, %155, %cst_132 {dimension_numbers = #tpu.dot_dimension_numbers<[1], [0], [0], [1], [0, 0, 1, 1], [], []>} : vector<140x64xbf16>, vector<64x64xbf16>, vector<140x64xf32> -> vector<140x64xf32>
    %157 = arith.addf %151, %156 : vector<140x64xf32>
    %c58 = arith.constant 58 : index
    %c0_133 = arith.constant 0 : index
    %158 = vector.load %arg9[%c58, %c0_133] : memref<200x64xf32, #tpu.memory_space<vmem>>, vector<140x64xf32>
    %159 = arith.truncf %158 : vector<140x64xf32> to vector<140x64xbf16>
    %c22 = arith.constant 22 : index
    %c0_134 = arith.constant 0 : index
    %c0_135 = arith.constant 0 : index
    %160 = vector.load %arg4[%c22, %c0_134, %c0_135] : memref<25x64x64xbf16, #tpu.memory_space<vmem>>, vector<1x64x64xbf16>
    %161 = vector.shape_cast %160 : vector<1x64x64xbf16> to vector<64x64xbf16>
    %cst_136 = arith.constant dense<0.000000e+00> : vector<140x64xf32>
    %162 = tpu.matmul %159, %161, %cst_136 {dimension_numbers = #tpu.dot_dimension_numbers<[1], [0], [0], [1], [0, 0, 1, 1], [], []>} : vector<140x64xbf16>, vector<64x64xbf16>, vector<140x64xf32> -> vector<140x64xf32>
    %163 = arith.addf %157, %162 : vector<140x64xf32>
    %c59 = arith.constant 59 : index
    %c0_137 = arith.constant 0 : index
    %164 = vector.load %arg9[%c59, %c0_137] : memref<200x64xf32, #tpu.memory_space<vmem>>, vector<140x64xf32>
    %165 = arith.truncf %164 : vector<140x64xf32> to vector<140x64xbf16>
    %c23 = arith.constant 23 : index
    %c0_138 = arith.constant 0 : index
    %c0_139 = arith.constant 0 : index
    %166 = vector.load %arg4[%c23, %c0_138, %c0_139] : memref<25x64x64xbf16, #tpu.memory_space<vmem>>, vector<1x64x64xbf16>
    %167 = vector.shape_cast %166 : vector<1x64x64xbf16> to vector<64x64xbf16>
    %cst_140 = arith.constant dense<0.000000e+00> : vector<140x64xf32>
    %168 = tpu.matmul %165, %167, %cst_140 {dimension_numbers = #tpu.dot_dimension_numbers<[1], [0], [0], [1], [0, 0, 1, 1], [], []>} : vector<140x64xbf16>, vector<64x64xbf16>, vector<140x64xf32> -> vector<140x64xf32>
    %169 = arith.addf %163, %168 : vector<140x64xf32>
    %c60 = arith.constant 60 : index
    %c0_141 = arith.constant 0 : index
    %170 = vector.load %arg9[%c60, %c0_141] : memref<200x64xf32, #tpu.memory_space<vmem>>, vector<140x64xf32>
    %171 = arith.truncf %170 : vector<140x64xf32> to vector<140x64xbf16>
    %c24 = arith.constant 24 : index
    %c0_142 = arith.constant 0 : index
    %c0_143 = arith.constant 0 : index
    %172 = vector.load %arg4[%c24, %c0_142, %c0_143] : memref<25x64x64xbf16, #tpu.memory_space<vmem>>, vector<1x64x64xbf16>
    %173 = vector.shape_cast %172 : vector<1x64x64xbf16> to vector<64x64xbf16>
    %cst_144 = arith.constant dense<0.000000e+00> : vector<140x64xf32>
    %174 = tpu.matmul %171, %173, %cst_144 {dimension_numbers = #tpu.dot_dimension_numbers<[1], [0], [0], [1], [0, 0, 1, 1], [], []>} : vector<140x64xbf16>, vector<64x64xbf16>, vector<140x64xf32> -> vector<140x64xf32>
    %175 = arith.addf %169, %174 : vector<140x64xf32>
    %c0_145 = arith.constant 0 : index
    %c0_146 = arith.constant 0 : index
    %176 = vector.load %arg10[%c0_145, %c0_146] : memref<140x64xf32, #tpu.memory_space<vmem>>, vector<140x64xf32>
    tpu.vector_store %arg10[%c0_145, %c0_146], %175 {strides = array<i32>} : memref<140x64xf32, #tpu.memory_space<vmem>>, vector<140x64xf32>,
    %c0_147 = arith.constant 0 : index
    %c0_148 = arith.constant 0 : index
    %177 = tpu.strided_load %arg10[%c0_147, %c0_148] {strides = array<i32: 2, 1>} : memref<140x64xf32, #tpu.memory_space<vmem>>, vector<5x64xf32>
    %c1_149 = arith.constant 1 : index
    %c0_150 = arith.constant 0 : index
    %178 = tpu.strided_load %arg10[%c1_149, %c0_150] {strides = array<i32: 2, 1>} : memref<140x64xf32, #tpu.memory_space<vmem>>, vector<5x64xf32>
    %c14_151 = arith.constant 14 : index
    %c0_152 = arith.constant 0 : index
    %179 = tpu.strided_load %arg10[%c14_151, %c0_152] {strides = array<i32: 2, 1>} : memref<140x64xf32, #tpu.memory_space<vmem>>, vector<5x64xf32>
    %c15_153 = arith.constant 15 : index
    %c0_154 = arith.constant 0 : index
    %180 = tpu.strided_load %arg10[%c15_153, %c0_154] {strides = array<i32: 2, 1>} : memref<140x64xf32, #tpu.memory_space<vmem>>, vector<5x64xf32>
    %181 = arith.maximumf %177, %178 : vector<5x64xf32>
    %182 = arith.maximumf %179, %180 : vector<5x64xf32>
    %183 = arith.maximumf %181, %182 : vector<5x64xf32>
    %c0_155 = arith.constant 0 : index
    %c0_156 = arith.constant 0 : index
    %184 = vector.load %arg5[%c0_155, %c0_156] : memref<1x64xf32, #tpu.memory_space<vmem>>, vector<1x64xf32>
    %185 = vector.broadcast %184 : vector<1x64xf32> to vector<5x64xf32>
    %186 = arith.addf %183, %185 : vector<5x64xf32>
    %cst_157 = arith.constant 0.000000e+00 : f32
    %187 = vector.broadcast %cst_157 : f32 to vector<5x64xf32>
    %188 = arith.maximumf %186, %187 : vector<5x64xf32>
    %189 = arith.truncf %188 : vector<5x64xf32> to vector<5x64xbf16>
    %190 = vector.extract_strided_slice %189 {offsets = [0, 0], sizes = [1, 64], strides = [1, 1]} : vector<5x64xbf16> to vector<1x64xbf16>
    %c0_158 = arith.constant 0 : index
    %c0_159 = arith.constant 0 : index
    %c0_160 = arith.constant 0 : index
    %191 = vector.load %arg6[%c0_158, %c0_159, %c0_160] : memref<25x64x128xbf16, #tpu.memory_space<vmem>>, vector<1x64x128xbf16>
    %192 = vector.shape_cast %191 : vector<1x64x128xbf16> to vector<64x128xbf16>
    %cst_161 = arith.constant dense<0.000000e+00> : vector<1x128xf32>
    %193 = tpu.matmul %190, %192, %cst_161 {dimension_numbers = #tpu.dot_dimension_numbers<[1], [0], [0], [1], [0, 0, 1, 1], [], []>} : vector<1x64xbf16>, vector<64x128xbf16>, vector<1x128xf32> -> vector<1x128xf32>
    %194 = vector.extract_strided_slice %189 {offsets = [1, 0], sizes = [1, 64], strides = [1, 1]} : vector<5x64xbf16> to vector<1x64xbf16>
    %c1_162 = arith.constant 1 : index
    %c0_163 = arith.constant 0 : index
    %c0_164 = arith.constant 0 : index
    %195 = vector.load %arg6[%c1_162, %c0_163, %c0_164] : memref<25x64x128xbf16, #tpu.memory_space<vmem>>, vector<1x64x128xbf16>
    %196 = vector.shape_cast %195 : vector<1x64x128xbf16> to vector<64x128xbf16>
    %cst_165 = arith.constant dense<0.000000e+00> : vector<1x128xf32>
    %197 = tpu.matmul %194, %196, %cst_165 {dimension_numbers = #tpu.dot_dimension_numbers<[1], [0], [0], [1], [0, 0, 1, 1], [], []>} : vector<1x64xbf16>, vector<64x128xbf16>, vector<1x128xf32> -> vector<1x128xf32>
    %198 = arith.addf %193, %197 : vector<1x128xf32>
    %199 = vector.extract_strided_slice %189 {offsets = [2, 0], sizes = [1, 64], strides = [1, 1]} : vector<5x64xbf16> to vector<1x64xbf16>
    %c2_166 = arith.constant 2 : index
    %c0_167 = arith.constant 0 : index
    %c0_168 = arith.constant 0 : index
    %200 = vector.load %arg6[%c2_166, %c0_167, %c0_168] : memref<25x64x128xbf16, #tpu.memory_space<vmem>>, vector<1x64x128xbf16>
    %201 = vector.shape_cast %200 : vector<1x64x128xbf16> to vector<64x128xbf16>
    %cst_169 = arith.constant dense<0.000000e+00> : vector<1x128xf32>
    %202 = tpu.matmul %199, %201, %cst_169 {dimension_numbers = #tpu.dot_dimension_numbers<[1], [0], [0], [1], [0, 0, 1, 1], [], []>} : vector<1x64xbf16>, vector<64x128xbf16>, vector<1x128xf32> -> vector<1x128xf32>
    %203 = arith.addf %198, %202 : vector<1x128xf32>
    %204 = vector.extract_strided_slice %189 {offsets = [3, 0], sizes = [1, 64], strides = [1, 1]} : vector<5x64xbf16> to vector<1x64xbf16>
    %c3_170 = arith.constant 3 : index
    %c0_171 = arith.constant 0 : index
    %c0_172 = arith.constant 0 : index
    %205 = vector.load %arg6[%c3_170, %c0_171, %c0_172] : memref<25x64x128xbf16, #tpu.memory_space<vmem>>, vector<1x64x128xbf16>
    %206 = vector.shape_cast %205 : vector<1x64x128xbf16> to vector<64x128xbf16>
    %cst_173 = arith.constant dense<0.000000e+00> : vector<1x128xf32>
    %207 = tpu.matmul %204, %206, %cst_173 {dimension_numbers = #tpu.dot_dimension_numbers<[1], [0], [0], [1], [0, 0, 1, 1], [], []>} : vector<1x64xbf16>, vector<64x128xbf16>, vector<1x128xf32> -> vector<1x128xf32>
    %208 = arith.addf %203, %207 : vector<1x128xf32>
    %209 = vector.extract_strided_slice %189 {offsets = [4, 0], sizes = [1, 64], strides = [1, 1]} : vector<5x64xbf16> to vector<1x64xbf16>
    %c4_174 = arith.constant 4 : index
    %c0_175 = arith.constant 0 : index
    %c0_176 = arith.constant 0 : index
    %210 = vector.load %arg6[%c4_174, %c0_175, %c0_176] : memref<25x64x128xbf16, #tpu.memory_space<vmem>>, vector<1x64x128xbf16>
    %211 = vector.shape_cast %210 : vector<1x64x128xbf16> to vector<64x128xbf16>
    %cst_177 = arith.constant dense<0.000000e+00> : vector<1x128xf32>
    %212 = tpu.matmul %209, %211, %cst_177 {dimension_numbers = #tpu.dot_dimension_numbers<[1], [0], [0], [1], [0, 0, 1, 1], [], []>} : vector<1x64xbf16>, vector<64x128xbf16>, vector<1x128xf32> -> vector<1x128xf32>
    %213 = arith.addf %208, %212 : vector<1x128xf32>
    %c28_178 = arith.constant 28 : index
    %c0_179 = arith.constant 0 : index
    %214 = tpu.strided_load %arg10[%c28_178, %c0_179] {strides = array<i32: 2, 1>} : memref<140x64xf32, #tpu.memory_space<vmem>>, vector<5x64xf32>
    %c29_180 = arith.constant 29 : index
    %c0_181 = arith.constant 0 : index
    %215 = tpu.strided_load %arg10[%c29_180, %c0_181] {strides = array<i32: 2, 1>} : memref<140x64xf32, #tpu.memory_space<vmem>>, vector<5x64xf32>
    %c42_182 = arith.constant 42 : index
    %c0_183 = arith.constant 0 : index
    %216 = tpu.strided_load %arg10[%c42_182, %c0_183] {strides = array<i32: 2, 1>} : memref<140x64xf32, #tpu.memory_space<vmem>>, vector<5x64xf32>
    %c43_184 = arith.constant 43 : index
    %c0_185 = arith.constant 0 : index
    %217 = tpu.strided_load %arg10[%c43_184, %c0_185] {strides = array<i32: 2, 1>} : memref<140x64xf32, #tpu.memory_space<vmem>>, vector<5x64xf32>
    %218 = arith.maximumf %214, %215 : vector<5x64xf32>
    %219 = arith.maximumf %216, %217 : vector<5x64xf32>
    %220 = arith.maximumf %218, %219 : vector<5x64xf32>
    %c0_186 = arith.constant 0 : index
    %c0_187 = arith.constant 0 : index
    %221 = vector.load %arg5[%c0_186, %c0_187] : memref<1x64xf32, #tpu.memory_space<vmem>>, vector<1x64xf32>
    %222 = vector.broadcast %221 : vector<1x64xf32> to vector<5x64xf32>
    %223 = arith.addf %220, %222 : vector<5x64xf32>
    %cst_188 = arith.constant 0.000000e+00 : f32
    %224 = vector.broadcast %cst_188 : f32 to vector<5x64xf32>
    %225 = arith.maximumf %223, %224 : vector<5x64xf32>
    %226 = arith.truncf %225 : vector<5x64xf32> to vector<5x64xbf16>
    %227 = vector.extract_strided_slice %226 {offsets = [0, 0], sizes = [1, 64], strides = [1, 1]} : vector<5x64xbf16> to vector<1x64xbf16>
    %c5_189 = arith.constant 5 : index
    %c0_190 = arith.constant 0 : index
    %c0_191 = arith.constant 0 : index
    %228 = vector.load %arg6[%c5_189, %c0_190, %c0_191] : memref<25x64x128xbf16, #tpu.memory_space<vmem>>, vector<1x64x128xbf16>
    %229 = vector.shape_cast %228 : vector<1x64x128xbf16> to vector<64x128xbf16>
    %cst_192 = arith.constant dense<0.000000e+00> : vector<1x128xf32>
    %230 = tpu.matmul %227, %229, %cst_192 {dimension_numbers = #tpu.dot_dimension_numbers<[1], [0], [0], [1], [0, 0, 1, 1], [], []>} : vector<1x64xbf16>, vector<64x128xbf16>, vector<1x128xf32> -> vector<1x128xf32>
    %231 = arith.addf %213, %230 : vector<1x128xf32>
    %232 = vector.extract_strided_slice %226 {offsets = [1, 0], sizes = [1, 64], strides = [1, 1]} : vector<5x64xbf16> to vector<1x64xbf16>
    %c6_193 = arith.constant 6 : index
    %c0_194 = arith.constant 0 : index
    %c0_195 = arith.constant 0 : index
    %233 = vector.load %arg6[%c6_193, %c0_194, %c0_195] : memref<25x64x128xbf16, #tpu.memory_space<vmem>>, vector<1x64x128xbf16>
    %234 = vector.shape_cast %233 : vector<1x64x128xbf16> to vector<64x128xbf16>
    %cst_196 = arith.constant dense<0.000000e+00> : vector<1x128xf32>
    %235 = tpu.matmul %232, %234, %cst_196 {dimension_numbers = #tpu.dot_dimension_numbers<[1], [0], [0], [1], [0, 0, 1, 1], [], []>} : vector<1x64xbf16>, vector<64x128xbf16>, vector<1x128xf32> -> vector<1x128xf32>
    %236 = arith.addf %231, %235 : vector<1x128xf32>
    %237 = vector.extract_strided_slice %226 {offsets = [2, 0], sizes = [1, 64], strides = [1, 1]} : vector<5x64xbf16> to vector<1x64xbf16>
    %c7_197 = arith.constant 7 : index
    %c0_198 = arith.constant 0 : index
    %c0_199 = arith.constant 0 : index
    %238 = vector.load %arg6[%c7_197, %c0_198, %c0_199] : memref<25x64x128xbf16, #tpu.memory_space<vmem>>, vector<1x64x128xbf16>
    %239 = vector.shape_cast %238 : vector<1x64x128xbf16> to vector<64x128xbf16>
    %cst_200 = arith.constant dense<0.000000e+00> : vector<1x128xf32>
    %240 = tpu.matmul %237, %239, %cst_200 {dimension_numbers = #tpu.dot_dimension_numbers<[1], [0], [0], [1], [0, 0, 1, 1], [], []>} : vector<1x64xbf16>, vector<64x128xbf16>, vector<1x128xf32> -> vector<1x128xf32>
    %241 = arith.addf %236, %240 : vector<1x128xf32>
    %242 = vector.extract_strided_slice %226 {offsets = [3, 0], sizes = [1, 64], strides = [1, 1]} : vector<5x64xbf16> to vector<1x64xbf16>
    %c8_201 = arith.constant 8 : index
    %c0_202 = arith.constant 0 : index
    %c0_203 = arith.constant 0 : index
    %243 = vector.load %arg6[%c8_201, %c0_202, %c0_203] : memref<25x64x128xbf16, #tpu.memory_space<vmem>>, vector<1x64x128xbf16>
    %244 = vector.shape_cast %243 : vector<1x64x128xbf16> to vector<64x128xbf16>
    %cst_204 = arith.constant dense<0.000000e+00> : vector<1x128xf32>
    %245 = tpu.matmul %242, %244, %cst_204 {dimension_numbers = #tpu.dot_dimension_numbers<[1], [0], [0], [1], [0, 0, 1, 1], [], []>} : vector<1x64xbf16>, vector<64x128xbf16>, vector<1x128xf32> -> vector<1x128xf32>
    %246 = arith.addf %241, %245 : vector<1x128xf32>
    %247 = vector.extract_strided_slice %226 {offsets = [4, 0], sizes = [1, 64], strides = [1, 1]} : vector<5x64xbf16> to vector<1x64xbf16>
    %c9_205 = arith.constant 9 : index
    %c0_206 = arith.constant 0 : index
    %c0_207 = arith.constant 0 : index
    %248 = vector.load %arg6[%c9_205, %c0_206, %c0_207] : memref<25x64x128xbf16, #tpu.memory_space<vmem>>, vector<1x64x128xbf16>
    %249 = vector.shape_cast %248 : vector<1x64x128xbf16> to vector<64x128xbf16>
    %cst_208 = arith.constant dense<0.000000e+00> : vector<1x128xf32>
    %250 = tpu.matmul %247, %249, %cst_208 {dimension_numbers = #tpu.dot_dimension_numbers<[1], [0], [0], [1], [0, 0, 1, 1], [], []>} : vector<1x64xbf16>, vector<64x128xbf16>, vector<1x128xf32> -> vector<1x128xf32>
    %251 = arith.addf %246, %250 : vector<1x128xf32>
    %c56_209 = arith.constant 56 : index
    %c0_210 = arith.constant 0 : index
    %252 = tpu.strided_load %arg10[%c56_209, %c0_210] {strides = array<i32: 2, 1>} : memref<140x64xf32, #tpu.memory_space<vmem>>, vector<5x64xf32>
    %c57_211 = arith.constant 57 : index
    %c0_212 = arith.constant 0 : index
    %253 = tpu.strided_load %arg10[%c57_211, %c0_212] {strides = array<i32: 2, 1>} : memref<140x64xf32, #tpu.memory_space<vmem>>, vector<5x64xf32>
    %c70 = arith.constant 70 : index
    %c0_213 = arith.constant 0 : index
    %254 = tpu.strided_load %arg10[%c70, %c0_213] {strides = array<i32: 2, 1>} : memref<140x64xf32, #tpu.memory_space<vmem>>, vector<5x64xf32>
    %c71 = arith.constant 71 : index
    %c0_214 = arith.constant 0 : index
    %255 = tpu.strided_load %arg10[%c71, %c0_214] {strides = array<i32: 2, 1>} : memref<140x64xf32, #tpu.memory_space<vmem>>, vector<5x64xf32>
    %256 = arith.maximumf %252, %253 : vector<5x64xf32>
    %257 = arith.maximumf %254, %255 : vector<5x64xf32>
    %258 = arith.maximumf %256, %257 : vector<5x64xf32>
    %c0_215 = arith.constant 0 : index
    %c0_216 = arith.constant 0 : index
    %259 = vector.load %arg5[%c0_215, %c0_216] : memref<1x64xf32, #tpu.memory_space<vmem>>, vector<1x64xf32>
    %260 = vector.broadcast %259 : vector<1x64xf32> to vector<5x64xf32>
    %261 = arith.addf %258, %260 : vector<5x64xf32>
    %cst_217 = arith.constant 0.000000e+00 : f32
    %262 = vector.broadcast %cst_217 : f32 to vector<5x64xf32>
    %263 = arith.maximumf %261, %262 : vector<5x64xf32>
    %264 = arith.truncf %263 : vector<5x64xf32> to vector<5x64xbf16>
    %265 = vector.extract_strided_slice %264 {offsets = [0, 0], sizes = [1, 64], strides = [1, 1]} : vector<5x64xbf16> to vector<1x64xbf16>
    %c10_218 = arith.constant 10 : index
    %c0_219 = arith.constant 0 : index
    %c0_220 = arith.constant 0 : index
    %266 = vector.load %arg6[%c10_218, %c0_219, %c0_220] : memref<25x64x128xbf16, #tpu.memory_space<vmem>>, vector<1x64x128xbf16>
    %267 = vector.shape_cast %266 : vector<1x64x128xbf16> to vector<64x128xbf16>
    %cst_221 = arith.constant dense<0.000000e+00> : vector<1x128xf32>
    %268 = tpu.matmul %265, %267, %cst_221 {dimension_numbers = #tpu.dot_dimension_numbers<[1], [0], [0], [1], [0, 0, 1, 1], [], []>} : vector<1x64xbf16>, vector<64x128xbf16>, vector<1x128xf32> -> vector<1x128xf32>
    %269 = arith.addf %251, %268 : vector<1x128xf32>
    %270 = vector.extract_strided_slice %264 {offsets = [1, 0], sizes = [1, 64], strides = [1, 1]} : vector<5x64xbf16> to vector<1x64xbf16>
    %c11_222 = arith.constant 11 : index
    %c0_223 = arith.constant 0 : index
    %c0_224 = arith.constant 0 : index
    %271 = vector.load %arg6[%c11_222, %c0_223, %c0_224] : memref<25x64x128xbf16, #tpu.memory_space<vmem>>, vector<1x64x128xbf16>
    %272 = vector.shape_cast %271 : vector<1x64x128xbf16> to vector<64x128xbf16>
    %cst_225 = arith.constant dense<0.000000e+00> : vector<1x128xf32>
    %273 = tpu.matmul %270, %272, %cst_225 {dimension_numbers = #tpu.dot_dimension_numbers<[1], [0], [0], [1], [0, 0, 1, 1], [], []>} : vector<1x64xbf16>, vector<64x128xbf16>, vector<1x128xf32> -> vector<1x128xf32>
    %274 = arith.addf %269, %273 : vector<1x128xf32>
    %275 = vector.extract_strided_slice %264 {offsets = [2, 0], sizes = [1, 64], strides = [1, 1]} : vector<5x64xbf16> to vector<1x64xbf16>
    %c12_226 = arith.constant 12 : index
    %c0_227 = arith.constant 0 : index
    %c0_228 = arith.constant 0 : index
    %276 = vector.load %arg6[%c12_226, %c0_227, %c0_228] : memref<25x64x128xbf16, #tpu.memory_space<vmem>>, vector<1x64x128xbf16>
    %277 = vector.shape_cast %276 : vector<1x64x128xbf16> to vector<64x128xbf16>
    %cst_229 = arith.constant dense<0.000000e+00> : vector<1x128xf32>
    %278 = tpu.matmul %275, %277, %cst_229 {dimension_numbers = #tpu.dot_dimension_numbers<[1], [0], [0], [1], [0, 0, 1, 1], [], []>} : vector<1x64xbf16>, vector<64x128xbf16>, vector<1x128xf32> -> vector<1x128xf32>
    %279 = arith.addf %274, %278 : vector<1x128xf32>
    %280 = vector.extract_strided_slice %264 {offsets = [3, 0], sizes = [1, 64], strides = [1, 1]} : vector<5x64xbf16> to vector<1x64xbf16>
    %c13_230 = arith.constant 13 : index
    %c0_231 = arith.constant 0 : index
    %c0_232 = arith.constant 0 : index
    %281 = vector.load %arg6[%c13_230, %c0_231, %c0_232] : memref<25x64x128xbf16, #tpu.memory_space<vmem>>, vector<1x64x128xbf16>
    %282 = vector.shape_cast %281 : vector<1x64x128xbf16> to vector<64x128xbf16>
    %cst_233 = arith.constant dense<0.000000e+00> : vector<1x128xf32>
    %283 = tpu.matmul %280, %282, %cst_233 {dimension_numbers = #tpu.dot_dimension_numbers<[1], [0], [0], [1], [0, 0, 1, 1], [], []>} : vector<1x64xbf16>, vector<64x128xbf16>, vector<1x128xf32> -> vector<1x128xf32>
    %284 = arith.addf %279, %283 : vector<1x128xf32>
    %285 = vector.extract_strided_slice %264 {offsets = [4, 0], sizes = [1, 64], strides = [1, 1]} : vector<5x64xbf16> to vector<1x64xbf16>
    %c14_234 = arith.constant 14 : index
    %c0_235 = arith.constant 0 : index
    %c0_236 = arith.constant 0 : index
    %286 = vector.load %arg6[%c14_234, %c0_235, %c0_236] : memref<25x64x128xbf16, #tpu.memory_space<vmem>>, vector<1x64x128xbf16>
    %287 = vector.shape_cast %286 : vector<1x64x128xbf16> to vector<64x128xbf16>
    %cst_237 = arith.constant dense<0.000000e+00> : vector<1x128xf32>
    %288 = tpu.matmul %285, %287, %cst_237 {dimension_numbers = #tpu.dot_dimension_numbers<[1], [0], [0], [1], [0, 0, 1, 1], [], []>} : vector<1x64xbf16>, vector<64x128xbf16>, vector<1x128xf32> -> vector<1x128xf32>
    %289 = arith.addf %284, %288 : vector<1x128xf32>
    %c84 = arith.constant 84 : index
    %c0_238 = arith.constant 0 : index
    %290 = tpu.strided_load %arg10[%c84, %c0_238] {strides = array<i32: 2, 1>} : memref<140x64xf32, #tpu.memory_space<vmem>>, vector<5x64xf32>
    %c85 = arith.constant 85 : index
    %c0_239 = arith.constant 0 : index
    %291 = tpu.strided_load %arg10[%c85, %c0_239] {strides = array<i32: 2, 1>} : memref<140x64xf32, #tpu.memory_space<vmem>>, vector<5x64xf32>
    %c98 = arith.constant 98 : index
    %c0_240 = arith.constant 0 : index
    %292 = tpu.strided_load %arg10[%c98, %c0_240] {strides = array<i32: 2, 1>} : memref<140x64xf32, #tpu.memory_space<vmem>>, vector<5x64xf32>
    %c99 = arith.constant 99 : index
    %c0_241 = arith.constant 0 : index
    %293 = tpu.strided_load %arg10[%c99, %c0_241] {strides = array<i32: 2, 1>} : memref<140x64xf32, #tpu.memory_space<vmem>>, vector<5x64xf32>
    %294 = arith.maximumf %290, %291 : vector<5x64xf32>
    %295 = arith.maximumf %292, %293 : vector<5x64xf32>
    %296 = arith.maximumf %294, %295 : vector<5x64xf32>
    %c0_242 = arith.constant 0 : index
    %c0_243 = arith.constant 0 : index
    %297 = vector.load %arg5[%c0_242, %c0_243] : memref<1x64xf32, #tpu.memory_space<vmem>>, vector<1x64xf32>
    %298 = vector.broadcast %297 : vector<1x64xf32> to vector<5x64xf32>
    %299 = arith.addf %296, %298 : vector<5x64xf32>
    %cst_244 = arith.constant 0.000000e+00 : f32
    %300 = vector.broadcast %cst_244 : f32 to vector<5x64xf32>
    %301 = arith.maximumf %299, %300 : vector<5x64xf32>
    %302 = arith.truncf %301 : vector<5x64xf32> to vector<5x64xbf16>
    %303 = vector.extract_strided_slice %302 {offsets = [0, 0], sizes = [1, 64], strides = [1, 1]} : vector<5x64xbf16> to vector<1x64xbf16>
    %c15_245 = arith.constant 15 : index
    %c0_246 = arith.constant 0 : index
    %c0_247 = arith.constant 0 : index
    %304 = vector.load %arg6[%c15_245, %c0_246, %c0_247] : memref<25x64x128xbf16, #tpu.memory_space<vmem>>, vector<1x64x128xbf16>
    %305 = vector.shape_cast %304 : vector<1x64x128xbf16> to vector<64x128xbf16>
    %cst_248 = arith.constant dense<0.000000e+00> : vector<1x128xf32>
    %306 = tpu.matmul %303, %305, %cst_248 {dimension_numbers = #tpu.dot_dimension_numbers<[1], [0], [0], [1], [0, 0, 1, 1], [], []>} : vector<1x64xbf16>, vector<64x128xbf16>, vector<1x128xf32> -> vector<1x128xf32>
    %307 = arith.addf %289, %306 : vector<1x128xf32>
    %308 = vector.extract_strided_slice %302 {offsets = [1, 0], sizes = [1, 64], strides = [1, 1]} : vector<5x64xbf16> to vector<1x64xbf16>
    %c16_249 = arith.constant 16 : index
    %c0_250 = arith.constant 0 : index
    %c0_251 = arith.constant 0 : index
    %309 = vector.load %arg6[%c16_249, %c0_250, %c0_251] : memref<25x64x128xbf16, #tpu.memory_space<vmem>>, vector<1x64x128xbf16>
    %310 = vector.shape_cast %309 : vector<1x64x128xbf16> to vector<64x128xbf16>
    %cst_252 = arith.constant dense<0.000000e+00> : vector<1x128xf32>
    %311 = tpu.matmul %308, %310, %cst_252 {dimension_numbers = #tpu.dot_dimension_numbers<[1], [0], [0], [1], [0, 0, 1, 1], [], []>} : vector<1x64xbf16>, vector<64x128xbf16>, vector<1x128xf32> -> vector<1x128xf32>
    %312 = arith.addf %307, %311 : vector<1x128xf32>
    %313 = vector.extract_strided_slice %302 {offsets = [2, 0], sizes = [1, 64], strides = [1, 1]} : vector<5x64xbf16> to vector<1x64xbf16>
    %c17_253 = arith.constant 17 : index
    %c0_254 = arith.constant 0 : index
    %c0_255 = arith.constant 0 : index
    %314 = vector.load %arg6[%c17_253, %c0_254, %c0_255] : memref<25x64x128xbf16, #tpu.memory_space<vmem>>, vector<1x64x128xbf16>
    %315 = vector.shape_cast %314 : vector<1x64x128xbf16> to vector<64x128xbf16>
    %cst_256 = arith.constant dense<0.000000e+00> : vector<1x128xf32>
    %316 = tpu.matmul %313, %315, %cst_256 {dimension_numbers = #tpu.dot_dimension_numbers<[1], [0], [0], [1], [0, 0, 1, 1], [], []>} : vector<1x64xbf16>, vector<64x128xbf16>, vector<1x128xf32> -> vector<1x128xf32>
    %317 = arith.addf %312, %316 : vector<1x128xf32>
    %318 = vector.extract_strided_slice %302 {offsets = [3, 0], sizes = [1, 64], strides = [1, 1]} : vector<5x64xbf16> to vector<1x64xbf16>
    %c18_257 = arith.constant 18 : index
    %c0_258 = arith.constant 0 : index
    %c0_259 = arith.constant 0 : index
    %319 = vector.load %arg6[%c18_257, %c0_258, %c0_259] : memref<25x64x128xbf16, #tpu.memory_space<vmem>>, vector<1x64x128xbf16>
    %320 = vector.shape_cast %319 : vector<1x64x128xbf16> to vector<64x128xbf16>
    %cst_260 = arith.constant dense<0.000000e+00> : vector<1x128xf32>
    %321 = tpu.matmul %318, %320, %cst_260 {dimension_numbers = #tpu.dot_dimension_numbers<[1], [0], [0], [1], [0, 0, 1, 1], [], []>} : vector<1x64xbf16>, vector<64x128xbf16>, vector<1x128xf32> -> vector<1x128xf32>
    %322 = arith.addf %317, %321 : vector<1x128xf32>
    %323 = vector.extract_strided_slice %302 {offsets = [4, 0], sizes = [1, 64], strides = [1, 1]} : vector<5x64xbf16> to vector<1x64xbf16>
    %c19_261 = arith.constant 19 : index
    %c0_262 = arith.constant 0 : index
    %c0_263 = arith.constant 0 : index
    %324 = vector.load %arg6[%c19_261, %c0_262, %c0_263] : memref<25x64x128xbf16, #tpu.memory_space<vmem>>, vector<1x64x128xbf16>
    %325 = vector.shape_cast %324 : vector<1x64x128xbf16> to vector<64x128xbf16>
    %cst_264 = arith.constant dense<0.000000e+00> : vector<1x128xf32>
    %326 = tpu.matmul %323, %325, %cst_264 {dimension_numbers = #tpu.dot_dimension_numbers<[1], [0], [0], [1], [0, 0, 1, 1], [], []>} : vector<1x64xbf16>, vector<64x128xbf16>, vector<1x128xf32> -> vector<1x128xf32>
    %327 = arith.addf %322, %326 : vector<1x128xf32>
    %c112 = arith.constant 112 : index
    %c0_265 = arith.constant 0 : index
    %328 = tpu.strided_load %arg10[%c112, %c0_265] {strides = array<i32: 2, 1>} : memref<140x64xf32, #tpu.memory_space<vmem>>, vector<5x64xf32>
    %c113 = arith.constant 113 : index
    %c0_266 = arith.constant 0 : index
    %329 = tpu.strided_load %arg10[%c113, %c0_266] {strides = array<i32: 2, 1>} : memref<140x64xf32, #tpu.memory_space<vmem>>, vector<5x64xf32>
    %c126 = arith.constant 126 : index
    %c0_267 = arith.constant 0 : index
    %330 = tpu.strided_load %arg10[%c126, %c0_267] {strides = array<i32: 2, 1>} : memref<140x64xf32, #tpu.memory_space<vmem>>, vector<5x64xf32>
    %c127 = arith.constant 127 : index
    %c0_268 = arith.constant 0 : index
    %331 = tpu.strided_load %arg10[%c127, %c0_268] {strides = array<i32: 2, 1>} : memref<140x64xf32, #tpu.memory_space<vmem>>, vector<5x64xf32>
    %332 = arith.maximumf %328, %329 : vector<5x64xf32>
    %333 = arith.maximumf %330, %331 : vector<5x64xf32>
    %334 = arith.maximumf %332, %333 : vector<5x64xf32>
    %c0_269 = arith.constant 0 : index
    %c0_270 = arith.constant 0 : index
    %335 = vector.load %arg5[%c0_269, %c0_270] : memref<1x64xf32, #tpu.memory_space<vmem>>, vector<1x64xf32>
    %336 = vector.broadcast %335 : vector<1x64xf32> to vector<5x64xf32>
    %337 = arith.addf %334, %336 : vector<5x64xf32>
    %cst_271 = arith.constant 0.000000e+00 : f32
    %338 = vector.broadcast %cst_271 : f32 to vector<5x64xf32>
    %339 = arith.maximumf %337, %338 : vector<5x64xf32>
    %340 = arith.truncf %339 : vector<5x64xf32> to vector<5x64xbf16>
    %341 = vector.extract_strided_slice %340 {offsets = [0, 0], sizes = [1, 64], strides = [1, 1]} : vector<5x64xbf16> to vector<1x64xbf16>
    %c20_272 = arith.constant 20 : index
    %c0_273 = arith.constant 0 : index
    %c0_274 = arith.constant 0 : index
    %342 = vector.load %arg6[%c20_272, %c0_273, %c0_274] : memref<25x64x128xbf16, #tpu.memory_space<vmem>>, vector<1x64x128xbf16>
    %343 = vector.shape_cast %342 : vector<1x64x128xbf16> to vector<64x128xbf16>
    %cst_275 = arith.constant dense<0.000000e+00> : vector<1x128xf32>
    %344 = tpu.matmul %341, %343, %cst_275 {dimension_numbers = #tpu.dot_dimension_numbers<[1], [0], [0], [1], [0, 0, 1, 1], [], []>} : vector<1x64xbf16>, vector<64x128xbf16>, vector<1x128xf32> -> vector<1x128xf32>
    %345 = arith.addf %327, %344 : vector<1x128xf32>
    %346 = vector.extract_strided_slice %340 {offsets = [1, 0], sizes = [1, 64], strides = [1, 1]} : vector<5x64xbf16> to vector<1x64xbf16>
    %c21_276 = arith.constant 21 : index
    %c0_277 = arith.constant 0 : index
    %c0_278 = arith.constant 0 : index
    %347 = vector.load %arg6[%c21_276, %c0_277, %c0_278] : memref<25x64x128xbf16, #tpu.memory_space<vmem>>, vector<1x64x128xbf16>
    %348 = vector.shape_cast %347 : vector<1x64x128xbf16> to vector<64x128xbf16>
    %cst_279 = arith.constant dense<0.000000e+00> : vector<1x128xf32>
    %349 = tpu.matmul %346, %348, %cst_279 {dimension_numbers = #tpu.dot_dimension_numbers<[1], [0], [0], [1], [0, 0, 1, 1], [], []>} : vector<1x64xbf16>, vector<64x128xbf16>, vector<1x128xf32> -> vector<1x128xf32>
    %350 = arith.addf %345, %349 : vector<1x128xf32>
    %351 = vector.extract_strided_slice %340 {offsets = [2, 0], sizes = [1, 64], strides = [1, 1]} : vector<5x64xbf16> to vector<1x64xbf16>
    %c22_280 = arith.constant 22 : index
    %c0_281 = arith.constant 0 : index
    %c0_282 = arith.constant 0 : index
    %352 = vector.load %arg6[%c22_280, %c0_281, %c0_282] : memref<25x64x128xbf16, #tpu.memory_space<vmem>>, vector<1x64x128xbf16>
    %353 = vector.shape_cast %352 : vector<1x64x128xbf16> to vector<64x128xbf16>
    %cst_283 = arith.constant dense<0.000000e+00> : vector<1x128xf32>
    %354 = tpu.matmul %351, %353, %cst_283 {dimension_numbers = #tpu.dot_dimension_numbers<[1], [0], [0], [1], [0, 0, 1, 1], [], []>} : vector<1x64xbf16>, vector<64x128xbf16>, vector<1x128xf32> -> vector<1x128xf32>
    %355 = arith.addf %350, %354 : vector<1x128xf32>
    %356 = vector.extract_strided_slice %340 {offsets = [3, 0], sizes = [1, 64], strides = [1, 1]} : vector<5x64xbf16> to vector<1x64xbf16>
    %c23_284 = arith.constant 23 : index
    %c0_285 = arith.constant 0 : index
    %c0_286 = arith.constant 0 : index
    %357 = vector.load %arg6[%c23_284, %c0_285, %c0_286] : memref<25x64x128xbf16, #tpu.memory_space<vmem>>, vector<1x64x128xbf16>
    %358 = vector.shape_cast %357 : vector<1x64x128xbf16> to vector<64x128xbf16>
    %cst_287 = arith.constant dense<0.000000e+00> : vector<1x128xf32>
    %359 = tpu.matmul %356, %358, %cst_287 {dimension_numbers = #tpu.dot_dimension_numbers<[1], [0], [0], [1], [0, 0, 1, 1], [], []>} : vector<1x64xbf16>, vector<64x128xbf16>, vector<1x128xf32> -> vector<1x128xf32>
    %360 = arith.addf %355, %359 : vector<1x128xf32>
    %361 = vector.extract_strided_slice %340 {offsets = [4, 0], sizes = [1, 64], strides = [1, 1]} : vector<5x64xbf16> to vector<1x64xbf16>
    %c24_288 = arith.constant 24 : index
    %c0_289 = arith.constant 0 : index
    %c0_290 = arith.constant 0 : index
    %362 = vector.load %arg6[%c24_288, %c0_289, %c0_290] : memref<25x64x128xbf16, #tpu.memory_space<vmem>>, vector<1x64x128xbf16>
    %363 = vector.shape_cast %362 : vector<1x64x128xbf16> to vector<64x128xbf16>
    %cst_291 = arith.constant dense<0.000000e+00> : vector<1x128xf32>
    %364 = tpu.matmul %361, %363, %cst_291 {dimension_numbers = #tpu.dot_dimension_numbers<[1], [0], [0], [1], [0, 0, 1, 1], [], []>} : vector<1x64xbf16>, vector<64x128xbf16>, vector<1x128xf32> -> vector<1x128xf32>
    %365 = arith.addf %360, %364 : vector<1x128xf32>
    %c0_292 = arith.constant 0 : index
    %c0_293 = arith.constant 0 : index
    %366 = vector.load %arg7[%c0_292, %c0_293] : memref<1x128xf32, #tpu.memory_space<vmem>>, vector<1x128xf32>
    %367 = arith.addf %365, %366 : vector<1x128xf32>
    %368 = math.absf %367 : vector<1x128xf32>
    %cst_294 = arith.constant 0.000000e+00 : f32
    %369 = vector.broadcast %cst_294 : f32 to vector<1x128xf32>
    %370 = arith.subf %369, %368 : vector<1x128xf32>
    %371 = math.exp %370 : vector<1x128xf32>
    %cst_295 = arith.constant 0.000000e+00 : f32
    %372 = vector.broadcast %cst_295 : f32 to vector<1x128xf32>
    %373 = arith.cmpf oge, %367, %372 : vector<1x128xf32>
    %cst_296 = arith.constant 1.000000e+00 : f32
    %374 = vector.broadcast %cst_296 : f32 to vector<1x128xf32>
    %375 = arith.addf %374, %371 : vector<1x128xf32>
    %cst_297 = arith.constant 1.000000e+00 : f32
    %376 = vector.broadcast %cst_297 : f32 to vector<1x128xf32>
    %377 = arith.divf %376, %375 : vector<1x128xf32>
    %cst_298 = arith.constant 1.000000e+00 : f32
    %378 = vector.broadcast %cst_298 : f32 to vector<1x128xf32>
    %379 = arith.addf %378, %371 : vector<1x128xf32>
    %380 = arith.divf %371, %379 : vector<1x128xf32>
    %381 = arith.select %373, %377, %380 : vector<1x128xi1>, vector<1x128xf32>
    %c0_299 = arith.constant 0 : index
    %c0_300 = arith.constant 0 : index
    %c0_301 = arith.constant 0 : index
    %382 = vector.load %arg8[%c0_299, %c0_300, %c0_301] : memref<1x1x128xf32, #tpu.memory_space<vmem>>, vector<1x1x128xf32>
    %383 = vector.shape_cast %382 : vector<1x1x128xf32> to vector<1x128xf32>
    %384 = vector.shape_cast %381 : vector<1x128xf32> to vector<1x1x128xf32>
    tpu.vector_store %arg8[%c0_299, %c0_300, %c0_301], %384 {strides = array<i32>} : memref<1x1x128xf32, #tpu.memory_space<vmem>>, vector<1x1x128xf32>,
    return
  }
  func.func @transform_0(%arg0: i32) -> (i32, i32, i32, i32) {
    %c0_i32 = arith.constant 0 : i32
    %c0_i32_0 = arith.constant 0 : i32
    %c0_i32_1 = arith.constant 0 : i32
    %c0_i32_2 = arith.constant 0 : i32
    return %arg0, %c0_i32, %c0_i32_0, %c0_i32_1 : i32, i32, i32, i32
  }
  func.func @transform_1(%arg0: i32) -> (i32, i32) {
    %c0_i32 = arith.constant 0 : i32
    %c0_i32_0 = arith.constant 0 : i32
    %c0_i32_1 = arith.constant 0 : i32
    return %c0_i32, %c0_i32_0 : i32, i32
  }
  func.func @transform_2(%arg0: i32) -> (i32, i32) {
    %c0_i32 = arith.constant 0 : i32
    %c0_i32_0 = arith.constant 0 : i32
    %c0_i32_1 = arith.constant 0 : i32
    return %c0_i32, %c0_i32_0 : i32, i32
  }
  func.func @transform_3(%arg0: i32) -> (i32, i32, i32) {
    %c0_i32 = arith.constant 0 : i32
    %c0_i32_0 = arith.constant 0 : i32
    %c0_i32_1 = arith.constant 0 : i32
    %c0_i32_2 = arith.constant 0 : i32
    return %c0_i32, %c0_i32_0, %c0_i32_1 : i32, i32, i32
  }
  func.func @transform_4(%arg0: i32) -> (i32, i32) {
    %c0_i32 = arith.constant 0 : i32
    %c0_i32_0 = arith.constant 0 : i32
    %c0_i32_1 = arith.constant 0 : i32
    return %c0_i32, %c0_i32_0 : i32, i32
  }
  func.func @transform_5(%arg0: i32) -> (i32, i32, i32) {
    %c0_i32 = arith.constant 0 : i32
    %c0_i32_0 = arith.constant 0 : i32
    %c0_i32_1 = arith.constant 0 : i32
    %c0_i32_2 = arith.constant 0 : i32
    return %c0_i32, %c0_i32_0, %c0_i32_1 : i32, i32, i32
  }
  func.func @transform_6(%arg0: i32) -> (i32, i32) {
    %c0_i32 = arith.constant 0 : i32
    %c0_i32_0 = arith.constant 0 : i32
    %c0_i32_1 = arith.constant 0 : i32
    return %c0_i32, %c0_i32_0 : i32, i32
  }
  func.func @transform_7(%arg0: i32) -> (i32, i32, i32) {
    %c0_i32 = arith.constant 0 : i32
    %c0_i32_0 = arith.constant 0 : i32
    %c0_i32_1 = arith.constant 0 : i32
    return %arg0, %c0_i32, %c0_i32_0 : i32, i32, i32
  }
}

</mosaic_0001>

<bundles_post_ra>
// kernel: small_cnn_feature.1
= control target key start
LH: loop header
LB: loop body
LE: loop exit
PB: predicated region body
PF: predicated region fallthrough
CT: control target
= control target key end

     0   :  { %12 = vsyncpa [#allocation5], 0  ;;  %s16036_s0 = inlined_call_operand.vmem [shape: bf16[2,4,196,128], index: 0, kind: input, shape index: {}]   ;;  %s16037_s1 = inlined_call_operand.vmem [shape: bf16[128,64], index: 1, kind: input, shape index: {}]   ;;  %s16038_s2 = inlined_call_operand.vmem [shape: f32[1,64], index: 2, kind: input, shape index: {}]   ;;  %s16039_s3 = inlined_call_operand.vmem [shape: bf16[25,64,64], index: 3, kind: input, shape index: {}]   ;;  %s16040_s4 = inlined_call_operand.vmem [shape: f32[1,64], index: 4, kind: input, shape index: {}]   ;;  %s16041_s5 = inlined_call_operand.vmem [shape: bf16[25,64,128], index: 5, kind: input, shape index: {}]   ;;  %s16042_s6 = inlined_call_operand.vmem [shape: f32[1,128], index: 6, kind: input, shape index: {}]   ;;  %s16043_s7 = inlined_call_operand.hbm [shape: f32[2,1,128], index: 7, kind: output, shape index: {}]  }
   0x1   :  { %14 = vsyncpa [#allocation5 + $0x1], 0  ;;  %s13294_s24 = smov 0   ;;  %s13296_s25 = smov 0  }
   0x2   :  { %s13298_s26 = smov 0   ;;  %s13300_s27 = smov 0  }
   0x3 LB: > { %s13315_s28 = sadd.s32 4294967295, %s13249_s27   ;;  %s8816_s29 = sadd.s32 4294967294, %s13249_s27   ;;  %s13249_s27 = sphi %s13300_s27, %s16081_s27   ;;  %s13245_s26 = sphi %s13298_s26, %s16080_s26   ;;  %s13241_s25 = sphi %s13296_s25, %s16079_s25   ;;  %s13237_s24 = sphi %s13294_s24, %s16078_s24  }
   0x4   : > { %s13319_s30 = sadd.s32 1, %s13249_s27   ;;  %s179_s8 = sadd.s32 1, %s13245_s26 }
   0x5   : > { %s176_s9 = ssub.s32 %s13249_s27, %s13319_s30  ;;  %p189_p0 = scmp.ne.s32.totalorder %s13245_s26, %s13241_s25 }
   0x6   : > { %p177_p1 = scmp.eq.s32.totalorder %s176_s9, 0  ;;  %p190_p2 = scmp.eq.s32.totalorder %s13315_s28, 1 }
   0x7   : > { %p195_p3 = scmp.ne.s32.totalorder %s13241_s25, %s13237_s24  ;;  %p196_p4 = scmp.eq.s32.totalorder %s8816_s29, 1 }
   0x8   : > { %s13330_s10 = scalar_select %p177_p1, %s13245_s26, %s179_s8  }
   0x9   : > { %p13332_p5 = por %p190_p2, %p189_p0  ;;  %p13336_p6 = por %p196_p4, %p195_p3 }
   0xa   : > { %p8819_p7 = scmp.ge.s32.totalorder %s13249_s27, 1  ;;  %p240_p8 = scmp.lt.s32.totalorder %s13249_s27, 3 }
   0xc   : > { %p241_p9 = pnand %p8819_p7, %p240_p8 }
   0xe   : > { %244 = sbr.rel (%p241_p9) target bundleno = 2734 (0xaae), region = 48 }
  0x15   : > { %v13345_v0 = vld [vmem:[%s16037_s1] sm:$0xff]   ;;  %v13251_v1 = vmov 0.0   ;;  %v13353_v2 = vld [vmem:[%s16037_s1 + $0x8] sm:$0xff]   ;;  %vm13252_vm0 = vmmov 0   ;;  %p271_p10 = scmp.lt.s32.totalorder %s13315_s28, 1  ;;  %v13366_v3 = vld [vmem:[%s16037_s1 + $0x10] sm:$0xff]  }
  0x16   : > { %10329 = vmatprep.subr.bf16.mxu1 %v13251_v1  ;;  %10865 = vmatprep.subr.bf16.mxu0 %v13251_v1  ;;  %v13378_v4 = vld [vmem:[%s16037_s1 + $0x18] sm:$0xff]   ;;  %v13385_v5 = vld [vmem:[%s16037_s1 + $0x20] sm:$0xff]   ;;  %v13392_v6 = vld [vmem:[%s16037_s1 + $0x28] sm:$0xff]   ;;  %vm1367_vm1 = vcmask 523264   ;;  %vm1474_vm2 = vcmask 519168   ;;  %s9792_s18 = sshll.u32 %s13315_s28, 4 }
  0x17   : > { %10330 = vmatpush3.bf16.msra.mxu1 %v13345_v0  ;;  %10345 = vmatprep.mubr.msk.bf16.mxu1 %vm13252_vm0, %v13251_v1  ;;  %s272_s17 = scalar_select %p271_p10, %s13315_s28, 1  ;;  %v13398_v7 = vld [vmem:[%s16037_s1 + $0x30] sm:$0xff]   ;;  %v13406_v8 = vld [vmem:[%s16037_s1 + $0x38] sm:$0xff]   ;;  %v13161_v36 = vld [vmem:[%s16037_s1] sm:$0xff]   ;;  %1368 = vst.msk [vmem:[#allocation2] sm:$0xff] %vm1367_vm1, %v13251_v1 }
  0x18   : > { %10331 = vmatprep.subr.bf16.mxu1 %v13251_v1  ;;  %10873 = vmatprep.mubr.msk.bf16.mxu0 %vm13252_vm0, %v13251_v1  ;;  %v13162_v41 = vld [vmem:[%s16037_s1 + $0x8] sm:$0xff]   ;;  %v13163_v43 = vld [vmem:[%s16037_s1 + $0x10] sm:$0xff]   ;;  %v13164_v48 = vld [vmem:[%s16037_s1 + $0x18] sm:$0xff]   ;;  %1369 = vst.msk [vmem:[#allocation2 + $0x8] sm:$0xff] %vm1367_vm1, %v13251_v1  ;;  %s15994_s29 = scalar_lea.hbm %s16043_s7, %s9792_s18  ;;  %s13253_s28 = smov [#allocation4]  }
  0x19   : > { %s12855_s20 = smul.u32 400, %s272_s17  ;;  %v13165_v50 = vld [vmem:[%s16037_s1 + $0x20] sm:$0xff]   ;;  %v13166_v55 = vld [vmem:[%s16037_s1 + $0x28] sm:$0xff]   ;;  %v13167_v57 = vld [vmem:[%s16037_s1 + $0x30] sm:$0xff]   ;;  %1370 = vst.msk [vmem:[#allocation2 + $0x10] sm:$0xff] %vm1367_vm1, %v13251_v1  ;;  %s269_s17 = sand.u32 1, %s13241_s25  }
  0x1a   : > { %v13168_v62 = vld [vmem:[%s16037_s1 + $0x38] sm:$0xff]   ;;  %1371 = vst.msk [vmem:[#allocation2 + $0x18] sm:$0xff] %vm1367_vm1, %v13251_v1  ;;  %1372 = vst.msk [vmem:[#allocation2 + $0x20] sm:$0xff] %vm1367_vm1, %v13251_v1  ;;  %s270_s19 = scalar_lea.vmem [#allocation4], %s269_s17  ;;  %s8749_s8 = scalar_lea.sflag [#allocation5], %s269_s17 }
  0x1b   : > { %10332 = vmatpush3.bf16.msra.mxu1 %v13353_v2  ;;  %s13372_s23 = scalar_lea.vmem %s16036_s0, %s12855_s20  ;;  %1373 = vst.msk [vmem:[#allocation2 + $0x28] sm:$0xff] %vm1367_vm1, %v13251_v1  ;;  %1374 = vst.msk [vmem:[#allocation2 + $0x30] sm:$0xff] %vm1367_vm1, %v13251_v1  ;;  %s8761_s20 = sshll.u32 %s270_s19, 4  ;;  %s15996_s20 = int_to_ptr.vmem [resolvable:$true] %s8761_s20 }
  0x1c   : > { %10333 = vmatprep.subr.bf16.mxu1 %v13251_v1  ;;  %v12905_v9 = vld [vmem:[%s13372_s23] sm:$0xff]   ;;  %v12906_v10 = vld [vmem:[%s13372_s23 + $0x8] sm:$0xff]   ;;  %v12907_v11 = vld [vmem:[%s13372_s23 + $0x10] sm:$0xff]   ;;  %1375 = vst.msk [vmem:[#allocation2 + $0x38] sm:$0xff] %vm1367_vm1, %v13251_v1  ;;  %s13187_s9 = scalar_lea.vmem %s15996_s20, 16  ;;  %s13191_s13 = sshll.u32 %s13253_s28, 4  ;;  %s13192_s13 = int_to_ptr.vmem [resolvable:$false] %s13191_s13 }
  0x1d   : > { %v12908_v12 = vld [vmem:[%s13372_s23 + $0x18] sm:$0xff]   ;;  %v12909_v13 = vld [vmem:[%s13372_s23 + $0x20] sm:$0xff]   ;;  %v12910_v14 = vld [vmem:[%s13372_s23 + $0x28] sm:$0xff]   ;;  %1376 = vst.msk [vmem:[#allocation2 + $0x40] sm:$0xff] %vm1367_vm1, %v13251_v1  ;;  %p13188_p11 = scmp.ne.s32.totalorder %s15996_s20, %s13187_s9  ;;  %s13193_s14 = scalar_lea.vmem %s13192_s13, 32 }
  0x1e   : > { %v12911_v15 = vld [vmem:[%s13372_s23 + $0x30] sm:$0xff]   ;;  %v12912_v16 = vld [vmem:[%s13372_s23 + $0x38] sm:$0xff]   ;;  %v12913_v17 = vld [vmem:[%s13372_s23 + $0x40] sm:$0xff]   ;;  %1377 = vst.msk [vmem:[#allocation2 + $0x48] sm:$0xff] %vm1367_vm1, %v13251_v1  ;;  %p13194_p0 = scmp.lt.s32.totalorder %s15996_s20, %s13192_s13  ;;  %p13195_p1 = scmp.lt.s32.totalorder %s13193_s14, %s13187_s9 }
  0x1f   : > { %10334 = vmatpush3.bf16.msra.mxu1 %v13366_v3  ;;  %v12914_v18 = vld [vmem:[%s13372_s23 + $0x48] sm:$0xff]   ;;  %v12915_v19 = vld [vmem:[%s13372_s23 + $0x50] sm:$0xff]   ;;  %v12916_v20 = vld [vmem:[%s13372_s23 + $0x58] sm:$0xff]   ;;  %1378 = vst.msk [vmem:[#allocation2 + $0x50] sm:$0xff] %vm1367_vm1, %v13251_v1  ;;  %p13189_p12 = pnand %p13188_p11, %p13332_p5 }
  0x20   : > { %10335 = vmatprep.subr.bf16.mxu1 %v13251_v1  ;;  %v12917_v21 = vld [vmem:[%s13372_s23 + $0x60] ss:$0 sps:$4 sm:$0x33]   ;;  %v12918_v22 = vld [vmem:[%s13372_s23 + $0x64] sm:$0xff]   ;;  %v12919_v23 = vld [vmem:[%s13372_s23 + $0x6c] sm:$0xff]   ;;  %1379 = vst.msk [vmem:[#allocation2 + $0x58] sm:$0xff] %vm1367_vm1, %v13251_v1  ;;  %p13196_p2 = por %p13195_p1, %p13194_p0 }
  0x21   : > { %v12920_v24 = vld [vmem:[%s13372_s23 + $0x74] sm:$0xff]   ;;  %v12921_v25 = vld [vmem:[%s13372_s23 + $0x7c] sm:$0xff]   ;;  %v12922_v26 = vld [vmem:[%s13372_s23 + $0x84] sm:$0xff]   ;;  %1380 = vst.msk [vmem:[#allocation2 + $0x60] sm:$0xff] %vm1367_vm1, %v13251_v1  ;;  %p13190_p13 = pneg %p13189_p12 }
  0x22   : > { %v12923_v27 = vld [vmem:[%s13372_s23 + $0x8c] sm:$0xff]   ;;  %v12924_v28 = vld [vmem:[%s13372_s23 + $0x94] sm:$0xff]   ;;  %v12925_v29 = vld [vmem:[%s13372_s23 + $0x9c] sm:$0xff]   ;;  %1381 = vst.msk [vmem:[#allocation2 + $0x68] sm:$0xff] %vm1367_vm1, %v13251_v1 }
  0x23   : > { %10336 = vmatpush3.bf16.msra.mxu1 %v13378_v4  ;;  %v12926_v30 = vld [vmem:[%s13372_s23 + $0xa4] sm:$0xff]   ;;  %v12927_v31 = vld [vmem:[%s13372_s23 + $0xac] sm:$0xff]   ;;  %v12928_v32 = vld [vmem:[%s13372_s23 + $0xb4] sm:$0xff]   ;;  %1382 = vst.msk [vmem:[#allocation2 + $0x70] sm:$0xff] %vm1367_vm1, %v13251_v1  ;;  %p13197_p3 = pnand %p13196_p2, %p13190_p13 }
  0x24   : > { %10337 = vmatprep.subr.bf16.mxu1 %v13251_v1  ;;  %v12929_v33 = vld [vmem:[%s13372_s23 + $0xbc] sm:$0xff]   ;;  %v12930_v34 = vld [vmem:[%s13372_s23 + $0xc4] ss:$0 sps:$4 sm:$0x33]   ;;  %v12931_v35 = vld [vmem:[%s13372_s23 + $0xc8] sm:$0xff]   ;;  %1383 = vst.msk [vmem:[#allocation2 + $0x78] sm:$0xff] %vm1367_vm1, %v13251_v1 }
  0x25   : > { %v12932_v39 = vld [vmem:[%s13372_s23 + $0xd0] sm:$0xff]   ;;  %v12933_v46 = vld [vmem:[%s13372_s23 + $0xd8] sm:$0xff]   ;;  %v12934_v53 = vld [vmem:[%s13372_s23 + $0xe0] sm:$0xff]   ;;  %1384 = vst.msk [vmem:[#allocation2 + $0x80] sm:$0xff] %vm1367_vm1, %v13251_v1 }
  0x26   : > { %v12935_v60 = vld [vmem:[%s13372_s23 + $0xe8] sm:$0xff]   ;;  %1385 = vst.msk [vmem:[#allocation2 + $0x88] sm:$0xff] %vm1367_vm1, %v13251_v1  ;;  %1386 = vst.msk [vmem:[#allocation2 + $0x90] sm:$0xff] %vm1367_vm1, %v13251_v1 }
  0x27   : > { %10338 = vmatpush3.bf16.msra.mxu1 %v13385_v5  ;;  %1387 = vst.msk [vmem:[#allocation2 + $0x98] sm:$0xff] %vm1367_vm1, %v13251_v1  ;;  %1388 = vst.msk [vmem:[#allocation2 + $0xa0] sm:$0xff] %vm1367_vm1, %v13251_v1 }
  0x28   : > { %10339 = vmatprep.subr.bf16.mxu1 %v13251_v1  ;;  %1389 = vst.msk [vmem:[#allocation2 + $0xa8] sm:$0xff] %vm1367_vm1, %v13251_v1  ;;  %1390 = vst.msk [vmem:[#allocation2 + $0xb0] sm:$0xff] %vm1367_vm1, %v13251_v1 }
  0x29   : > { %1391 = vst.msk [vmem:[#allocation2 + $0xb8] sm:$0xff] %vm1367_vm1, %v13251_v1  ;;  %1392 = vst.msk [vmem:[#allocation2 + $0xc0] sm:$0xff] %vm1367_vm1, %v13251_v1 }
  0x2b   : > { %10340 = vmatpush3.bf16.msra.mxu1 %v13392_v6 }
  0x2c   : > { %10341 = vmatprep.subr.bf16.mxu1 %v13251_v1 }
  0x2f   : > { %10342 = vmatpush3.bf16.msra.mxu1 %v13398_v7 }
  0x30   : > { %10343 = vmatprep.subr.bf16.mxu1 %v13251_v1 }
  0x33   : > { %10344 = vmatpush3.bf16.msra.mxu1 %v13406_v8 }
  0x34   : > { %10397 = vmatprep.subr.bf16.mxu1 %v13251_v1 }
  0x36   : > { %10346 = vmatmul.mubr.bf16.vlgmr.msra.gmra.mrb[0].mxu1 %v12905_v9 }
  0x37   : > { %10398 = vmatpush3.bf16.msra.mxu1 %v13345_v0  ;;  %10349 = vmatprep.mubr.msk.bf16.mxu1 %vm13252_vm0, %v13251_v1 }
  0x38   : > { %10399 = vmatprep.subr.bf16.mxu1 %v13251_v1 }
  0x3b   : > { %10400 = vmatpush3.bf16.msra.mxu1 %v13353_v2 }
  0x3c   : > { %10401 = vmatprep.subr.bf16.mxu1 %v13251_v1 }
  0x3e   : > { %10350 = vmatmul.mubr.bf16.gmra.mrb[4].mxu1 %v12906_v10 }
  0x3f   : > { %10353 = vmatprep.mubr.msk.bf16.mxu1 %vm13252_vm0, %v13251_v1  ;;  %10402 = vmatpush3.bf16.msra.mxu1 %v13366_v3 }
  0x40   : > { %10403 = vmatprep.subr.bf16.mxu1 %v13251_v1 }
  0x43   : > { %10404 = vmatpush3.bf16.msra.mxu1 %v13378_v4 }
  0x44   : > { %10405 = vmatprep.subr.bf16.mxu1 %v13251_v1 }
  0x46   : > { %10354 = vmatmul.mubr.bf16.gmra.mrb[8].mxu1 %v12907_v11 }
  0x47   : > { %10357 = vmatprep.mubr.msk.bf16.mxu1 %vm13252_vm0, %v13251_v1  ;;  %10406 = vmatpush3.bf16.msra.mxu1 %v13385_v5 }
  0x48   : > { %10407 = vmatprep.subr.bf16.mxu1 %v13251_v1 }
  0x4b   : > { %10408 = vmatpush3.bf16.msra.mxu1 %v13392_v6 }
  0x4c   : > { %10409 = vmatprep.subr.bf16.mxu1 %v13251_v1 }
  0x4e   : > { %10358 = vmatmul.mubr.bf16.gmra.mrb[12].mxu1 %v12908_v12 }
  0x4f   : > { %10361 = vmatprep.mubr.msk.bf16.mxu1 %vm13252_vm0, %v13251_v1  ;;  %10410 = vmatpush3.bf16.msra.mxu1 %v13398_v7 }
  0x50   : > { %10411 = vmatprep.subr.bf16.mxu1 %v13251_v1 }
  0x53   : > { %10412 = vmatpush3.bf16.msra.mxu1 %v13406_v8 }
  0x54   : > { %10465 = vmatprep.subr.bf16.mxu1 %v13251_v1 }
  0x56   : > { %10362 = vmatmul.mubr.bf16.gmra.mrb[16].mxu1 %v12909_v13  ;;  %v12938_v13 = vld [vmem:[%s13372_s23 + $0x100] sm:$0xff]  }
  0x57   : > { %10365 = vmatprep.mubr.msk.bf16.mxu1 %vm13252_vm0, %v13251_v1 }
  0x5e   : > { %10366 = vmatmul.mubr.bf16.gmra.mrb[20].mxu1 %v12910_v14 }
  0x5f   : > { %10369 = vmatprep.mubr.msk.bf16.mxu1 %vm13252_vm0, %v13251_v1 }
  0x66   : > { %10370 = vmatmul.mubr.bf16.gmra.mrb[24].mxu1 %v12911_v15 }
  0x67   : > { %10373 = vmatprep.mubr.msk.bf16.mxu1 %vm13252_vm0, %v13251_v1 }
  0x6e   : > { %10374 = vmatmul.mubr.bf16.gmra.mrb[28].mxu1 %v12912_v16 }
  0x6f   : > { %10377 = vmatprep.mubr.msk.bf16.mxu1 %vm13252_vm0, %v13251_v1 }
  0x76   : > { %10378 = vmatmul.mubr.bf16.gmra.mrb[32].mxu1 %v12913_v17 }
  0x77   : > { %10381 = vmatprep.mubr.msk.bf16.mxu1 %vm13252_vm0, %v13251_v1 }
  0x7e   : > { %10382 = vmatmul.mubr.bf16.gmra.mrb[36].mxu1 %v12914_v18  ;;  %v12939_v18 = vld [vmem:[%s13372_s23 + $0x108] sm:$0xff]  }
  0x7f   : > { %10385 = vmatprep.mubr.msk.bf16.mxu1 %vm13252_vm0, %v13251_v1 }
  0x86   : > { %10386 = vmatmul.mubr.bf16.gmra.mrb[40].mxu1 %v12915_v19 }
  0x87   : > { %10389 = vmatprep.mubr.msk.bf16.mxu1 %vm13252_vm0, %v13251_v1 }
  0x8e   : > { %10390 = vmatmul.mubr.bf16.gmra.mrb[44].mxu1 %v12916_v20 }
  0x8f   : > { %10393 = vmatprep.mubr.msk.bf16.mxu1 %vm13252_vm0, %v13251_v1 }
  0x96   : > { %10394 = vmatmul.mubr.bf16.gmra.mrb[48].mxu1 %v12917_v21 }
  0x97   : > { %10413 = vmatprep.mubr.msk.bf16.mxu1 %vm13252_vm0, %v13251_v1 }
  0x9e   : > { %10414 = vmatmul.mubr.bf16.vlgmr.msra.gmra.mrb[52].mxu1 %v12918_v22 }
  0x9f   : > { %10466 = vmatpush3.bf16.msra.mxu1 %v13345_v0  ;;  %10417 = vmatprep.mubr.msk.bf16.mxu1 %vm13252_vm0, %v13251_v1 }
  0xa0   : > { %10467 = vmatprep.subr.bf16.mxu1 %v13251_v1 }
  0xa3   : > { %10468 = vmatpush3.bf16.msra.mxu1 %v13353_v2 }
  0xa4   : > { %10469 = vmatprep.subr.bf16.mxu1 %v13251_v1 }
  0xa6   : > { %10418 = vmatmul.mubr.bf16.gmra.mrb[56].mxu1 %v12919_v23  ;;  %v12940_v23 = vld [vmem:[%s13372_s23 + $0x110] sm:$0xff]  }
  0xa7   : > { %10421 = vmatprep.mubr.msk.bf16.mxu1 %vm13252_vm0, %v13251_v1  ;;  %10470 = vmatpush3.bf16.msra.mxu1 %v13366_v3  ;;  %v12936_v3 = vld [vmem:[%s13372_s23 + $0xf0] sm:$0xff]  }
  0xa8   : > { %10471 = vmatprep.subr.bf16.mxu1 %v13251_v1 }
  0xab   : > { %10472 = vmatpush3.bf16.msra.mxu1 %v13378_v4 }
  0xac   : > { %10473 = vmatprep.subr.bf16.mxu1 %v13251_v1 }
  0xae   : > { %10422 = vmatmul.mubr.bf16.gmra.mrb[60].mxu1 %v12920_v24 }
  0xaf   : > { %10425 = vmatprep.mubr.msk.bf16.mxu1 %vm13252_vm0, %v13251_v1  ;;  %10474 = vmatpush3.bf16.msra.mxu1 %v13385_v5 }
  0xb0   : > { %10475 = vmatprep.subr.bf16.mxu1 %v13251_v1 }
  0xb3   : > { %10476 = vmatpush3.bf16.msra.mxu1 %v13392_v6 }
  0xb4   : > { %10477 = vmatprep.subr.bf16.mxu1 %v13251_v1 }
  0xb6   : > { %10426 = vmatmul.mubr.bf16.gmra.mrb[64].mxu1 %v12921_v25 }
  0xb7   : > { %10429 = vmatprep.mubr.msk.bf16.mxu1 %vm13252_vm0, %v13251_v1  ;;  %10478 = vmatpush3.bf16.msra.mxu1 %v13398_v7 }
  0xb8   : > { %10479 = vmatprep.subr.bf16.mxu1 %v13251_v1 }
  0xbb   : > { %10480 = vmatpush3.bf16.msra.mxu1 %v13406_v8  ;;  %v12937_v8 = vld [vmem:[%s13372_s23 + $0xf8] sm:$0xff]  }
  0xbc   : > { %10533 = vmatprep.subr.bf16.mxu1 %v13251_v1 }
  0xbe   : > { %10430 = vmatmul.mubr.bf16.gmra.mrb[68].mxu1 %v12922_v26 }
  0xbf   : > { %10433 = vmatprep.mubr.msk.bf16.mxu1 %vm13252_vm0, %v13251_v1 }
  0xc6   : > { %10434 = vmatmul.mubr.bf16.gmra.mrb[72].mxu1 %v12923_v27 }
  0xc7   : > { %10437 = vmatprep.mubr.msk.bf16.mxu1 %vm13252_vm0, %v13251_v1 }
  0xce   : > { %10438 = vmatmul.mubr.bf16.gmra.mrb[76].mxu1 %v12924_v28  ;;  %v12941_v28 = vld [vmem:[%s13372_s23 + $0x118] sm:$0xff]  }
  0xcf   : > { %10441 = vmatprep.mubr.msk.bf16.mxu1 %vm13252_vm0, %v13251_v1 }
  0xd6   : > { %10442 = vmatmul.mubr.bf16.gmra.mrb[80].mxu1 %v12925_v29 }
  0xd7   : > { %10445 = vmatprep.mubr.msk.bf16.mxu1 %vm13252_vm0, %v13251_v1 }
  0xde   : > { %10446 = vmatmul.mubr.bf16.gmra.mrb[84].mxu1 %v12926_v30 }
  0xdf   : > { %10449 = vmatprep.mubr.msk.bf16.mxu1 %vm13252_vm0, %v13251_v1 }
  0xe6   : > { %10450 = vmatmul.mubr.bf16.gmra.mrb[88].mxu1 %v12927_v31 }
  0xe7   : > { %10453 = vmatprep.mubr.msk.bf16.mxu1 %vm13252_vm0, %v13251_v1 }
  0xee   : > { %10454 = vmatmul.mubr.bf16.gmra.mrb[92].mxu1 %v12928_v32 }
  0xef   : > { %10457 = vmatprep.mubr.msk.bf16.mxu1 %vm13252_vm0, %v13251_v1 }
  0xf6   : > { %10458 = vmatmul.mubr.bf16.gmra.mrb[96].mxu1 %v12929_v33  ;;  %v12942_v33 = vld [vmem:[%s13372_s23 + $0x120] sm:$0xff]  }
  0xf7   : > { %10461 = vmatprep.mubr.msk.bf16.mxu1 %vm13252_vm0, %v13251_v1 }
  0xfe   : > { %10462 = vmatmul.mubr.bf16.gmra.mrb[100].mxu1 %v12930_v34 }
  0xff   : > { %10481 = vmatprep.mubr.msk.bf16.mxu1 %vm13252_vm0, %v13251_v1 }
 0x106   : > { %10482 = vmatmul.mubr.bf16.vlgmr.msra.gmra.mrb[104].mxu1 %v12931_v35 }
 0x107   : > { %10534 = vmatpush3.bf16.msra.mxu1 %v13161_v36  ;;  %10485 = vmatprep.mubr.msk.bf16.mxu1 %vm13252_vm0, %v13251_v1 }
 0x108   : > { %10535 = vmatprep.subr.bf16.mxu1 %v13251_v1 }
 0x109   : > { %v13528_v37 = vpop.f32.mrb[0].mxu1 }
 0x10a   : > { %v10347_v38 = vpop.f32.mrb[1].mxu1 }
 0x10b   : > { %v13531_v40 = vpop.f32.mrb[2].mxu1  ;;  %10536 = vmatpush3.bf16.msra.mxu1 %v13162_v41 }
 0x10c   : > { %v10348_v42 = vpop.f32.mrb[3].mxu1  ;;  %10537 = vmatprep.subr.bf16.mxu1 %v13251_v1 }
 0x10e   : > { %10486 = vmatmul.mubr.bf16.gmra.mrb[108].mxu1 %v12932_v39  ;;  %v12943_v39 = vld [vmem:[%s13372_s23 + $0x128] ss:$0 sps:$4 sm:$0x33]  }
 0x10f   : > { %10489 = vmatprep.mubr.msk.bf16.mxu1 %vm13252_vm0, %v13251_v1  ;;  %10538 = vmatpush3.bf16.msra.mxu1 %v13163_v43 }
 0x110   : > { %10539 = vmatprep.subr.bf16.mxu1 %v13251_v1 }
 0x111   : > { %v13543_v44 = vpop.f32.mrb[4].mxu1 }
 0x112   : > { %v10351_v45 = vpop.f32.mrb[5].mxu1 }
 0x113   : > { %v13546_v47 = vpop.f32.mrb[6].mxu1  ;;  %10540 = vmatpush3.bf16.msra.mxu1 %v13164_v48 }
 0x114   : > { %v10352_v49 = vpop.f32.mrb[7].mxu1  ;;  %10541 = vmatprep.subr.bf16.mxu1 %v13251_v1 }
 0x116   : > { %10490 = vmatmul.mubr.bf16.gmra.mrb[112].mxu1 %v12933_v46  ;;  %v12944_v46 = vld [vmem:[%s13372_s23 + $0x12c] sm:$0xff]  }
 0x117   : > { %10493 = vmatprep.mubr.msk.bf16.mxu1 %vm13252_vm0, %v13251_v1  ;;  %10542 = vmatpush3.bf16.msra.mxu1 %v13165_v50 }
 0x118   : > { %10543 = vmatprep.subr.bf16.mxu1 %v13251_v1 }
 0x119   : > { %v13558_v51 = vpop.f32.mrb[8].mxu1 }
 0x11a   : > { %v10355_v52 = vpop.f32.mrb[9].mxu1 }
 0x11b   : > { %v13561_v54 = vpop.f32.mrb[10].mxu1  ;;  %10544 = vmatpush3.bf16.msra.mxu1 %v13166_v55 }
 0x11c   : > { %v10356_v56 = vpop.f32.mrb[11].mxu1  ;;  %10545 = vmatprep.subr.bf16.mxu1 %v13251_v1 }
 0x11e   : > { %10494 = vmatmul.mubr.bf16.gmra.mrb[116].mxu1 %v12934_v53  ;;  %v12945_v53 = vld [vmem:[%s13372_s23 + $0x134] sm:$0xff]  }
 0x11f   : > { %10497 = vmatprep.mubr.msk.bf16.mxu1 %vm13252_vm0, %v13251_v1  ;;  %10546 = vmatpush3.bf16.msra.mxu1 %v13167_v57 }
 0x120   : > { %10547 = vmatprep.subr.bf16.mxu1 %v13251_v1 }
 0x121   : > { %v13573_v58 = vpop.f32.mrb[12].mxu1 }
 0x122   : > { %v10359_v59 = vpop.f32.mrb[13].mxu1 }
 0x123   : > { %v13576_v61 = vpop.f32.mrb[14].mxu1  ;;  %10548 = vmatpush3.bf16.msra.mxu1 %v13168_v62 }
 0x124   : > { %v10360_v63 = vpop.f32.mrb[15].mxu1  ;;  %10601 = vmatprep.subr.bf16.mxu1 %v13251_v1 }
 0x125   : > { %v12946_v63 = vld [vmem:[%s13372_s23 + $0x13c] sm:$0xff]  }
 0x126   : > { %10498 = vmatmul.mubr.bf16.gmra.mrb[120].mxu1 %v12935_v60 }
 0x127   : > { %10501 = vmatprep.mubr.msk.bf16.mxu1 %vm13252_vm0, %v13251_v1 }
 0x129   : > { %v13584_v0 = vpop.f32.mrb[16].mxu1 }
 0x12a   : > { %v10363_v2 = vpop.f32.mrb[17].mxu1 }
 0x12b   : > { %v13587_v4 = vpop.f32.mrb[18].mxu1 }
 0x12c   : > { %v10364_v5 = vpop.f32.mrb[19].mxu1 }
 0x12e   : > { %10502 = vmatmul.mubr.bf16.gmra.mrb[124].mxu1 %v12936_v3 }
 0x12f   : > { %10505 = vmatprep.mubr.msk.bf16.mxu1 %vm13252_vm0, %v13251_v1 }
 0x131   : > { %v13591_v6 = vpop.f32.mrb[20].mxu1 }
 0x132   : > { %v10367_v7 = vpop.f32.mrb[21].mxu1 }
 0x133   : > { %v13594_v9 = vpop.f32.mrb[22].mxu1 }
 0x134   : > { %v10368_v10 = vpop.f32.mrb[23].mxu1 }
 0x136   : > { %10506 = vmatmul.mubr.bf16.gmra.mrb[128].mxu1 %v12937_v8 }
 0x137   : > { %10509 = vmatprep.mubr.msk.bf16.mxu1 %vm13252_vm0, %v13251_v1 }
 0x139   : > { %v13598_v11 = vpop.f32.mrb[24].mxu1 }
 0x13a   : > { %v10371_v12 = vpop.f32.mrb[25].mxu1 }
 0x13b   : > { %v13601_v14 = vpop.f32.mrb[26].mxu1  ;;  %v12947_v12 = vld [vmem:[%s13372_s23 + $0x144] sm:$0xff]  }
 0x13c   : > { %v10372_v15 = vpop.f32.mrb[27].mxu1 }
 0x13e   : > { %10510 = vmatmul.mubr.bf16.gmra.mrb[132].mxu1 %v12938_v13 }
 0x13f   : > { %10513 = vmatprep.mubr.msk.bf16.mxu1 %vm13252_vm0, %v13251_v1 }
 0x141   : > { %v13605_v16 = vpop.f32.mrb[28].mxu1 }
 0x142   : > { %v10375_v17 = vpop.f32.mrb[29].mxu1 }
 0x143   : > { %v13608_v19 = vpop.f32.mrb[30].mxu1 }
 0x144   : > { %v10376_v20 = vpop.f32.mrb[31].mxu1 }
 0x146   : > { %10514 = vmatmul.mubr.bf16.gmra.mrb[136].mxu1 %v12939_v18 }
 0x147   : > { %10517 = vmatprep.mubr.msk.bf16.mxu1 %vm13252_vm0, %v13251_v1 }
 0x149   : > { %v13612_v21 = vpop.f32.mrb[32].mxu1 }
 0x14a   : > { %v10379_v22 = vpop.f32.mrb[33].mxu1 }
 0x14b   : > { %v13615_v24 = vpop.f32.mrb[34].mxu1 }
 0x14c   : > { %v10380_v25 = vpop.f32.mrb[35].mxu1 }
 0x14e   : > { %10518 = vmatmul.mubr.bf16.gmra.mrb[140].mxu1 %v12940_v23  ;;  %v12948_v23 = vld [vmem:[%s13372_s23 + $0x14c] sm:$0xff]  }
 0x14f   : > { %10521 = vmatprep.mubr.msk.bf16.mxu1 %vm13252_vm0, %v13251_v1 }
 0x151   : > { %v13619_v26 = vpop.f32.mrb[36].mxu1 }
 0x152   : > { %v10383_v27 = vpop.f32.mrb[37].mxu1 }
 0x153   : > { %v13622_v29 = vpop.f32.mrb[38].mxu1 }
 0x154   : > { %v10384_v30 = vpop.f32.mrb[39].mxu1 }
 0x156   : > { %10522 = vmatmul.mubr.bf16.gmra.mrb[144].mxu1 %v12941_v28 }
 0x157   : > { %10525 = vmatprep.mubr.msk.bf16.mxu1 %vm13252_vm0, %v13251_v1 }
 0x159   : > { %v13626_v31 = vpop.f32.mrb[40].mxu1 }
 0x15a   : > { %v10387_v32 = vpop.f32.mrb[41].mxu1 }
 0x15b   : > { %v13629_v34 = vpop.f32.mrb[42].mxu1 }
 0x15c   : > { %v10388_v35 = vpop.f32.mrb[43].mxu1 }
 0x15d   : > { %v12949_v35 = vld [vmem:[%s13372_s23 + $0x154] sm:$0xff]  }
 0x15e   : > { %10526 = vmatmul.mubr.bf16.gmra.mrb[148].mxu1 %v12942_v33 }
 0x15f   : > { %10529 = vmatprep.mubr.msk.bf16.mxu1 %vm13252_vm0, %v13251_v1 }
 0x161   : > { %v13633_v36 = vpop.f32.mrb[44].mxu1 }
 0x162   : > { %v10391_v38 = vpop.f32.mrb[45].mxu1 }
 0x163   : > { %v13636_v41 = vpop.f32.mrb[46].mxu1  ;;  %v12956_v38 = vld [vmem:[%s13372_s23 + $0x18c] ss:$0 sps:$4 sm:$0x33]  }
 0x164   : > { %v10392_v42 = vpop.f32.mrb[47].mxu1 }
 0x166   : > { %10530 = vmatmul.mubr.bf16.gmra.mrb[152].mxu1 %v12943_v39 }
 0x167   : > { %10549 = vmatprep.mubr.msk.bf16.mxu1 %vm13252_vm0, %v13251_v1 }
 0x169   : > { %v13640_v43 = vpop.f32.mrb[48].mxu1 }
 0x16a   : > { %v10395_v45 = vpop.f32.mrb[49].mxu1 }
 0x16b   : > { %v575_v48 = vpop.f32.mrb[50].mxu1  ;;  %v12955_v45 = vld [vmem:[%s13372_s23 + $0x184] sm:$0xff]  }
 0x16c   : > { %v10396_v49 = vpop.f32.mrb[51].mxu1 }
 0x16d   : > { %v12950_v49 = vld [vmem:[%s13372_s23 + $0x15c] sm:$0xff]  }
 0x16e   : > { %10550 = vmatmul.mubr.bf16.vlgmr.msra.gmra.mrb[156].mxu1 %v12944_v46 }
 0x16f   : > { %10553 = vmatprep.mubr.msk.bf16.mxu1 %vm13252_vm0, %v13251_v1 }
 0x171   : > { %v13645_v50 = vpop.f32.mrb[52].mxu1 }
 0x172   : > { %v10415_v52 = vpop.f32.mrb[53].mxu1  ;;  %v816_v55 = vmax.f32 %v13528_v37, %v13645_v50 }
 0x173   : > { %v13650_v56 = vpop.f32.mrb[54].mxu1 }
 0x174   : > { %v10416_v57 = vpop.f32.mrb[55].mxu1  ;;  %v817_v59 = vmax.f32 %v13531_v40, %v13650_v56 }
 0x176   : > { %10554 = vmatmul.mubr.bf16.gmra.mrb[160].mxu1 %v12945_v53 }
 0x177   : > { %10557 = vmatprep.mubr.msk.bf16.mxu1 %vm13252_vm0, %v13251_v1 }
 0x179   : > { %v13656_v60 = vpop.f32.mrb[56].mxu1 }
 0x17a   : > { %v10419_v62 = vpop.f32.mrb[57].mxu1  ;;  %v818_v2 = vmax.f32 %v13543_v44, %v13656_v60 }
 0x17b   : > { %v13661_v3 = vpop.f32.mrb[58].mxu1 }
 0x17c   : > { %v10420_v5 = vpop.f32.mrb[59].mxu1  ;;  %v819_v7 = vmax.f32 %v13546_v47, %v13661_v3 }
 0x17e   : > { %10558 = vmatmul.mubr.bf16.gmra.mrb[164].mxu1 %v12946_v63 }
 0x17f   : > { %10561 = vmatprep.mubr.msk.bf16.mxu1 %vm13252_vm0, %v13251_v1 }
 0x181   : > { %v13667_v8 = vpop.f32.mrb[60].mxu1 }
 0x182   : > { %v10423_v10 = vpop.f32.mrb[61].mxu1  ;;  %v16046_v40 = vmax.f32 %v13558_v51, %v13667_v8 }
 0x183   : > { %v13672_v15 = vpop.f32.mrb[62].mxu1  ;;  %v12951_v10 = vld [vmem:[%s13372_s23 + $0x164] sm:$0xff]  }
 0x184   : > { %v10424_v17 = vpop.f32.mrb[63].mxu1  ;;  %v16047_v44 = vmax.f32 %v13561_v54, %v13672_v15 }
 0x186   : > { %10562 = vmatmul.mubr.bf16.gmra.mrb[168].mxu1 %v12947_v12  ;;  %v12954_v12 = vld [vmem:[%s13372_s23 + $0x17c] sm:$0xff]  }
 0x187   : > { %10565 = vmatprep.mubr.msk.bf16.mxu1 %vm13252_vm0, %v13251_v1 }
 0x189   : > { %v13678_v20 = vpop.f32.mrb[64].mxu1 }
 0x18a   : > { %v10427_v22 = vpop.f32.mrb[65].mxu1  ;;  %v16048_v47 = vmax.f32 %v13573_v58, %v13678_v20 }
 0x18b   : > { %v13683_v27 = vpop.f32.mrb[66].mxu1 }
 0x18c   : > { %v10428_v28 = vpop.f32.mrb[67].mxu1  ;;  %v16049_v51 = vmax.f32 %v13576_v61, %v13683_v27 }
 0x18e   : > { %10566 = vmatmul.mubr.bf16.gmra.mrb[172].mxu1 %v12948_v23 }
 0x18f   : > { %10569 = vmatprep.mubr.msk.bf16.mxu1 %vm13252_vm0, %v13251_v1 }
 0x191   : > { %v13689_v32 = vpop.f32.mrb[68].mxu1 }
 0x192   : > { %v10431_v33 = vpop.f32.mrb[69].mxu1  ;;  %v16050_v54 = vmax.f32 %v13584_v0, %v13689_v32 }
 0x193   : > { %v13694_v39 = vpop.f32.mrb[70].mxu1 }
 0x194   : > { %v10432_v42 = vpop.f32.mrb[71].mxu1  ;;  %v16051_v58 = vmax.f32 %v13587_v4, %v13694_v39 }
 0x196   : > { %10570 = vmatmul.mubr.bf16.gmra.mrb[176].mxu1 %v12949_v35  ;;  %v12952_v35 = vld [vmem:[%s13372_s23 + $0x16c] sm:$0xff]  }
 0x197   : > { %10573 = vmatprep.mubr.msk.bf16.mxu1 %vm13252_vm0, %v13251_v1 }
 0x199   : > { %v13700_v46 = vpop.f32.mrb[72].mxu1 }
 0x19a   : > { %v10435_v48 = vpop.f32.mrb[73].mxu1  ;;  %v16052_v61 = vmax.f32 %v13591_v6, %v13700_v46 }
 0x19b   : > { %v13705_v53 = vpop.f32.mrb[74].mxu1 }
 0x19c   : > { %v10436_v57 = vpop.f32.mrb[75].mxu1  ;;  %v16053_v0 = vmax.f32 %v13594_v9, %v13705_v53 }
 0x19e   : > { %10574 = vmatmul.mubr.bf16.gmra.mrb[180].mxu1 %v12950_v49 }
 0x19f   : > { %10577 = vmatprep.mubr.msk.bf16.mxu1 %vm13252_vm0, %v13251_v1 }
 0x1a1   : > { %v13711_v63 = vpop.f32.mrb[76].mxu1 }
 0x1a2   : > { %v10439_v5 = vpop.f32.mrb[77].mxu1  ;;  %v16054_v4 = vmax.f32 %v13598_v11, %v13711_v63 }
 0x1a3   : > { %v13716_v17 = vpop.f32.mrb[78].mxu1 }
 0x1a4   : > { %v10440_v22 = vpop.f32.mrb[79].mxu1  ;;  %v16055_v6 = vmax.f32 %v13601_v14, %v13716_v17 }
 0x1a5   : > { %v12953_v22 = vld [vmem:[%s13372_s23 + $0x174] sm:$0xff]  }
 0x1a6   : > { %10578 = vmatmul.mubr.bf16.gmra.mrb[184].mxu1 %v12951_v10 }
 0x1a7   : > { %10581 = vmatprep.mubr.msk.bf16.mxu1 %vm13252_vm0, %v13251_v1 }
 0x1a9   : > { %v13722_v28 = vpop.f32.mrb[80].mxu1 }
 0x1aa   : > { %v10443_v33 = vpop.f32.mrb[81].mxu1  ;;  %v16056_v9 = vmax.f32 %v13605_v16, %v13722_v28 }
 0x1ab   : > { %v13727_v48 = vpop.f32.mrb[82].mxu1 }
 0x1ac   : > { %v10444_v49 = vpop.f32.mrb[83].mxu1  ;;  %v16057_v11 = vmax.f32 %v13608_v19, %v13727_v48 }
 0x1ad   : > { %v12957_v49 = vld [vmem:[%s16039_s3 + $0x20] sm:$0xff]  }
 0x1ae   : > { %10582 = vmatmul.mubr.bf16.gmra.mrb[188].mxu1 %v12952_v35 }
 0x1af   : > { %10585 = vmatprep.mubr.msk.bf16.mxu1 %vm13252_vm0, %v13251_v1  ;;  %10602 = vmatpush3.bf16.msra.mxu1 %v12957_v49  ;;  %v12960_v49 = vld [vmem:[%s16039_s3 + $0xc8] sm:$0xff]  }
 0x1b0   : > { %10603 = vmatprep.subr.bf16.mxu1 %v13251_v1 }
 0x1b1   : > { %v13733_v5 = vpop.f32.mrb[84].mxu1 }
 0x1b2   : > { %v10447_v10 = vpop.f32.mrb[85].mxu1  ;;  %v16058_v14 = vmax.f32 %v13612_v21, %v13733_v5 }
 0x1b3   : > { %v13738_v23 = vpop.f32.mrb[86].mxu1 }
 0x1b4   : > { %v10448_v42 = vpop.f32.mrb[87].mxu1  ;;  %v16059_v16 = vmax.f32 %v13615_v24, %v13738_v23 }
 0x1b5   : > { %v12959_v42 = vld [vmem:[%s16039_s3 + $0x28] sm:$0xff]  }
 0x1b6   : > { %10586 = vmatmul.mubr.bf16.gmra.mrb[192].mxu1 %v12953_v22 }
 0x1b7   : > { %10589 = vmatprep.mubr.msk.bf16.mxu1 %vm13252_vm0, %v13251_v1  ;;  %10604 = vmatpush3.bf16.msra.mxu1 %v12959_v42 }
 0x1b8   : > { %10605 = vmatprep.subr.bf16.mxu1 %v13251_v1 }
 0x1b9   : > { %v13744_v35 = vpop.f32.mrb[88].mxu1 }
 0x1ba   : > { %v10451_v57 = vpop.f32.mrb[89].mxu1  ;;  %v16060_v19 = vmax.f32 %v13619_v26, %v13744_v35 }
 0x1bb   : > { %v13749_v62 = vpop.f32.mrb[90].mxu1 }
 0x1bc   : > { %v10452_v33 = vpop.f32.mrb[91].mxu1  ;;  %v16061_v21 = vmax.f32 %v13622_v29, %v13749_v62 }
 0x1be   : > { %10590 = vmatmul.mubr.bf16.gmra.mrb[196].mxu1 %v12954_v12 }
 0x1bf   : > { %10593 = vmatprep.mubr.msk.bf16.mxu1 %vm13252_vm0, %v13251_v1 }
 0x1c1   : > { %v13755_v22 = vpop.f32.mrb[92].mxu1 }
 0x1c2   : > { %v10455_v52 = vpop.f32.mrb[93].mxu1  ;;  %v16062_v24 = vmax.f32 %v13626_v31, %v13755_v22 }
 0x1c3   : > { %v13760_v57 = vpop.f32.mrb[94].mxu1 }
 0x1c4   : > { %v10456_v12 = vpop.f32.mrb[95].mxu1  ;;  %v16063_v26 = vmax.f32 %v13629_v34, %v13760_v57 }
 0x1c5   : > { %v12962_v12 = vld [vmem:[%s16039_s3 + $0xd0] sm:$0xff]  }
 0x1c6   : > { %10594 = vmatmul.mubr.bf16.gmra.mrb[200].mxu1 %v12955_v45  ;;  %v12958_v45 = vld [vmem:[%s16039_s3 + $0xc0] sm:$0xff]  }
 0x1c7   : > { %10597 = vmatprep.mubr.msk.bf16.mxu1 %vm13252_vm0, %v13251_v1  ;;  %10866 = vmatpush3.bf16.msra.mxu0 %v12958_v45 }
 0x1c8   : > { %10867 = vmatprep.subr.bf16.mxu0 %v13251_v1 }
 0x1c9   : > { %v13816_v33 = vpop.f32.mrb[96].mxu1 }
 0x1ca   : > { %v10459_v10 = vpop.f32.mrb[97].mxu1  ;;  %v16064_v29 = vmax.f32 %v13633_v36, %v13816_v33  ;;  %v13991_v33 = vld [vmem:[%s16038_s2] ss:$0 sm:$0xff] }
 0x1cb   : > { %v13824_v30 = vpop.f32.mrb[98].mxu1  ;;  %10868 = vmatpush3.bf16.msra.mxu0 %v12960_v49  ;;  %v12963_v49 = vld [vmem:[%s16039_s3 + $0x38] sm:$0xff]  }
 0x1cc   : > { %v10460_v52 = vpop.f32.mrb[99].mxu1  ;;  %10869 = vmatprep.subr.bf16.mxu0 %v13251_v1  ;;  %v16065_v31 = vmax.f32 %v13636_v41, %v13824_v30 }
 0x1cd   : > { %v12961_v52 = vld [vmem:[%s16039_s3 + $0x30] sm:$0xff]  }
 0x1ce   : > { %10598 = vmatmul.mubr.bf16.gmra.mrb[204].mxu1 %v12956_v38 }
 0x1cf   : > { %10609 = vmatprep.mubr.msk.bf16.mxu1 %vm13252_vm0, %v13251_v1  ;;  %10606 = vmatpush3.bf16.msra.mxu1 %v12961_v52 }
 0x1d0   : > { %10607 = vmatprep.subr.bf16.mxu1 %v13251_v1  ;;  %10870 = vmatpush3.bf16.msra.mxu0 %v12962_v12 }
 0x1d1   : > { %v13842_v10 = vpop.f32.mrb[100].mxu1  ;;  %10871 = vmatprep.subr.bf16.mxu0 %v13251_v1 }
 0x1d2   : > { %v10463_v42 = vpop.f32.mrb[101].mxu1  ;;  %v16066_v34 = vmax.f32 %v13640_v43, %v13842_v10 }
 0x1d3   : > { %v813_v45 = vpop.f32.mrb[102].mxu1  ;;  %10608 = vmatpush3.bf16.msra.mxu1 %v12963_v49  ;;  %v12964_v42 = vld [vmem:[%s16039_s3 + $0xd8] sm:$0xff]  }
 0x1d4   : > { %v10464_v25 = vpop.f32.mrb[103].mxu1  ;;  %10645 = vmatprep.subr.bf16.mxu1 %v13251_v1  ;;  %10872 = vmatpush3.bf16.msra.mxu0 %v12964_v42 }
 0x1d5   : > { %10909 = vmatprep.subr.bf16.mxu0 %v13251_v1 }
 0x1d9   : > { %v977_v52 = vpop.f32.mrb[104].mxu1 }
 0x1da   : > { %v13865_v25 = vmax.f32 %v816_v55, %v977_v52  ;;  %v10483_v12 = vpop.f32.mrb[105].mxu1 }
 0x1db   : > { %v980_v45 = vpop.f32.mrb[106].mxu1 }
 0x1dc   : > { %v13871_v49 = vmax.f32 %v817_v59, %v980_v45  ;;  %v10484_v38 = vpop.f32.mrb[107].mxu1 }
 0x1e1   : > { %v985_v18 = vpop.f32.mrb[108].mxu1 }
 0x1e2   : > { %v13876_v42 = vmax.f32 %v818_v2, %v985_v18  ;;  %v10487_v13 = vpop.f32.mrb[109].mxu1 }
 0x1e3   : > { %v988_v37 = vpop.f32.mrb[110].mxu1 }
 0x1e4   : > { %v13881_v50 = vmax.f32 %v819_v7, %v988_v37  ;;  %v10488_v55 = vpop.f32.mrb[111].mxu1 }
 0x1e9   : > { %v993_v52 = vpop.f32.mrb[112].mxu1 }
 0x1ea   : > { %v13886_v56 = vmax.f32 %v16046_v40, %v993_v52  ;;  %v10491_v59 = vpop.f32.mrb[113].mxu1 }
 0x1eb   : > { %v996_v38 = vpop.f32.mrb[114].mxu1 }
 0x1ec   : > { %v13891_v60 = vmax.f32 %v16047_v44, %v996_v38  ;;  %v10492_v2 = vpop.f32.mrb[115].mxu1 }
 0x1f1   : > { %v1001_v13 = vpop.f32.mrb[116].mxu1 }
 0x1f2   : > { %v13896_v3 = vmax.f32 %v16048_v47, %v1001_v13  ;;  %v10495_v7 = vpop.f32.mrb[117].mxu1 }
 0x1f3   : > { %v1004_v18 = vpop.f32.mrb[118].mxu1 }
 0x1f4   : > { %v13901_v8 = vmax.f32 %v16049_v51, %v1004_v18  ;;  %v10496_v12 = vpop.f32.mrb[119].mxu1 }
 0x1f9   : > { %v1009_v45 = vpop.f32.mrb[120].mxu1 }
 0x1fa   : > { %v13906_v15 = vmax.f32 %v16050_v54, %v1009_v45  ;;  %v10499_v37 = vpop.f32.mrb[121].mxu1 }
 0x1fb   : > { %v1012_v55 = vpop.f32.mrb[122].mxu1 }
 0x1fc   : > { %v13911_v20 = vmax.f32 %v16051_v58, %v1012_v55  ;;  %v10500_v52 = vpop.f32.mrb[123].mxu1 }
 0x201   : > { %v1017_v40 = vpop.f32.mrb[124].mxu1 }
 0x202   : > { %v13916_v27 = vmax.f32 %v16052_v61, %v1017_v40  ;;  %v10503_v59 = vpop.f32.mrb[125].mxu1 }
 0x203   : > { %v1020_v38 = vpop.f32.mrb[126].mxu1 }
 0x204   : > { %v13921_v32 = vmax.f32 %v16053_v0, %v1020_v38  ;;  %v10504_v44 = vpop.f32.mrb[127].mxu1 }
 0x209   : > { %v1025_v2 = vpop.f32.mrb[128].mxu1 }
 0x20a   : > { %v13926_v39 = vmax.f32 %v16054_v4, %v1025_v2  ;;  %v10507_v13 = vpop.f32.mrb[129].mxu1 }
 0x20b   : > { %v1028_v47 = vpop.f32.mrb[130].mxu1 }
 0x20c   : > { %v13931_v46 = vmax.f32 %v16055_v6, %v1028_v47  ;;  %v10508_v7 = vpop.f32.mrb[131].mxu1 }
 0x211   : > { %v1033_v18 = vpop.f32.mrb[132].mxu1 }
 0x212   : > { %v13936_v53 = vmax.f32 %v16056_v9, %v1033_v18  ;;  %v10511_v51 = vpop.f32.mrb[133].mxu1 }
 0x213   : > { %v1036_v12 = vpop.f32.mrb[134].mxu1 }
 0x214   : > { %v13941_v63 = vmax.f32 %v16057_v11, %v1036_v12  ;;  %v10512_v45 = vpop.f32.mrb[135].mxu1 }
 0x219   : > { %v1041_v54 = vpop.f32.mrb[136].mxu1 }
 0x21a   : > { %v13946_v17 = vmax.f32 %v16058_v14, %v1041_v54  ;;  %v10515_v37 = vpop.f32.mrb[137].mxu1 }
 0x21b   : > { %v1044_v55 = vpop.f32.mrb[138].mxu1 }
 0x21c   : > { %v13951_v28 = vmax.f32 %v16059_v16, %v1044_v55  ;;  %v10516_v58 = vpop.f32.mrb[139].mxu1 }
 0x221   : > { %v1049_v52 = vpop.f32.mrb[140].mxu1 }
 0x222   : > { %v13956_v48 = vmax.f32 %v16060_v19, %v1049_v52  ;;  %v10519_v40 = vpop.f32.mrb[141].mxu1 }
 0x223   : > { %v1052_v61 = vpop.f32.mrb[142].mxu1 }
 0x224   : > { %v13961_v5 = vmax.f32 %v16061_v21, %v1052_v61  ;;  %v10520_v59 = vpop.f32.mrb[143].mxu1 }
 0x229   : > { %v1057_v38 = vpop.f32.mrb[144].mxu1 }
 0x22a   : > { %v13966_v23 = vmax.f32 %v16062_v24, %v1057_v38  ;;  %v10523_v0 = vpop.f32.mrb[145].mxu1 }
 0x22b   : > { %v1060_v44 = vpop.f32.mrb[146].mxu1 }
 0x22c   : > { %v13971_v35 = vmax.f32 %v16063_v26, %v1060_v44  ;;  %v10524_v2 = vpop.f32.mrb[147].mxu1 }
 0x231   : > { %v1065_v4 = vpop.f32.mrb[148].mxu1 }
 0x232   : > { %v13976_v62 = vmax.f32 %v16064_v29, %v1065_v4  ;;  %v10527_v13 = vpop.f32.mrb[149].mxu1  ;;  %v12972_v29 = vld [vmem:[%s16039_s3] sm:$0xff]  }
 0x233   : > { %v1068_v47 = vpop.f32.mrb[150].mxu1 }
 0x234   : > { %v13981_v22 = vmax.f32 %v16065_v31, %v1068_v47  ;;  %v10528_v6 = vpop.f32.mrb[151].mxu1 }
 0x239   : > { %v1073_v7 = vpop.f32.mrb[152].mxu1 }
 0x23a   : > { %v13986_v57 = vmax.f32 %v16066_v34, %v1073_v7  ;;  %v10531_v18 = vpop.f32.mrb[153].mxu1 }
 0x23b   : > { %v1076_v9 = vpop.f32.mrb[154].mxu1 }
 0x23c   : > { %v10532_v51 = vpop.f32.mrb[155].mxu1 }
 0x23d   : > { %v12973_v51 = vld [vmem:[%s16039_s3 + $0x8] sm:$0xff]  }
 0x241   : > { %v1240_v36 = vpop.f32.mrb[156].mxu1 }
 0x242   : > { %v1342_v41 = vmax.f32 %v13865_v25, %v1240_v36  ;;  %v10551_v30 = vpop.f32.mrb[157].mxu1 }
 0x243   : > { %v1243_v12 = vpop.f32.mrb[158].mxu1  ;;  %v12966_v30 = vld [vmem:[%s16039_s3 + $0xe8] sm:$0xff]  }
 0x244   : > { %v1400_v11 = vadd.f32 %v13991_v33, %v1342_v41  ;;  %v1343_v45 = vmax.f32 %v13871_v49, %v1243_v12  ;;  %v10552_v43 = vpop.f32.mrb[159].mxu1 }
 0x245   : > { %v12974_v43 = vld [vmem:[%s16039_s3 + $0x10] sm:$0xff]  }
 0x246   : > { %v1425_v10 = vmax.f32 %v1400_v11, 0.0  ;;  %v1401_v54 = vadd.f32 %v13991_v33, %v1343_v45 }
 0x248   : > { %1450 = vst.msk [vmem:[#allocation2] sm:$0xff] %vm1367_vm1, %v1425_v10  ;;  %v1426_v14 = vmax.f32 %v1401_v54, 0.0 }
 0x249   : > { %v1248_v37 = vpop.f32.mrb[160].mxu1 }
 0x24a   : > { %1451 = vst.msk [vmem:[#allocation2 + $0x8] sm:$0xff] %vm1367_vm1, %v1426_v14  ;;  %v1344_v55 = vmax.f32 %v13876_v42, %v1248_v37  ;;  %v10555_v16 = vpop.f32.mrb[161].mxu1 }
 0x24b   : > { %v1251_v25 = vpop.f32.mrb[162].mxu1  ;;  %v12967_v16 = vld [vmem:[%s16039_s3 + $0xf0] sm:$0xff]  }
 0x24c   : > { %v1402_v58 = vadd.f32 %v13991_v33, %v1344_v55  ;;  %v1345_v52 = vmax.f32 %v13881_v50, %v1251_v25  ;;  %v10556_v19 = vpop.f32.mrb[163].mxu1 }
 0x24e   : > { %v1427_v49 = vmax.f32 %v1402_v58, 0.0  ;;  %v1403_v40 = vadd.f32 %v13991_v33, %v1345_v52 }
 0x250   : > { %1452 = vst.msk [vmem:[#allocation2 + $0x10] sm:$0xff] %vm1367_vm1, %v1427_v49  ;;  %v1428_v61 = vmax.f32 %v1403_v40, 0.0  ;;  %v12975_v49 = vld [vmem:[%s16039_s3 + $0x18] sm:$0xff]  }
 0x251   : > { %v1256_v21 = vpop.f32.mrb[164].mxu1  ;;  %v1511_v2 = vld [vmem:[#allocation2 + $0x1] sm:$0xff] }
 0x252   : > { %1453 = vst.msk [vmem:[#allocation2 + $0x18] sm:$0xff] %vm1367_vm1, %v1428_v61  ;;  %v1346_v59 = vmax.f32 %v13886_v56, %v1256_v21  ;;  %v10559_v38 = vpop.f32.mrb[165].mxu1  ;;  %v12968_v21 = vld [vmem:[%s16039_s3 + $0xf8] sm:$0xff]  }
 0x253   : > { %v1259_v42 = vpop.f32.mrb[166].mxu1 }
 0x254   : > { %v1404_v24 = vadd.f32 %v13991_v33, %v1346_v59  ;;  %v1347_v0 = vmax.f32 %v13891_v60, %v1259_v42  ;;  %v10560_v44 = vpop.f32.mrb[167].mxu1  ;;  %v12965_v60 = vld [vmem:[%s16039_s3 + $0xe0] sm:$0xff]  }
 0x256   : > { %v1429_v50 = vmax.f32 %v1404_v24, 0.0  ;;  %v1405_v26 = vadd.f32 %v13991_v33, %v1347_v0 }
 0x257   : > { %v1512_v4 = vld [vmem:[#allocation2 + $0x9] sm:$0xff] }
 0x258   : > { %1454 = vst.msk [vmem:[#allocation2 + $0x20] sm:$0xff] %vm1367_vm1, %v1429_v50  ;;  %v1430_v13 = vmax.f32 %v1405_v26, 0.0  ;;  %v1529_v56 = vpack.c.bf16 %v1512_v4, %v1511_v2  ;;  %v2699_v31 = vld [vmem:[#allocation2 + $0xf] sm:$0xff]  ;;  %v12969_v2 = vld [vmem:[%s16039_s3 + $0x100] sm:$0xff]  }
 0x259   : > { %v1264_v47 = vpop.f32.mrb[168].mxu1  ;;  %v2700_v6 = vld [vmem:[#allocation2 + $0x17] sm:$0xff] }
 0x25a   : > { %1455 = vst.msk [vmem:[#allocation2 + $0x28] sm:$0xff] %vm1367_vm1, %v1430_v13  ;;  %v1348_v7 = vmax.f32 %v13896_v3, %v1264_v47  ;;  %v10563_v34 = vpop.f32.mrb[169].mxu1  ;;  %10610 = vmatmul.mubr.msk.bf16.vlgmr.msra.gmra.mrb[208].mxu1 %vm1367_vm1, %v1529_v56  ;;  %v2717_v18 = vpack.c.bf16 %v2700_v6, %v2699_v31  ;;  %v1513_v45 = vld [vmem:[#allocation2 + $0x11] sm:$0xff]  ;;  %v12970_v6 = vld [vmem:[%s16039_s3 + $0x108] sm:$0xff]  }
 0x25b   : > { %v1267_v9 = vpop.f32.mrb[170].mxu1  ;;  %10613 = vmatprep.mubr.msk.bf16.mxu1 %vm13252_vm0, %v13251_v1  ;;  %10646 = vmatpush3.bf16.msra.mxu1 %v12972_v29  ;;  %v2910_v24 = vld [vmem:[#allocation2 + $0x18] sm:$0xff]  ;;  %v2909_v26 = vld [vmem:[#allocation2 + $0x10] sm:$0xff] }
 0x25c   : > { %v1406_v36 = vadd.f32 %v13991_v33, %v1348_v7  ;;  %v1349_v41 = vmax.f32 %v13901_v8, %v1267_v9  ;;  %10874 = vmatmul.mubr.msk.bf16.vlgmr.msra.gmra.mrb[0].mxu0 %vm1367_vm1, %v2717_v18  ;;  %v10564_v3 = vpop.f32.mrb[171].mxu1  ;;  %10647 = vmatprep.subr.bf16.mxu1 %v13251_v1  ;;  %v14077_v13 = vpack.c.bf16 %v2910_v24, %v2909_v26 }
 0x25d   : > { %10910 = vmatpush3.bf16.msra.mxu0 %v12965_v60  ;;  %10877 = vmatprep.mubr.msk.bf16.mxu0 %vm13252_vm0, %v13251_v1  ;;  %v12971_v3 = vld [vmem:[%s16039_s3 + $0x110] sm:$0xff]  }
 0x25e   : > { %v1431_v12 = vmax.f32 %v1406_v36, 0.0  ;;  %v1407_v11 = vadd.f32 %v13991_v33, %v1349_v41  ;;  %10911 = vmatprep.subr.bf16.mxu0 %v13251_v1 }
 0x25f   : > { %v1514_v8 = vld [vmem:[#allocation2 + $0x19] sm:$0xff]  ;;  %10648 = vmatpush3.bf16.msra.mxu1 %v12973_v51 }
 0x260   : > { %1456 = vst.msk [vmem:[#allocation2 + $0x30] sm:$0xff] %vm1367_vm1, %v1431_v12  ;;  %v1432_v10 = vmax.f32 %v1407_v11, 0.0  ;;  %v14039_v54 = vpack.c.bf16 %v1514_v8, %v1513_v45  ;;  %10649 = vmatprep.subr.bf16.mxu1 %v13251_v1  ;;  %v2701_v37 = vld [vmem:[#allocation2 + $0x1f] sm:$0xff] }
 0x261   : > { %v1272_v14 = vpop.f32.mrb[172].mxu1  ;;  %10912 = vmatpush3.bf16.msra.mxu0 %v12966_v30  ;;  %v2702_v55 = vld [vmem:[#allocation2 + $0x27] sm:$0xff] }
 0x262   : > { %1457 = vst.msk [vmem:[#allocation2 + $0x38] sm:$0xff] %vm1367_vm1, %v1432_v10  ;;  %v1350_v25 = vmax.f32 %v13906_v15, %v1272_v14  ;;  %v10567_v58 = vpop.f32.mrb[173].mxu1  ;;  %10614 = vmatmul.mubr.msk.bf16.gmra.mrb[212].mxu1 %vm1367_vm1, %v14039_v54  ;;  %v2718_v52 = vpack.c.bf16 %v2702_v55, %v2701_v37  ;;  %10913 = vmatprep.subr.bf16.mxu0 %v13251_v1  ;;  %v1515_v42 = vld [vmem:[#allocation2 + $0x21] sm:$0xff]  ;;  %v12976_v37 = vld [vmem:[%s16039_s3 + $0x118] sm:$0xff]   ;;  %v13035_v55 = vld [vmem:[%s16039_s3 + $0x270] sm:$0xff]  }
 0x263   : > { %v1275_v19 = vpop.f32.mrb[174].mxu1  ;;  %10617 = vmatprep.mubr.msk.bf16.mxu1 %vm13252_vm0, %v13251_v1  ;;  %10650 = vmatpush3.bf16.msra.mxu1 %v12974_v43  ;;  %v2911_v41 = vld [vmem:[#allocation2 + $0x20] sm:$0xff] }
 0x264   : > { %v1408_v40 = vadd.f32 %v13991_v33, %v1350_v25  ;;  %v1351_v15 = vmax.f32 %v13911_v20, %v1275_v19  ;;  %10878 = vmatmul.mubr.msk.bf16.gmra.mrb[4].mxu0 %vm1367_vm1, %v2718_v52  ;;  %v10568_v61 = vpop.f32.mrb[175].mxu1  ;;  %10651 = vmatprep.subr.bf16.mxu1 %v13251_v1 }
 0x265   : > { %10914 = vmatpush3.bf16.msra.mxu0 %v12967_v16  ;;  %10917 = vmatprep.mubr.msk.bf16.mxu0 %vm13252_vm0, %v13251_v1 }
 0x266   : > { %v1433_v59 = vmax.f32 %v1408_v40, 0.0  ;;  %v1409_v38 = vadd.f32 %v13991_v33, %v1351_v15  ;;  %10915 = vmatprep.subr.bf16.mxu0 %v13251_v1 }
 0x267   : > { %v1516_v20 = vld [vmem:[#allocation2 + $0x29] sm:$0xff]  ;;  %10652 = vmatpush3.bf16.msra.mxu1 %v12975_v49 }
 0x268   : > { %1458 = vst.msk [vmem:[#allocation2 + $0x40] sm:$0xff] %vm1367_vm1, %v1433_v59  ;;  %v1434_v0 = vmax.f32 %v1409_v38, 0.0  ;;  %v14067_v44 = vpack.c.bf16 %v1516_v20, %v1515_v42  ;;  %10689 = vmatprep.subr.bf16.mxu1 %v13251_v1  ;;  %v2913_v15 = vld [vmem:[#allocation2 + $0x30] sm:$0xff] }
 0x269   : > { %v1280_v50 = vpop.f32.mrb[176].mxu1  ;;  %10916 = vmatpush3.bf16.msra.mxu0 %v12968_v21  ;;  %v1517_v34 = vld [vmem:[#allocation2 + $0x31] sm:$0xff] }
 0x26a   : > { %1459 = vst.msk [vmem:[#allocation2 + $0x48] sm:$0xff] %vm1367_vm1, %v1434_v0  ;;  %v1352_v4 = vmax.f32 %v13916_v27, %v1280_v50  ;;  %v10571_v29 = vpop.f32.mrb[177].mxu1  ;;  %10618 = vmatmul.mubr.msk.bf16.gmra.mrb[216].mxu1 %vm1367_vm1, %v14067_v44  ;;  %10953 = vmatprep.subr.bf16.mxu0 %v13251_v1  ;;  %v14112_v10 = vld [vmem:[#allocation2 + $0x38] sm:$0xff] }
 0x26b   : > { %v1283_v56 = vpop.f32.mrb[178].mxu1  ;;  %10621 = vmatprep.mubr.msk.bf16.mxu1 %vm13252_vm0, %v13251_v1  ;;  %v2914_v52 = vld [vmem:[#allocation2 + $0x38] sm:$0xff] }
 0x26c   : > { %v1410_v47 = vadd.f32 %v13991_v33, %v1352_v4  ;;  %v1353_v31 = vmax.f32 %v13921_v32, %v1283_v56  ;;  %10918 = vmatmul.mubr.msk.bf16.vlgmr.msra.gmra.mrb[0].mxu0 %vm1367_vm1, %v14077_v13  ;;  %v10572_v27 = vpop.f32.mrb[179].mxu1  ;;  %v2912_v32 = vld [vmem:[#allocation2 + $0x28] sm:$0xff]  ;;  %v14132_v59 = vpack.c.bf16 %v2914_v52, %v2913_v15 }
 0x26d   : > { %10954 = vmatpush3.bf16.msra.mxu0 %v12969_v2  ;;  %10921 = vmatprep.mubr.msk.bf16.mxu0 %vm13252_vm0, %v13251_v1  ;;  %v14103_v11 = vpack.c.bf16 %v2912_v32, %v2911_v41  ;;  %v5219_v41 = vld [vmem:[#allocation2 + $0x2d] sm:$0xff] }
 0x26e   : > { %v1435_v60 = vmax.f32 %v1410_v47, 0.0  ;;  %v1411_v7 = vadd.f32 %v13991_v33, %v1353_v31  ;;  %10955 = vmatprep.subr.bf16.mxu0 %v13251_v1 }
 0x26f   : > { %v1518_v18 = vld [vmem:[#allocation2 + $0x39] sm:$0xff] }
 0x270   : > { %1460 = vst.msk [vmem:[#allocation2 + $0x50] sm:$0xff] %vm1367_vm1, %v1435_v60  ;;  %v1436_v9 = vmax.f32 %v1411_v7, 0.0  ;;  %v14094_v51 = vpack.c.bf16 %v1518_v18, %v1517_v34  ;;  %v14114_v14 = vld [vmem:[#allocation2 + $0x40] sm:$0xff] }
 0x271   : > { %v1288_v36 = vpop.f32.mrb[180].mxu1  ;;  %10956 = vmatpush3.bf16.msra.mxu0 %v12970_v6  ;;  %v1519_v25 = vld [vmem:[#allocation2 + $0x41] sm:$0xff] }
 0x272   : > { %1461 = vst.msk [vmem:[#allocation2 + $0x58] sm:$0xff] %vm1367_vm1, %v1436_v9  ;;  %v1354_v30 = vmax.f32 %v13926_v39, %v1288_v36  ;;  %v10575_v12 = vpop.f32.mrb[181].mxu1  ;;  %10622 = vmatmul.mubr.msk.bf16.gmra.mrb[220].mxu1 %vm1367_vm1, %v14094_v51  ;;  %10957 = vmatprep.subr.bf16.mxu0 %v13251_v1  ;;  %v14141_v24 = vld [vmem:[#allocation2 + $0x48] sm:$0xff]  ;;  %v2915_v27 = vld [vmem:[#allocation2 + $0x40] sm:$0xff] }
 0x273   : > { %v1291_v45 = vpop.f32.mrb[182].mxu1  ;;  %10625 = vmatprep.mubr.msk.bf16.mxu1 %vm13252_vm0, %v13251_v1  ;;  %v5221_v50 = vld [vmem:[#allocation2 + $0x3d] sm:$0xff] }
 0x274   : > { %v1412_v8 = vadd.f32 %v13991_v33, %v1354_v30  ;;  %v1355_v43 = vmax.f32 %v13931_v46, %v1291_v45  ;;  %10922 = vmatmul.mubr.msk.bf16.gmra.mrb[4].mxu0 %vm1367_vm1, %v14103_v11  ;;  %v10576_v39 = vpop.f32.mrb[183].mxu1 }
 0x275   : > { %10925 = vmatprep.mubr.msk.bf16.mxu0 %vm13252_vm0, %v13251_v1  ;;  %10958 = vmatpush3.bf16.msra.mxu0 %v12971_v3 }
 0x276   : > { %v1437_v46 = vmax.f32 %v1412_v8, 0.0  ;;  %v1413_v16 = vadd.f32 %v13991_v33, %v1355_v43  ;;  %10959 = vmatprep.subr.bf16.mxu0 %v13251_v1 }
 0x277   : > { %v1520_v58 = vld [vmem:[#allocation2 + $0x49] sm:$0xff] }
 0x278   : > { %1462 = vst.msk [vmem:[#allocation2 + $0x60] sm:$0xff] %vm1367_vm1, %v1437_v46  ;;  %v1438_v19 = vmax.f32 %v1413_v16, 0.0  ;;  %v14126_v49 = vpack.c.bf16 %v1520_v58, %v1519_v25  ;;  %v14143_v0 = vld [vmem:[#allocation2 + $0x50] sm:$0xff] }
 0x279   : > { %v1296_v40 = vpop.f32.mrb[184].mxu1  ;;  %10960 = vmatpush3.bf16.msra.mxu0 %v12976_v37  ;;  %v1521_v4 = vld [vmem:[#allocation2 + $0x51] sm:$0xff] }
 0x27a   : > { %1463 = vst.msk [vmem:[#allocation2 + $0x68] sm:$0xff] %vm1367_vm1, %v1438_v19  ;;  %v1356_v61 = vmax.f32 %v13936_v53, %v1296_v40  ;;  %v10579_v21 = vpop.f32.mrb[185].mxu1  ;;  %10626 = vmatmul.mubr.msk.bf16.gmra.mrb[224].mxu1 %vm1367_vm1, %v14126_v49  ;;  %10997 = vmatprep.subr.bf16.mxu0 %v13251_v1  ;;  %v14165_v36 = vld [vmem:[#allocation2 + $0x58] sm:$0xff]  ;;  %v2917_v37 = vld [vmem:[#allocation2 + $0x50] sm:$0xff] }
 0x27b   : > { %v1299_v38 = vpop.f32.mrb[186].mxu1  ;;  %10629 = vmatprep.mubr.msk.bf16.mxu1 %vm13252_vm0, %v13251_v1 }
 0x27c   : > { %v1414_v42 = vadd.f32 %v13991_v33, %v1356_v61  ;;  %v1357_v20 = vmax.f32 %v13941_v63, %v1299_v38  ;;  %10926 = vmatmul.mubr.msk.bf16.gmra.mrb[8].mxu0 %vm1367_vm1, %v14132_v59  ;;  %v10580_v53 = vpop.f32.mrb[187].mxu1  ;;  %v2916_v63 = vld [vmem:[#allocation2 + $0x48] sm:$0xff]  ;;  %v5220_v61 = vld [vmem:[#allocation2 + $0x35] sm:$0xff] }
 0x27d   : > { %10929 = vmatprep.mubr.msk.bf16.mxu0 %vm13252_vm0, %v13251_v1  ;;  %v14157_v7 = vpack.c.bf16 %v2916_v63, %v2915_v27 }
 0x27e   : > { %v1439_v26 = vmax.f32 %v1414_v42, 0.0  ;;  %v1415_v2 = vadd.f32 %v13991_v33, %v1357_v20 }
 0x27f   : > { %v1522_v29 = vld [vmem:[#allocation2 + $0x59] sm:$0xff] }
 0x280   : > { %1464 = vst.msk [vmem:[#allocation2 + $0x70] sm:$0xff] %vm1367_vm1, %v1439_v26  ;;  %v1440_v56 = vmax.f32 %v1415_v2, 0.0  ;;  %v14151_v47 = vpack.c.bf16 %v1522_v29, %v1521_v4  ;;  %v2919_v4 = vld [vmem:[#allocation2 + $0x60] sm:$0xff] }
 0x281   : > { %v1304_v31 = vpop.f32.mrb[188].mxu1  ;;  %v1523_v12 = vld [vmem:[#allocation2 + $0x61] sm:$0xff] }
 0x282   : > { %1465 = vst.msk [vmem:[#allocation2 + $0x78] sm:$0xff] %vm1367_vm1, %v1440_v56  ;;  %v1358_v6 = vmax.f32 %v13946_v17, %v1304_v31  ;;  %v10583_v60 = vpop.f32.mrb[189].mxu1  ;;  %10630 = vmatmul.mubr.msk.bf16.gmra.mrb[228].mxu1 %vm1367_vm1, %v14151_v47  ;;  %v14167_v17 = vld [vmem:[#allocation2 + $0x60] sm:$0xff]  ;;  %v14189_v15 = vld [vmem:[#allocation2 + $0x68] sm:$0xff] }
 0x283   : > { %v1307_v34 = vpop.f32.mrb[190].mxu1  ;;  %10633 = vmatprep.mubr.msk.bf16.mxu1 %vm13252_vm0, %v13251_v1 }
 0x284   : > { %v1416_v18 = vadd.f32 %v13991_v33, %v1358_v6  ;;  %v1359_v32 = vmax.f32 %v13951_v28, %v1307_v34  ;;  %10930 = vmatmul.mubr.msk.bf16.gmra.mrb[12].mxu0 %vm1367_vm1, %v14157_v7  ;;  %v10584_v9 = vpop.f32.mrb[191].mxu1  ;;  %v2918_v28 = vld [vmem:[#allocation2 + $0x58] sm:$0xff] }
 0x285   : > { %10933 = vmatprep.mubr.msk.bf16.mxu0 %vm13252_vm0, %v13251_v1  ;;  %v14181_v25 = vpack.c.bf16 %v2918_v28, %v2917_v37 }
 0x286   : > { %v1441_v3 = vmax.f32 %v1416_v18, 0.0  ;;  %v1417_v30 = vadd.f32 %v13991_v33, %v1359_v32 }
 0x287   : > { %v1524_v45 = vld [vmem:[#allocation2 + $0x69] sm:$0xff] }
 0x288   : > { %1466 = vst.msk [vmem:[#allocation2 + $0x80] sm:$0xff] %vm1367_vm1, %v1441_v3  ;;  %v1442_v8 = vmax.f32 %v1417_v30, 0.0  ;;  %v14175_v43 = vpack.c.bf16 %v1524_v45, %v1523_v12 }
 0x289   : > { %v1312_v39 = vpop.f32.mrb[192].mxu1  ;;  %v1525_v42 = vld [vmem:[#allocation2 + $0x71] sm:$0xff] }
 0x28a   : > { %1467 = vst.msk [vmem:[#allocation2 + $0x88] sm:$0xff] %vm1367_vm1, %v1442_v8  ;;  %v1360_v46 = vmax.f32 %v13956_v48, %v1312_v39  ;;  %v10587_v16 = vpop.f32.mrb[193].mxu1  ;;  %10634 = vmatmul.mubr.msk.bf16.gmra.mrb[232].mxu1 %vm1367_vm1, %v14175_v43  ;;  %v14191_v48 = vld [vmem:[#allocation2 + $0x70] sm:$0xff]  ;;  %v14218_v9 = vld [vmem:[#allocation2 + $0x78] sm:$0xff] }
 0x28b   : > { %v1315_v58 = vpop.f32.mrb[194].mxu1  ;;  %10637 = vmatprep.mubr.msk.bf16.mxu1 %vm13252_vm0, %v13251_v1  ;;  %v2922_v30 = vld [vmem:[#allocation2 + $0x78] sm:$0xff]  ;;  %v2921_v8 = vld [vmem:[#allocation2 + $0x70] sm:$0xff] }
 0x28c   : > { %v1418_v52 = vadd.f32 %v13991_v33, %v1360_v46  ;;  %v1361_v19 = vmax.f32 %v13961_v5, %v1315_v58  ;;  %10934 = vmatmul.mubr.msk.bf16.gmra.mrb[16].mxu0 %vm1367_vm1, %v14181_v25  ;;  %v10588_v40 = vpop.f32.mrb[195].mxu1  ;;  %v2920_v5 = vld [vmem:[#allocation2 + $0x68] sm:$0xff]  ;;  %v14229_v46 = vpack.c.bf16 %v2922_v30, %v2921_v8  ;;  %v12982_v8 = vld [vmem:[%s16039_s3 + $0x50] sm:$0xff]  }
 0x28d   : > { %10937 = vmatprep.mubr.msk.bf16.mxu0 %vm13252_vm0, %v13251_v1  ;;  %v14205_v56 = vpack.c.bf16 %v2920_v5, %v2919_v4  ;;  %v1477_v40 = vld [vmem:[#allocation2 + $0x8] sm:$0xff] }
 0x28e   : > { %v1443_v21 = vmax.f32 %v1418_v52, 0.0  ;;  %v1419_v38 = vadd.f32 %v13991_v33, %v1361_v19 }
 0x28f   : > { %v1526_v20 = vld [vmem:[#allocation2 + $0x79] sm:$0xff] }
 0x290   : > { %1468 = vst.msk [vmem:[#allocation2 + $0x90] sm:$0xff] %vm1367_vm1, %v1443_v21  ;;  %v1444_v53 = vmax.f32 %v1419_v38, 0.0  ;;  %v14199_v26 = vpack.c.bf16 %v1526_v20, %v1525_v42  ;;  %v14220_v3 = vld [vmem:[#allocation2 + $0x80] sm:$0xff] }
 0x291   : > { %v1320_v2 = vpop.f32.mrb[196].mxu1  ;;  %v14213_v34 = vld [vmem:[#allocation2 + $0x81] sm:$0xff] }
 0x292   : > { %1469 = vst.msk [vmem:[#allocation2 + $0x98] sm:$0xff] %vm1367_vm1, %v1444_v53  ;;  %v1362_v29 = vmax.f32 %v13966_v23, %v1320_v2  ;;  %v10591_v63 = vpop.f32.mrb[197].mxu1  ;;  %10638 = vmatmul.mubr.msk.bf16.gmra.mrb[236].mxu1 %vm1367_vm1, %v14199_v26  ;;  %v1528_v23 = vld [vmem:[#allocation2 + $0x89] sm:$0xf]  ;;  %v1476_v20 = vld [vmem:[#allocation2] sm:$0xff] }
 0x293   : > { %v1323_v31 = vpop.f32.mrb[198].mxu1  ;;  %10641 = vmatprep.mubr.msk.bf16.mxu1 %vm13252_vm0, %v13251_v1  ;;  %v1537_v45 = vpack.c.bf16 %v1528_v23, %v14213_v34  ;;  %v14242_v42 = vld [vmem:[#allocation2 + $0x88] sm:$0xff]  ;;  %v1494_v4 = vpack.c.bf16 %v1477_v40, %v1476_v20 }
 0x294   : > { %v1420_v27 = vadd.f32 %v13991_v33, %v1362_v29  ;;  %v1363_v6 = vmax.f32 %v13971_v35, %v1323_v31  ;;  %10938 = vmatmul.mubr.msk.bf16.gmra.mrb[20].mxu0 %vm1367_vm1, %v14205_v56  ;;  %v10592_v60 = vpop.f32.mrb[199].mxu1  ;;  %v2924_v5 = vld [vmem:[#allocation2 + $0x88] sm:$0xff] }
 0x295   : > { %10941 = vmatprep.mubr.msk.bf16.mxu0 %vm13252_vm0, %v13251_v1  ;;  %v1863_v20 = vld [vmem:[#allocation2 + $0x22] sm:$0xff] }
 0x296   : > { %v1445_v18 = vmax.f32 %v1420_v27, 0.0  ;;  %v1421_v32 = vadd.f32 %v13991_v33, %v1363_v6  ;;  %v14254_v27 = vld [vmem:[#allocation2 + $0x80] sm:$0xff] }
 0x297   : > { %v2934_v23 = vpack.c.bf16 %v2924_v5, %v14254_v27  ;;  %v5019_v6 = vld [vmem:[#allocation2 + $0x7c] sm:$0xff]  ;;  %v5021_v53 = vld [vmem:[#allocation2 + $0x8c] sm:$0xff] }
 0x298   : > { %1470 = vst.msk [vmem:[#allocation2 + $0xa0] sm:$0xff] %vm1367_vm1, %v1445_v18  ;;  %v1446_v12 = vmax.f32 %v1421_v32, 0.0  ;;  %v12981_v32 = vld [vmem:[%s16039_s3 + $0x48] sm:$0xff]  }
 0x299   : > { %v1328_v28 = vpop.f32.mrb[200].mxu1  ;;  %v14250_v29 = vld [vmem:[#allocation2 + $0x98] sm:$0xff] }
 0x29a   : > { %1471 = vst.msk [vmem:[#allocation2 + $0xa8] sm:$0xff] %vm1367_vm1, %v1446_v12  ;;  %v1364_v39 = vmax.f32 %v13976_v62, %v1328_v28  ;;  %v10595_v37 = vpop.f32.mrb[201].mxu1  ;;  %10642 = vmatmul.mubr.msk.bf16.gmra.mrb[240].mxu1 %vm1367_vm1, %v1537_v45  ;;  %v14239_v62 = vld [vmem:[#allocation2 + $0x90] sm:$0xff]  ;;  %v2926_v28 = vld [vmem:[#allocation2 + $0x98] sm:$0xf] }
 0x29b   : > { %v1331_v16 = vpop.f32.mrb[202].mxu1  ;;  %10653 = vmatprep.mubr.msk.bf16.mxu1 %vm13252_vm0, %v13251_v1  ;;  %v12983_v37 = vld [vmem:[%s16039_s3 + $0x58] sm:$0xff]  }
 0x29c   : > { %v1422_v58 = vadd.f32 %v13991_v33, %v1364_v39  ;;  %v1365_v52 = vmax.f32 %v13981_v22, %v1331_v16  ;;  %10942 = vmatmul.mubr.msk.bf16.gmra.mrb[24].mxu0 %vm1367_vm1, %v14229_v46  ;;  %v10596_v19 = vpop.f32.mrb[203].mxu1  ;;  %v12980_v22 = vld [vmem:[%s16039_s3 + $0x40] sm:$0xff]   ;;  %v12978_v16 = vld [vmem:[%s16039_s3 + $0x128] sm:$0xff]  }
 0x29d   : > { %10945 = vmatprep.mubr.msk.bf16.mxu0 %vm13252_vm0, %v13251_v1 }
 0x29e   : > { %v1447_v21 = vmax.f32 %v1422_v58, 0.0  ;;  %v1423_v38 = vadd.f32 %v13991_v33, %v1365_v52  ;;  %v3135_v58 = vld [vmem:[#allocation2 + $0x91] sm:$0xff]  ;;  %v3136_v52 = vld [vmem:[#allocation2 + $0x99] sm:$0xf] }
 0x29f   : > { %v14252_v63 = vld [vmem:[#allocation2 + $0xa0] sm:$0xff]  ;;  %v3145_v40 = vpack.c.bf16 %v3136_v52, %v3135_v58  ;;  %v12998_v58 = vld [vmem:[%s16039_s3 + $0x90] sm:$0xff]  }
 0x2a0   : > { %1472 = vst.msk [vmem:[#allocation2 + $0xb0] sm:$0xff] %vm1367_vm1, %v1447_v21  ;;  %v1448_v2 = vmax.f32 %v1423_v38, 0.0  ;;  %v12991_v21 = vld [vmem:[%s16039_s3 + $0x78] sm:$0xff]   ;;  %v1864_v38 = vld [vmem:[#allocation2 + $0x2a] sm:$0xff] }
 0x2a1   : > { %v1336_v31 = vpop.f32.mrb[204].mxu1  ;;  %v1879_v5 = vpack.c.bf16 %v1864_v38, %v1863_v20  ;;  %v14474_v38 = vld [vmem:[#allocation2 + $0x24] sm:$0xff]  ;;  %v5023_v35 = vld [vmem:[#allocation2 + $0x9c] sm:$0xff] }
 0x2a2   : > { %1473 = vst.msk [vmem:[#allocation2 + $0xb8] sm:$0xff] %vm1367_vm1, %v1448_v2  ;;  %v1366_v60 = vmax.f32 %v13986_v57, %v1336_v31  ;;  %10654 = vmatmul.mubr.msk.bf16.vlgmr.msra.gmra.mrb[208].mxu1 %vm1367_vm1, %v1494_v4  ;;  %v10599_v18 = vpop.f32.mrb[205].mxu1  ;;  %v1866_v2 = vld [vmem:[#allocation2 + $0x3a] sm:$0xff]  ;;  %v12986_v4 = vld [vmem:[%s16039_s3 + $0x148] sm:$0xff]   ;;  %v1865_v31 = vld [vmem:[#allocation2 + $0x32] sm:$0xff] }
 0x2a3   : > { %10657 = vmatprep.mubr.msk.bf16.mxu1 %vm13252_vm0, %v13251_v1  ;;  %10690 = vmatpush3.bf16.msra.mxu1 %v12980_v22  ;;  %v1339_v30 = vpop.f32.mrb[206].mxu1  ;;  %v12985_v22 = vld [vmem:[%s16039_s3 + $0x140] sm:$0xff]   ;;  %v12992_v18 = vld [vmem:[%s16039_s3 + $0x158] sm:$0xff]  }
 0x2a4   : > { %v1424_v12 = vadd.f32 %v13991_v33, %v1366_v60  ;;  %10946 = vmatmul.mubr.msk.bf16.gmra.mrb[28].mxu0 %vm1367_vm1, %v2934_v23  ;;  %10691 = vmatprep.subr.bf16.mxu1 %v13251_v1  ;;  %v10600_v57 = vpop.f32.mrb[207].mxu1  ;;  %v2925_v33 = vld [vmem:[#allocation2 + $0x90] sm:$0xff] }
 0x2a5   : > { %10949 = vmatprep.mubr.msk.bf16.mxu0 %vm13252_vm0, %v13251_v1  ;;  %v2935_v39 = vpack.c.bf16 %v2926_v28, %v2925_v33  ;;  %v12987_v60 = vld [vmem:[%s16039_s3 + $0x150] sm:$0xff]  }
 0x2a6   : > { %v1449_v45 = vmax.f32 %v1424_v12, 0.0  ;;  %v1868_v23 = vld [vmem:[#allocation2 + $0x4a] sm:$0xff]  ;;  %v1870_v12 = vld [vmem:[#allocation2 + $0x5a] sm:$0xff]  ;;  %v1869_v57 = vld [vmem:[#allocation2 + $0x52] sm:$0xff] }
 0x2a7   : > { %10692 = vmatpush3.bf16.msra.mxu1 %v12981_v32  ;;  %v1867_v32 = vld [vmem:[#allocation2 + $0x42] sm:$0xff]  ;;  %v1872_v28 = vld [vmem:[#allocation2 + $0x6a] sm:$0xff] }
 0x2a8   : > { %1475 = vst.msk [vmem:[#allocation2 + $0xc0] sm:$0xf] %vm1474_vm2, %v1449_v45  ;;  %10693 = vmatprep.subr.bf16.mxu1 %v13251_v1  ;;  %v1881_v30 = vpack.c.bf16 %v1868_v23, %v1867_v32  ;;  %v1882_v45 = vpack.c.bf16 %v1870_v12, %v1869_v57  ;;  %v12995_v32 = vld [vmem:[%s16039_s3 + $0x170] sm:$0xff]   ;;  %v13000_v57 = vld [vmem:[%s16039_s3 + $0x178] sm:$0xff]  }
 0x2a9   : > { %v2078_v12 = vld [vmem:[#allocation2 + $0x4b] sm:$0xff] }
 0x2aa   : > { %10658 = vmatmul.mubr.msk.bf16.gmra.mrb[212].mxu1 %vm1367_vm1, %v14077_v13  ;;  %v12977_v13 = vld [vmem:[%s16039_s3 + $0x120] sm:$0xff]  }
 0x2ab   : > { %10661 = vmatprep.mubr.msk.bf16.mxu1 %vm13252_vm0, %v13251_v1  ;;  %10694 = vmatpush3.bf16.msra.mxu1 %v12982_v8  ;;  %v1871_v8 = vld [vmem:[#allocation2 + $0x62] sm:$0xff] }
 0x2ac   : > { %10950 = vmatmul.mubr.msk.bf16.gmra.mrb[32].mxu0 %vm1367_vm1, %v2935_v39  ;;  %10695 = vmatprep.subr.bf16.mxu1 %v13251_v1  ;;  %v1883_v33 = vpack.c.bf16 %v1872_v28, %v1871_v8  ;;  %v1874_v39 = vld [vmem:[#allocation2 + $0x7a] sm:$0xff]  ;;  %v14514_v28 = vld [vmem:[#allocation2 + $0x44] sm:$0xff] }
 0x2ad   : > { %10961 = vmatprep.mubr.msk.bf16.mxu0 %vm13252_vm0, %v13251_v1 }
 0x2af   : > { %10696 = vmatpush3.bf16.msra.mxu1 %v12983_v37  ;;  %v1873_v37 = vld [vmem:[#allocation2 + $0x72] sm:$0xff] }
 0x2b0   : > { %10733 = vmatprep.subr.bf16.mxu1 %v13251_v1 }
 0x2b2   : > { %10662 = vmatmul.mubr.msk.bf16.gmra.mrb[216].mxu1 %vm1367_vm1, %v14103_v11  ;;  %v12979_v11 = vld [vmem:[%s16039_s3 + $0x130] sm:$0xff]  }
 0x2b3   : > { %10665 = vmatprep.mubr.msk.bf16.mxu1 %vm13252_vm0, %v13251_v1 }
 0x2b4   : > { %10962 = vmatmul.mubr.msk.bf16.vlgmr.msra.gmra.mrb[0].mxu0 %vm1367_vm1, %v14039_v54  ;;  %v12984_v54 = vld [vmem:[%s16039_s3 + $0x138] sm:$0xff]  }
 0x2b5   : > { %10998 = vmatpush3.bf16.msra.mxu0 %v12977_v13  ;;  %10965 = vmatprep.mubr.msk.bf16.mxu0 %vm13252_vm0, %v13251_v1  ;;  %v1884_v13 = vpack.c.bf16 %v1874_v39, %v1873_v37  ;;  %v2080_v37 = vld [vmem:[#allocation2 + $0x5b] sm:$0xff] }
 0x2b6   : > { %10999 = vmatprep.subr.bf16.mxu0 %v13251_v1 }
 0x2b9   : > { %11000 = vmatpush3.bf16.msra.mxu0 %v12978_v16  ;;  %v1875_v16 = vld [vmem:[#allocation2 + $0x82] sm:$0xff] }
 0x2ba   : > { %10666 = vmatmul.mubr.msk.bf16.gmra.mrb[220].mxu1 %vm1367_vm1, %v14132_v59  ;;  %11001 = vmatprep.subr.bf16.mxu0 %v13251_v1  ;;  %v1859_v59 = vld [vmem:[#allocation2 + $0x2] sm:$0xff] }
 0x2bb   : > { %10669 = vmatprep.mubr.msk.bf16.mxu1 %vm13252_vm0, %v13251_v1 }
 0x2bc   : > { %10966 = vmatmul.mubr.msk.bf16.gmra.mrb[4].mxu0 %vm1367_vm1, %v14067_v44  ;;  %v1493_v44 = vld [vmem:[#allocation2 + $0x88] sm:$0xf] }
 0x2bd   : > { %10969 = vmatprep.mubr.msk.bf16.mxu0 %vm13252_vm0, %v13251_v1  ;;  %11002 = vmatpush3.bf16.msra.mxu0 %v12979_v11  ;;  %v1876_v11 = vld [vmem:[#allocation2 + $0x8a] sm:$0xf] }
 0x2be   : > { %11003 = vmatprep.subr.bf16.mxu0 %v13251_v1 }
 0x2c1   : > { %11004 = vmatpush3.bf16.msra.mxu0 %v12984_v54  ;;  %v1885_v54 = vpack.c.bf16 %v1876_v11, %v1875_v16 }
 0x2c2   : > { %10670 = vmatmul.mubr.msk.bf16.gmra.mrb[224].mxu1 %vm1367_vm1, %v14157_v7  ;;  %11041 = vmatprep.subr.bf16.mxu0 %v13251_v1  ;;  %v12988_v7 = vld [vmem:[%s16039_s3 + $0x60] sm:$0xff]  }
 0x2c3   : > { %10673 = vmatprep.mubr.msk.bf16.mxu1 %vm13252_vm0, %v13251_v1 }
 0x2c4   : > { %10970 = vmatmul.mubr.msk.bf16.gmra.mrb[8].mxu0 %vm1367_vm1, %v14094_v51  ;;  %v1502_v51 = vpack.c.bf16 %v1493_v44, %v14254_v27  ;;  %v1880_v27 = vpack.c.bf16 %v1866_v2, %v1865_v31  ;;  %v2070_v44 = vld [vmem:[#allocation2 + $0xb] sm:$0xff] }
 0x2c5   : > { %10973 = vmatprep.mubr.msk.bf16.mxu0 %vm13252_vm0, %v13251_v1  ;;  %v12994_v31 = vld [vmem:[%s16039_s3 + $0x168] sm:$0xff]  }
 0x2ca   : > { %10674 = vmatmul.mubr.msk.bf16.gmra.mrb[228].mxu1 %vm1367_vm1, %v14181_v25 }
 0x2cb   : > { %10677 = vmatprep.mubr.msk.bf16.mxu1 %vm13252_vm0, %v13251_v1 }
 0x2cc   : > { %10974 = vmatmul.mubr.msk.bf16.gmra.mrb[12].mxu0 %vm1367_vm1, %v14126_v49  ;;  %v1860_v49 = vld [vmem:[#allocation2 + $0xa] sm:$0xff] }
 0x2cd   : > { %10977 = vmatprep.mubr.msk.bf16.mxu0 %vm13252_vm0, %v13251_v1 }
 0x2d2   : > { %10678 = vmatmul.mubr.msk.bf16.gmra.mrb[232].mxu1 %vm1367_vm1, %v14205_v56  ;;  %v1862_v56 = vld [vmem:[#allocation2 + $0x1a] sm:$0xff] }
 0x2d3   : > { %10681 = vmatprep.mubr.msk.bf16.mxu1 %vm13252_vm0, %v13251_v1 }
 0x2d4   : > { %10978 = vmatmul.mubr.msk.bf16.gmra.mrb[16].mxu0 %vm1367_vm1, %v14151_v47  ;;  %v3134_v47 = vld [vmem:[#allocation2 + $0x89] sm:$0xff] }
 0x2d5   : > { %10981 = vmatprep.mubr.msk.bf16.mxu0 %vm13252_vm0, %v13251_v1  ;;  %v3144_v25 = vpack.c.bf16 %v3134_v47, %v14213_v34  ;;  %v12990_v34 = vld [vmem:[%s16039_s3 + $0x70] sm:$0xff]  }
 0x2da   : > { %10682 = vmatmul.mubr.msk.bf16.gmra.mrb[236].mxu1 %vm1367_vm1, %v14229_v46  ;;  %v1861_v46 = vld [vmem:[#allocation2 + $0x12] sm:$0xff] }
 0x2db   : > { %10685 = vmatprep.mubr.msk.bf16.mxu1 %vm13252_vm0, %v13251_v1  ;;  %v1878_v19 = vpack.c.bf16 %v1862_v56, %v1861_v46  ;;  %v3345_v56 = vld [vmem:[#allocation2 + $0x92] sm:$0xff]  ;;  %v3346_v46 = vld [vmem:[#allocation2 + $0x9a] sm:$0xf] }
 0x2dc   : > { %10982 = vmatmul.mubr.msk.bf16.gmra.mrb[20].mxu0 %vm1367_vm1, %v14175_v43  ;;  %v1877_v43 = vpack.c.bf16 %v1860_v49, %v1859_v59  ;;  %v3344_v49 = vld [vmem:[#allocation2 + $0x8a] sm:$0xff]  ;;  %v12996_v59 = vld [vmem:[%s16039_s3 + $0x80] sm:$0xff]  }
 0x2dd   : > { %10985 = vmatprep.mubr.msk.bf16.mxu0 %vm13252_vm0, %v13251_v1 }
 0x2e2   : > { %10686 = vmatmul.mubr.msk.bf16.gmra.mrb[240].mxu1 %vm1367_vm1, %v1502_v51  ;;  %v2069_v51 = vld [vmem:[#allocation2 + $0x3] sm:$0xff] }
 0x2e3   : > { %10697 = vmatprep.mubr.msk.bf16.mxu1 %vm13252_vm0, %v13251_v1  ;;  %v2087_v47 = vpack.c.bf16 %v2070_v44, %v2069_v51  ;;  %v2082_v51 = vld [vmem:[#allocation2 + $0x6b] sm:$0xff] }
 0x2e4   : > { %10986 = vmatmul.mubr.msk.bf16.gmra.mrb[24].mxu0 %vm1367_vm1, %v14199_v26  ;;  %v12989_v26 = vld [vmem:[%s16039_s3 + $0x68] sm:$0xff]  }
 0x2e5   : > { %10989 = vmatprep.mubr.msk.bf16.mxu0 %vm13252_vm0, %v13251_v1 }
 0x2ea   : > { %10698 = vmatmul.mubr.msk.bf16.vlgmr.msra.gmra.mrb[208].mxu1 %vm1367_vm1, %v1877_v43  ;;  %v12997_v43 = vld [vmem:[%s16039_s3 + $0x88] sm:$0xff]  }
 0x2eb   : > { %10701 = vmatprep.mubr.msk.bf16.mxu1 %vm13252_vm0, %v13251_v1  ;;  %10734 = vmatpush3.bf16.msra.mxu1 %v12988_v7  ;;  %v3354_v7 = vpack.c.bf16 %v3344_v49, %v1875_v16  ;;  %v14527_v16 = vld [vmem:[#allocation2 + $0x54] sm:$0xff]  ;;  %v2081_v49 = vld [vmem:[#allocation2 + $0x63] sm:$0xff] }
 0x2ec   : > { %10990 = vmatmul.mubr.msk.bf16.gmra.mrb[28].mxu0 %vm1367_vm1, %v3144_v25  ;;  %10735 = vmatprep.subr.bf16.mxu1 %v13251_v1  ;;  %v2072_v25 = vld [vmem:[#allocation2 + $0x1b] sm:$0xff] }
 0x2ed   : > { %10993 = vmatprep.mubr.msk.bf16.mxu0 %vm13252_vm0, %v13251_v1 }
 0x2ef   : > { %10736 = vmatpush3.bf16.msra.mxu1 %v12989_v26  ;;  %v2071_v26 = vld [vmem:[#allocation2 + $0x13] sm:$0xff] }
 0x2f0   : > { %10737 = vmatprep.subr.bf16.mxu1 %v13251_v1  ;;  %v2088_v52 = vpack.c.bf16 %v2072_v25, %v2071_v26  ;;  %v2084_v25 = vld [vmem:[#allocation2 + $0x7b] sm:$0xff]  ;;  %v2083_v26 = vld [vmem:[#allocation2 + $0x73] sm:$0xff] }
 0x2f2   : > { %10702 = vmatmul.mubr.msk.bf16.gmra.mrb[212].mxu1 %vm1367_vm1, %v1878_v19 }
 0x2f3   : > { %10705 = vmatprep.mubr.msk.bf16.mxu1 %vm13252_vm0, %v13251_v1  ;;  %10738 = vmatpush3.bf16.msra.mxu1 %v12990_v34  ;;  %v3355_v34 = vpack.c.bf16 %v3346_v46, %v3345_v56  ;;  %v14551_v56 = vld [vmem:[#allocation2 + $0x74] sm:$0xff]  ;;  %v2094_v46 = vpack.c.bf16 %v2084_v25, %v2083_v26 }
 0x2f4   : > { %10994 = vmatmul.mubr.msk.bf16.gmra.mrb[32].mxu0 %vm1367_vm1, %v3145_v40  ;;  %10739 = vmatprep.subr.bf16.mxu1 %v13251_v1  ;;  %v2074_v40 = vld [vmem:[#allocation2 + $0x2b] sm:$0xff] }
 0x2f5   : > { %11005 = vmatprep.mubr.msk.bf16.mxu0 %vm13252_vm0, %v13251_v1  ;;  %v3751_v25 = vld [vmem:[#allocation2 + $0x2d] sm:$0xff] }
 0x2f6   : > { %v13003_v26 = vld [vmem:[%s16039_s3 + $0x190] sm:$0xff]  }
 0x2f7   : > { %10740 = vmatpush3.bf16.msra.mxu1 %v12991_v21  ;;  %v2073_v21 = vld [vmem:[#allocation2 + $0x23] sm:$0xff] }
 0x2f8   : > { %10777 = vmatprep.subr.bf16.mxu1 %v13251_v1  ;;  %v2089_v20 = vpack.c.bf16 %v2074_v40, %v2073_v21  ;;  %v14563_v40 = vld [vmem:[#allocation2 + $0x84] sm:$0xff] }
 0x2fa   : > { %10706 = vmatmul.mubr.msk.bf16.gmra.mrb[216].mxu1 %vm1367_vm1, %v1879_v5 }
 0x2fb   : > { %10709 = vmatprep.mubr.msk.bf16.mxu1 %vm13252_vm0, %v13251_v1 }
 0x2fc   : > { %11006 = vmatmul.mubr.msk.bf16.vlgmr.msra.gmra.mrb[0].mxu0 %vm1367_vm1, %v1878_v19  ;;  %v12999_v19 = vld [vmem:[%s16039_s3 + $0x98] sm:$0xff]  }
 0x2fd   : > { %11042 = vmatpush3.bf16.msra.mxu0 %v12985_v22  ;;  %11009 = vmatprep.mubr.msk.bf16.mxu0 %vm13252_vm0, %v13251_v1  ;;  %v12993_v22 = vld [vmem:[%s16039_s3 + $0x160] sm:$0xff]  }
 0x2fe   : > { %11043 = vmatprep.subr.bf16.mxu0 %v13251_v1 }
 0x301   : > { %11044 = vmatpush3.bf16.msra.mxu0 %v12986_v4  ;;  %v2076_v4 = vld [vmem:[#allocation2 + $0x3b] sm:$0xff] }
 0x302   : > { %10710 = vmatmul.mubr.msk.bf16.gmra.mrb[220].mxu1 %vm1367_vm1, %v1880_v27  ;;  %11045 = vmatprep.subr.bf16.mxu0 %v13251_v1 }
 0x303   : > { %10713 = vmatprep.mubr.msk.bf16.mxu1 %vm13252_vm0, %v13251_v1 }
 0x304   : > { %11010 = vmatmul.mubr.msk.bf16.gmra.mrb[4].mxu0 %vm1367_vm1, %v1879_v5  ;;  %v14477_v5 = vld [vmem:[#allocation2 + $0x1c] sm:$0xff] }
 0x305   : > { %11013 = vmatprep.mubr.msk.bf16.mxu0 %vm13252_vm0, %v13251_v1  ;;  %11046 = vmatpush3.bf16.msra.mxu0 %v12987_v60  ;;  %v3557_v2 = vpack.c.bf16 %v14474_v38, %v14477_v5  ;;  %v14494_v60 = vld [vmem:[#allocation2 + $0x34] sm:$0xff] }
 0x306   : > { %11047 = vmatprep.subr.bf16.mxu0 %v13251_v1 }
 0x309   : > { %11048 = vmatpush3.bf16.msra.mxu0 %v12992_v18  ;;  %v14496_v18 = vld [vmem:[#allocation2 + $0x2c] sm:$0xff] }
 0x30a   : > { %10714 = vmatmul.mubr.msk.bf16.gmra.mrb[224].mxu1 %vm1367_vm1, %v1881_v30  ;;  %11085 = vmatprep.subr.bf16.mxu0 %v13251_v1 }
 0x30b   : > { %10717 = vmatprep.mubr.msk.bf16.mxu1 %vm13252_vm0, %v13251_v1 }
 0x30c   : > { %11014 = vmatmul.mubr.msk.bf16.gmra.mrb[8].mxu0 %vm1367_vm1, %v1880_v27  ;;  %v2075_v27 = vld [vmem:[#allocation2 + $0x33] sm:$0xff] }
 0x30d   : > { %11017 = vmatprep.mubr.msk.bf16.mxu0 %vm13252_vm0, %v13251_v1  ;;  %v2090_v23 = vpack.c.bf16 %v2076_v4, %v2075_v27  ;;  %v2279_v4 = vld [vmem:[#allocation2 + $0x4] sm:$0xff] }
 0x30e   : > { %v13004_v27 = vld [vmem:[%s16039_s3 + $0xa0] sm:$0xff]  }
 0x312   : > { %10718 = vmatmul.mubr.msk.bf16.gmra.mrb[228].mxu1 %vm1367_vm1, %v1882_v45 }
 0x313   : > { %10721 = vmatprep.mubr.msk.bf16.mxu1 %vm13252_vm0, %v13251_v1 }
 0x314   : > { %11018 = vmatmul.mubr.msk.bf16.gmra.mrb[12].mxu0 %vm1367_vm1, %v1881_v30  ;;  %v3558_v30 = vpack.c.bf16 %v14494_v60, %v14496_v18 }
 0x315   : > { %11021 = vmatprep.mubr.msk.bf16.mxu0 %vm13252_vm0, %v13251_v1 }
 0x31a   : > { %10722 = vmatmul.mubr.msk.bf16.gmra.mrb[232].mxu1 %vm1367_vm1, %v1883_v33 }
 0x31b   : > { %10725 = vmatprep.mubr.msk.bf16.mxu1 %vm13252_vm0, %v13251_v1 }
 0x31c   : > { %11022 = vmatmul.mubr.msk.bf16.gmra.mrb[16].mxu0 %vm1367_vm1, %v1882_v45  ;;  %v2077_v45 = vld [vmem:[#allocation2 + $0x43] sm:$0xff] }
 0x31d   : > { %11025 = vmatprep.mubr.msk.bf16.mxu0 %vm13252_vm0, %v13251_v1  ;;  %v2091_v8 = vpack.c.bf16 %v2078_v12, %v2077_v45  ;;  %v13005_v12 = vld [vmem:[%s16039_s3 + $0xa8] sm:$0xff]   ;;  %v3555_v45 = vld [vmem:[#allocation2 + $0x9c] sm:$0xff] }
 0x322   : > { %10726 = vmatmul.mubr.msk.bf16.gmra.mrb[236].mxu1 %vm1367_vm1, %v1884_v13 }
 0x323   : > { %10729 = vmatprep.mubr.msk.bf16.mxu1 %vm13252_vm0, %v13251_v1 }
 0x324   : > { %11026 = vmatmul.mubr.msk.bf16.gmra.mrb[20].mxu0 %vm1367_vm1, %v1883_v33  ;;  %v14516_v33 = vld [vmem:[#allocation2 + $0x3c] sm:$0xff] }
 0x325   : > { %11029 = vmatprep.mubr.msk.bf16.mxu0 %vm13252_vm0, %v13251_v1  ;;  %v3559_v39 = vpack.c.bf16 %v14514_v28, %v14516_v33 }
 0x32a   : > { %10730 = vmatmul.mubr.msk.bf16.gmra.mrb[240].mxu1 %vm1367_vm1, %v1885_v54  ;;  %v14529_v54 = vld [vmem:[#allocation2 + $0x4c] sm:$0xff] }
 0x32b   : > { %10741 = vmatprep.mubr.msk.bf16.mxu1 %vm13252_vm0, %v13251_v1  ;;  %v3560_v44 = vpack.c.bf16 %v14527_v16, %v14529_v54 }
 0x32c   : > { %11030 = vmatmul.mubr.msk.bf16.gmra.mrb[24].mxu0 %vm1367_vm1, %v1884_v13  ;;  %v2079_v13 = vld [vmem:[#allocation2 + $0x53] sm:$0xff] }
 0x32d   : > { %11033 = vmatprep.mubr.msk.bf16.mxu0 %vm13252_vm0, %v13251_v1  ;;  %v2092_v11 = vpack.c.bf16 %v2080_v37, %v2079_v13 }
 0x332   : > { %10742 = vmatmul.mubr.msk.bf16.vlgmr.msra.gmra.mrb[208].mxu1 %vm1367_vm1, %v2087_v47  ;;  %v2093_v47 = vpack.c.bf16 %v2082_v51, %v2081_v49  ;;  %v3749_v51 = vld [vmem:[#allocation2 + $0x1d] sm:$0xff] }
 0x333   : > { %10745 = vmatprep.mubr.msk.bf16.mxu1 %vm13252_vm0, %v13251_v1  ;;  %10778 = vmatpush3.bf16.msra.mxu1 %v12996_v59  ;;  %v14539_v59 = vld [vmem:[#allocation2 + $0x64] sm:$0xff] }
 0x334   : > { %11034 = vmatmul.mubr.msk.bf16.gmra.mrb[28].mxu0 %vm1367_vm1, %v3354_v7  ;;  %10779 = vmatprep.subr.bf16.mxu1 %v13251_v1  ;;  %v14541_v7 = vld [vmem:[#allocation2 + $0x5c] sm:$0xff] }
 0x335   : > { %11037 = vmatprep.mubr.msk.bf16.mxu0 %vm13252_vm0, %v13251_v1  ;;  %v13001_v49 = vld [vmem:[%s16039_s3 + $0x180] sm:$0xff]  }
 0x337   : > { %10780 = vmatpush3.bf16.msra.mxu1 %v12997_v43  ;;  %v3561_v43 = vpack.c.bf16 %v14539_v59, %v14541_v7 }
 0x338   : > { %10781 = vmatprep.subr.bf16.mxu1 %v13251_v1 }
 0x33a   : > { %10746 = vmatmul.mubr.msk.bf16.gmra.mrb[212].mxu1 %vm1367_vm1, %v2088_v52 }
 0x33b   : > { %10749 = vmatprep.mubr.msk.bf16.mxu1 %vm13252_vm0, %v13251_v1  ;;  %10782 = vmatpush3.bf16.msra.mxu1 %v12998_v58  ;;  %v14553_v58 = vld [vmem:[#allocation2 + $0x6c] sm:$0xff] }
 0x33c   : > { %11038 = vmatmul.mubr.msk.bf16.gmra.mrb[32].mxu0 %vm1367_vm1, %v3355_v34  ;;  %10783 = vmatprep.subr.bf16.mxu1 %v13251_v1  ;;  %v3562_v52 = vpack.c.bf16 %v14551_v56, %v14553_v58  ;;  %v2085_v34 = vld [vmem:[#allocation2 + $0x83] sm:$0xff] }
 0x33d   : > { %11049 = vmatprep.mubr.msk.bf16.mxu0 %vm13252_vm0, %v13251_v1 }
 0x33f   : > { %10784 = vmatpush3.bf16.msra.mxu1 %v12999_v19  ;;  %v2086_v19 = vld [vmem:[#allocation2 + $0x8b] sm:$0xf] }
 0x340   : > { %10821 = vmatprep.subr.bf16.mxu1 %v13251_v1  ;;  %v2095_v21 = vpack.c.bf16 %v2086_v19, %v2085_v34  ;;  %v3753_v34 = vld [vmem:[#allocation2 + $0x3d] sm:$0xff] }
 0x342   : > { %10750 = vmatmul.mubr.msk.bf16.gmra.mrb[216].mxu1 %vm1367_vm1, %v2089_v20  ;;  %v14565_v20 = vld [vmem:[#allocation2 + $0x7c] sm:$0xff] }
 0x343   : > { %10753 = vmatprep.mubr.msk.bf16.mxu1 %vm13252_vm0, %v13251_v1 }
 0x344   : > { %11050 = vmatmul.mubr.msk.bf16.vlgmr.msra.gmra.mrb[0].mxu0 %vm1367_vm1, %v3557_v2  ;;  %v2280_v2 = vld [vmem:[#allocation2 + $0xc] sm:$0xff] }
 0x345   : > { %11086 = vmatpush3.bf16.msra.mxu0 %v12993_v22  ;;  %11053 = vmatprep.mubr.msk.bf16.mxu0 %vm13252_vm0, %v13251_v1  ;;  %v3563_v22 = vpack.c.bf16 %v14563_v40, %v14565_v20 }
 0x346   : > { %11087 = vmatprep.subr.bf16.mxu0 %v13251_v1 }
 0x349   : > { %11088 = vmatpush3.bf16.msra.mxu0 %v12994_v31  ;;  %v3554_v31 = vld [vmem:[#allocation2 + $0x94] sm:$0xff] }
 0x34a   : > { %10754 = vmatmul.mubr.msk.bf16.gmra.mrb[220].mxu1 %vm1367_vm1, %v2090_v23  ;;  %11089 = vmatprep.subr.bf16.mxu0 %v13251_v1  ;;  %v2297_v23 = vpack.c.bf16 %v2280_v2, %v2279_v4  ;;  %v3758_v2 = vld [vmem:[#allocation2 + $0x65] sm:$0xff]  ;;  %v2303_v4 = vpack.c.bf16 %v14553_v58, %v14539_v59 }
 0x34b   : > { %10757 = vmatprep.mubr.msk.bf16.mxu1 %vm13252_vm0, %v13251_v1  ;;  %v2296_v58 = vld [vmem:[#allocation2 + $0x8c] sm:$0xf] }
 0x34c   : > { %11054 = vmatmul.mubr.msk.bf16.gmra.mrb[4].mxu0 %vm1367_vm1, %v3558_v30 }
 0x34d   : > { %11057 = vmatprep.mubr.msk.bf16.mxu0 %vm13252_vm0, %v13251_v1  ;;  %11090 = vmatpush3.bf16.msra.mxu0 %v12995_v32  ;;  %v3553_v32 = vld [vmem:[#allocation2 + $0x8c] sm:$0xff] }
 0x34e   : > { %11091 = vmatprep.subr.bf16.mxu0 %v13251_v1  ;;  %v3564_v30 = vpack.c.bf16 %v3554_v31, %v3553_v32  ;;  %v3757_v31 = vld [vmem:[#allocation2 + $0x5d] sm:$0xff]  ;;  %v3762_v32 = vld [vmem:[#allocation2 + $0x85] sm:$0xff] }
 0x351   : > { %11092 = vmatpush3.bf16.msra.mxu0 %v13000_v57  ;;  %v2281_v57 = vld [vmem:[#allocation2 + $0x14] sm:$0xff] }
 0x352   : > { %10758 = vmatmul.mubr.msk.bf16.gmra.mrb[224].mxu1 %vm1367_vm1, %v2091_v8  ;;  %11129 = vmatprep.subr.bf16.mxu0 %v13251_v1  ;;  %v3556_v8 = vld [vmem:[#allocation2 + $0xa4] sm:$0xf]  ;;  %v2298_v37 = vpack.c.bf16 %v14477_v5, %v2281_v57  ;;  %v2489_v57 = vld [vmem:[#allocation2 + $0xe] sm:$0xff] }
 0x353   : > { %10761 = vmatprep.mubr.msk.bf16.mxu1 %vm13252_vm0, %v13251_v1  ;;  %v3565_v13 = vpack.c.bf16 %v3556_v8, %v3555_v45  ;;  %v3750_v5 = vld [vmem:[#allocation2 + $0x25] sm:$0xff]  ;;  %v3764_v45 = vld [vmem:[#allocation2 + $0x95] sm:$0xff] }
 0x354   : > { %11058 = vmatmul.mubr.msk.bf16.gmra.mrb[8].mxu0 %vm1367_vm1, %v3559_v39  ;;  %v13006_v39 = vld [vmem:[%s16039_s3 + $0xb0] sm:$0xff]  }
 0x355   : > { %11061 = vmatprep.mubr.msk.bf16.mxu0 %vm13252_vm0, %v13251_v1 }
 0x35a   : > { %10762 = vmatmul.mubr.msk.bf16.gmra.mrb[228].mxu1 %vm1367_vm1, %v2092_v11  ;;  %v13007_v11 = vld [vmem:[%s16039_s3 + $0xb8] sm:$0xff]  }
 0x35b   : > { %10765 = vmatprep.mubr.msk.bf16.mxu1 %vm13252_vm0, %v13251_v1 }
 0x35c   : > { %11062 = vmatmul.mubr.msk.bf16.gmra.mrb[12].mxu0 %vm1367_vm1, %v3560_v44  ;;  %v2299_v44 = vpack.c.bf16 %v14496_v18, %v14474_v38  ;;  %v13002_v38 = vld [vmem:[%s16039_s3 + $0x188] sm:$0xff]   ;;  %v3752_v18 = vld [vmem:[#allocation2 + $0x35] sm:$0xff] }
 0x35d   : > { %11065 = vmatprep.mubr.msk.bf16.mxu0 %vm13252_vm0, %v13251_v1 }
 0x362   : > { %10766 = vmatmul.mubr.msk.bf16.gmra.mrb[232].mxu1 %vm1367_vm1, %v2093_v47  ;;  %v3767_v47 = vpack.c.bf16 %v3750_v5, %v3749_v51  ;;  %v3766_v5 = vld [vmem:[#allocation2 + $0xa5] sm:$0xf] }
 0x363   : > { %10769 = vmatprep.mubr.msk.bf16.mxu1 %vm13252_vm0, %v13251_v1 }
 0x364   : > { %11066 = vmatmul.mubr.msk.bf16.gmra.mrb[16].mxu0 %vm1367_vm1, %v3561_v43  ;;  %v2300_v43 = vpack.c.bf16 %v14516_v33, %v14494_v60  ;;  %v13008_v60 = vld [vmem:[%s16039_s3 + $0x198] sm:$0xff]   ;;  %v3754_v33 = vld [vmem:[#allocation2 + $0x45] sm:$0xff] }
 0x365   : > { %11069 = vmatprep.mubr.msk.bf16.mxu0 %vm13252_vm0, %v13251_v1  ;;  %v3769_v19 = vpack.c.bf16 %v3754_v33, %v3753_v34  ;;  %v13010_v33 = vld [vmem:[%s16039_s3 + $0x1a8] sm:$0xff]  }
 0x36a   : > { %10770 = vmatmul.mubr.msk.bf16.gmra.mrb[236].mxu1 %vm1367_vm1, %v2094_v46  ;;  %v3768_v46 = vpack.c.bf16 %v3752_v18, %v3751_v25  ;;  %v2494_v18 = vld [vmem:[#allocation2 + $0x36] sm:$0xff] }
 0x36b   : > { %10773 = vmatprep.mubr.msk.bf16.mxu1 %vm13252_vm0, %v13251_v1  ;;  %v13172_v25 = vld [vmem:[%s16039_s3 + $0xd8] sm:$0xff]  }
 0x36c   : > { %11070 = vmatmul.mubr.msk.bf16.gmra.mrb[20].mxu0 %vm1367_vm1, %v3562_v52  ;;  %v2301_v52 = vpack.c.bf16 %v14529_v54, %v14514_v28  ;;  %v3755_v28 = vld [vmem:[#allocation2 + $0x4d] sm:$0xff] }
 0x36d   : > { %11073 = vmatprep.mubr.msk.bf16.mxu0 %vm13252_vm0, %v13251_v1 }
 0x372   : > { %10774 = vmatmul.mubr.msk.bf16.gmra.mrb[240].mxu1 %vm1367_vm1, %v2095_v21  ;;  %v3756_v21 = vld [vmem:[#allocation2 + $0x55] sm:$0xff] }
 0x373   : > { %10785 = vmatprep.mubr.msk.bf16.mxu1 %vm13252_vm0, %v13251_v1  ;;  %v3770_v54 = vpack.c.bf16 %v3756_v21, %v3755_v28  ;;  %v2498_v21 = vld [vmem:[#allocation2 + $0x56] sm:$0xff]  ;;  %v2497_v28 = vld [vmem:[#allocation2 + $0x4e] sm:$0xff] }
 0x374   : > { %11074 = vmatmul.mubr.msk.bf16.gmra.mrb[24].mxu0 %vm1367_vm1, %v3563_v22  ;;  %v2302_v22 = vpack.c.bf16 %v14541_v7, %v14527_v16  ;;  %v3771_v16 = vpack.c.bf16 %v3758_v2, %v3757_v31  ;;  %v3760_v7 = vld [vmem:[#allocation2 + $0x75] sm:$0xff]  ;;  %v2500_v2 = vld [vmem:[#allocation2 + $0x66] sm:$0xff] }
 0x375   : > { %11077 = vmatprep.mubr.msk.bf16.mxu0 %vm13252_vm0, %v13251_v1 }
 0x37a   : > { %10786 = vmatmul.mubr.msk.bf16.vlgmr.msra.gmra.mrb[208].mxu1 %vm1367_vm1, %v2297_v23  ;;  %v3759_v23 = vld [vmem:[#allocation2 + $0x6d] sm:$0xff] }
 0x37b   : > { %10789 = vmatprep.mubr.msk.bf16.mxu1 %vm13252_vm0, %v13251_v1  ;;  %10822 = vmatpush3.bf16.msra.mxu1 %v13004_v27  ;;  %v2304_v27 = vpack.c.bf16 %v14565_v20, %v14551_v56  ;;  %v3772_v59 = vpack.c.bf16 %v3760_v7, %v3759_v23  ;;  %v2490_v20 = vld [vmem:[#allocation2 + $0x16] sm:$0xff]  ;;  %v2501_v7 = vld [vmem:[#allocation2 + $0x6e] sm:$0xff]  ;;  %v2504_v23 = vld [vmem:[#allocation2 + $0x86] sm:$0xff] }
 0x37c   : > { %11078 = vmatmul.mubr.msk.bf16.gmra.mrb[28].mxu0 %vm1367_vm1, %v3564_v30  ;;  %10823 = vmatprep.subr.bf16.mxu1 %v13251_v1  ;;  %v2305_v30 = vpack.c.bf16 %v2296_v58, %v14563_v40  ;;  %v2507_v8 = vpack.c.bf16 %v2490_v20, %v2489_v57  ;;  %v2703_v20 = vld [vmem:[#allocation2 + $0x2f] sm:$0xff] }
 0x37d   : > { %11081 = vmatprep.mubr.msk.bf16.mxu0 %vm13252_vm0, %v13251_v1  ;;  %v3974_v57 = vld [vmem:[#allocation2 + $0x96] sm:$0xff] }
 0x37f   : > { %10824 = vmatpush3.bf16.msra.mxu1 %v13005_v12  ;;  %v3761_v12 = vld [vmem:[#allocation2 + $0x7d] sm:$0xff] }
 0x380   : > { %10825 = vmatprep.subr.bf16.mxu1 %v13251_v1  ;;  %v3773_v56 = vpack.c.bf16 %v3762_v32, %v3761_v12  ;;  %v2506_v32 = vld [vmem:[#allocation2 + $0x96] sm:$0xf] }
 0x382   : > { %10790 = vmatmul.mubr.msk.bf16.gmra.mrb[212].mxu1 %vm1367_vm1, %v2298_v37  ;;  %v13169_v37 = vld [vmem:[%s16039_s3 + $0xc0] sm:$0xff]  }
 0x383   : > { %10793 = vmatprep.mubr.msk.bf16.mxu1 %vm13252_vm0, %v13251_v1  ;;  %10826 = vmatpush3.bf16.msra.mxu1 %v13006_v39  ;;  %v3763_v39 = vld [vmem:[#allocation2 + $0x8d] sm:$0xff] }
 0x384   : > { %11082 = vmatmul.mubr.msk.bf16.gmra.mrb[32].mxu0 %vm1367_vm1, %v3565_v13  ;;  %10827 = vmatprep.subr.bf16.mxu1 %v13251_v1  ;;  %v3774_v40 = vpack.c.bf16 %v3764_v45, %v3763_v39  ;;  %v2492_v13 = vld [vmem:[#allocation2 + $0x26] sm:$0xff] }
 0x385   : > { %11093 = vmatprep.mubr.msk.bf16.mxu0 %vm13252_vm0, %v13251_v1  ;;  %v2706_v39 = vld [vmem:[#allocation2 + $0x47] sm:$0xff] }
 0x387   : > { %10828 = vmatpush3.bf16.msra.mxu1 %v13007_v11  ;;  %v2491_v11 = vld [vmem:[#allocation2 + $0x1e] sm:$0xff] }
 0x388   : > { %12001 = vmatprep.subr.bf16.mxu1 %v13251_v1  ;;  %v2508_v51 = vpack.c.bf16 %v2492_v13, %v2491_v11  ;;  %v3975_v11 = vld [vmem:[#allocation2 + $0x9e] sm:$0xff] }
 0x38a   : > { %10794 = vmatmul.mubr.msk.bf16.gmra.mrb[216].mxu1 %vm1367_vm1, %v2299_v44  ;;  %v13170_v44 = vld [vmem:[%s16039_s3 + $0xc8] sm:$0xff]  }
 0x38b   : > { %10797 = vmatprep.mubr.msk.bf16.mxu1 %vm13252_vm0, %v13251_v1 }
 0x38c   : > { %11094 = vmatmul.mubr.msk.bf16.vlgmr.msra.gmra.mrb[0].mxu0 %vm1367_vm1, %v3767_v47 }
 0x38d   : > { %11130 = vmatpush3.bf16.msra.mxu0 %v13001_v49  ;;  %11097 = vmatprep.mubr.msk.bf16.mxu0 %vm13252_vm0, %v13251_v1  ;;  %v3765_v49 = vld [vmem:[#allocation2 + $0x9d] sm:$0xff] }
 0x38e   : > { %11131 = vmatprep.subr.bf16.mxu0 %v13251_v1  ;;  %v3775_v47 = vpack.c.bf16 %v3766_v5, %v3765_v49  ;;  %v4170_v49 = vld [vmem:[#allocation2 + $0x27] sm:$0xff] }
 0x391   : > { %11132 = vmatpush3.bf16.msra.mxu0 %v13002_v38  ;;  %v13171_v38 = vld [vmem:[%s16039_s3 + $0xd0] sm:$0xff]  }
 0x392   : > { %10798 = vmatmul.mubr.msk.bf16.gmra.mrb[220].mxu1 %vm1367_vm1, %v2300_v43  ;;  %11133 = vmatprep.subr.bf16.mxu0 %v13251_v1  ;;  %v2493_v43 = vld [vmem:[#allocation2 + $0x2e] sm:$0xff] }
 0x393   : > { %10801 = vmatprep.mubr.msk.bf16.mxu1 %vm13252_vm0, %v13251_v1 }
 0x394   : > { %11098 = vmatmul.mubr.msk.bf16.gmra.mrb[4].mxu0 %vm1367_vm1, %v3768_v46  ;;  %v13009_v46 = vld [vmem:[%s16039_s3 + $0x1a0] sm:$0xff]  }
 0x395   : > { %11101 = vmatprep.mubr.msk.bf16.mxu0 %vm13252_vm0, %v13251_v1  ;;  %11134 = vmatpush3.bf16.msra.mxu0 %v13003_v26  ;;  %v2509_v26 = vpack.c.bf16 %v2494_v18, %v2493_v43  ;;  %v13013_v18 = vld [vmem:[%s16039_s3 + $0x1c0] sm:$0xff]  }
 0x396   : > { %11135 = vmatprep.subr.bf16.mxu0 %v13251_v1 }
 0x399   : > { %11136 = vmatpush3.bf16.msra.mxu0 %v13008_v60  ;;  %v2496_v60 = vld [vmem:[#allocation2 + $0x46] sm:$0xff] }
 0x39a   : > { %10802 = vmatmul.mubr.msk.bf16.gmra.mrb[224].mxu1 %vm1367_vm1, %v2301_v52  ;;  %11173 = vmatprep.subr.bf16.mxu0 %v13251_v1  ;;  %v2495_v52 = vld [vmem:[#allocation2 + $0x3e] sm:$0xff] }
 0x39b   : > { %10805 = vmatprep.mubr.msk.bf16.mxu1 %vm13252_vm0, %v13251_v1  ;;  %v2510_v34 = vpack.c.bf16 %v2496_v60, %v2495_v52  ;;  %v2712_v52 = vld [vmem:[#allocation2 + $0x77] sm:$0xff] }
 0x39c   : > { %11102 = vmatmul.mubr.msk.bf16.gmra.mrb[8].mxu0 %vm1367_vm1, %v3769_v19  ;;  %v13011_v19 = vld [vmem:[%s16039_s3 + $0x1b0] sm:$0xff]  }
 0x39d   : > { %11105 = vmatprep.mubr.msk.bf16.mxu0 %vm13252_vm0, %v13251_v1 }
 0x3a2   : > { %10806 = vmatmul.mubr.msk.bf16.gmra.mrb[228].mxu1 %vm1367_vm1, %v2302_v22  ;;  %v13012_v22 = vld [vmem:[%s16039_s3 + $0x1b8] sm:$0xff]  }
 0x3a3   : > { %10809 = vmatprep.mubr.msk.bf16.mxu1 %vm13252_vm0, %v13251_v1 }
 0x3a4   : > { %11106 = vmatmul.mubr.msk.bf16.gmra.mrb[12].mxu0 %vm1367_vm1, %v3770_v54  ;;  %v2511_v54 = vpack.c.bf16 %v2498_v21, %v2497_v28  ;;  %v2713_v28 = vld [vmem:[#allocation2 + $0x7f] sm:$0xff] }
 0x3a5   : > { %11109 = vmatprep.mubr.msk.bf16.mxu0 %vm13252_vm0, %v13251_v1 }
 0x3aa   : > { %10810 = vmatmul.mubr.msk.bf16.gmra.mrb[232].mxu1 %vm1367_vm1, %v2303_v4  ;;  %v2499_v4 = vld [vmem:[#allocation2 + $0x5e] sm:$0xff] }
 0x3ab   : > { %10813 = vmatprep.mubr.msk.bf16.mxu1 %vm13252_vm0, %v13251_v1  ;;  %v2512_v31 = vpack.c.bf16 %v2500_v2, %v2499_v4  ;;  %v2716_v2 = vld [vmem:[#allocation2 + $0x97] sm:$0xf]  ;;  %v2715_v4 = vld [vmem:[#allocation2 + $0x8f] sm:$0xff] }
 0x3ac   : > { %11110 = vmatmul.mubr.msk.bf16.gmra.mrb[16].mxu0 %vm1367_vm1, %v3771_v16  ;;  %v2502_v16 = vld [vmem:[#allocation2 + $0x76] sm:$0xff] }
 0x3ad   : > { %11113 = vmatprep.mubr.msk.bf16.mxu0 %vm13252_vm0, %v13251_v1 }
 0x3b2   : > { %10814 = vmatmul.mubr.msk.bf16.gmra.mrb[236].mxu1 %vm1367_vm1, %v2304_v27  ;;  %v2513_v27 = vpack.c.bf16 %v2502_v16, %v2501_v7  ;;  %v4184_v16 = vld [vmem:[#allocation2 + $0x97] sm:$0xff] }
 0x3b3   : > { %10817 = vmatprep.mubr.msk.bf16.mxu1 %vm13252_vm0, %v13251_v1  ;;  %v4194_v7 = vpack.c.bf16 %v4184_v16, %v2715_v4  ;;  %v13186_v16 = vld [vmem:[#allocation2 + $0xa0] sm:$0xff] }
 0x3b4   : > { %11114 = vmatmul.mubr.msk.bf16.gmra.mrb[20].mxu0 %vm1367_vm1, %v3772_v59  ;;  %v2503_v59 = vld [vmem:[#allocation2 + $0x7e] sm:$0xff] }
 0x3b5   : > { %11117 = vmatprep.mubr.msk.bf16.mxu0 %vm13252_vm0, %v13251_v1  ;;  %v2514_v58 = vpack.c.bf16 %v2504_v23, %v2503_v59  ;;  %v4185_v23 = vld [vmem:[#allocation2 + $0x9f] sm:$0xff] }
 0x3ba   : > { %10818 = vmatmul.mubr.msk.bf16.gmra.mrb[240].mxu1 %vm1367_vm1, %v2305_v30  ;;  %v2505_v30 = vld [vmem:[#allocation2 + $0x8e] sm:$0xff] }
 0x3bb   : > { %10829 = vmatprep.mubr.msk.bf16.mxu1 %vm13252_vm0, %v13251_v1  ;;  %v2515_v12 = vpack.c.bf16 %v2506_v32, %v2505_v30  ;;  %v4379_v32 = vld [vmem:[#allocation2 + $0x20] sm:$0xff] }
 0x3bc   : > { %11118 = vmatmul.mubr.msk.bf16.gmra.mrb[24].mxu0 %vm1367_vm1, %v3773_v56  ;;  %v2704_v56 = vld [vmem:[#allocation2 + $0x37] sm:$0xff] }
 0x3bd   : > { %11121 = vmatprep.mubr.msk.bf16.mxu0 %vm13252_vm0, %v13251_v1  ;;  %v2719_v45 = vpack.c.bf16 %v2704_v56, %v2703_v20  ;;  %v13018_v56 = vld [vmem:[%s16039_s3 + $0x1e8] sm:$0xff]   ;;  %v4381_v20 = vld [vmem:[#allocation2 + $0x30] sm:$0xff] }
 0x3c2   : > { %10830 = vmatmul.mubr.msk.bf16.vlgmr.msra.gmra.mrb[208].mxu1 %vm1367_vm1, %v2507_v8  ;;  %v3984_v8 = vpack.c.bf16 %v3974_v57, %v2505_v30  ;;  %v13017_v30 = vld [vmem:[%s16039_s3 + $0x1e0] sm:$0xff]   ;;  %v13019_v57 = vld [vmem:[%s16039_s3 + $0x1f0] sm:$0xff]  }
 0x3c3   : > { %10833 = vmatprep.mubr.msk.bf16.mxu1 %vm13252_vm0, %v13251_v1  ;;  %12005 = vmatpush3.bf16.msra.mxu1 %v13169_v37  ;;  %v3976_v37 = vld [vmem:[#allocation2 + $0xa6] sm:$0xf] }
 0x3c4   : > { %11122 = vmatmul.mubr.msk.bf16.gmra.mrb[28].mxu0 %vm1367_vm1, %v3774_v40  ;;  %12002 = vmatprep.subr.bf16.mxu1 %v13251_v1  ;;  %v2705_v40 = vld [vmem:[#allocation2 + $0x3f] sm:$0xff]  ;;  %v3985_v5 = vpack.c.bf16 %v3976_v37, %v3975_v11  ;;  %v13175_v37 = vld [vmem:[#allocation2 + $0x48] sm:$0xff]  ;;  %v13176_v11 = vld [vmem:[#allocation2 + $0x50] sm:$0xff] }
 0x3c5   : > { %11125 = vmatprep.mubr.msk.bf16.mxu0 %vm13252_vm0, %v13251_v1  ;;  %v2720_v13 = vpack.c.bf16 %v2706_v39, %v2705_v40  ;;  %v13020_v39 = vld [vmem:[%s16039_s3 + $0x1f8] sm:$0xff]   ;;  %v13174_v40 = vld [vmem:[#allocation2 + $0x40] sm:$0xff] }
 0x3c7   : > { %12006 = vmatpush3.bf16.msra.mxu1 %v13170_v44  ;;  %v2708_v44 = vld [vmem:[#allocation2 + $0x57] sm:$0xff] }
 0x3c8   : > { %12003 = vmatprep.subr.bf16.mxu1 %v13251_v1 }
 0x3ca   : > { %10834 = vmatmul.mubr.msk.bf16.gmra.mrb[212].mxu1 %vm1367_vm1, %v2508_v51 }
 0x3cb   : > { %10837 = vmatprep.mubr.msk.bf16.mxu1 %vm13252_vm0, %v13251_v1  ;;  %12007 = vmatpush3.bf16.msra.mxu1 %v13171_v38  ;;  %v4169_v38 = vld [vmem:[#allocation2 + $0x1f] sm:$0xff] }
 0x3cc   : > { %11126 = vmatmul.mubr.msk.bf16.gmra.mrb[32].mxu0 %vm1367_vm1, %v3775_v47  ;;  %12004 = vmatprep.subr.bf16.mxu1 %v13251_v1  ;;  %v4187_v43 = vpack.c.bf16 %v4170_v49, %v4169_v38  ;;  %v13179_v49 = vld [vmem:[#allocation2 + $0x68] sm:$0xff]  ;;  %v13180_v38 = vld [vmem:[#allocation2 + $0x70] sm:$0xff] }
 0x3cd   : > { %11137 = vmatprep.mubr.msk.bf16.mxu0 %vm13252_vm0, %v13251_v1 }
 0x3cf   : > { %12008 = vmatpush3.bf16.msra.mxu1 %v13172_v25  ;;  %v2710_v25 = vld [vmem:[#allocation2 + $0x67] sm:$0xff] }
 0x3d0   : > { %11701 = vmatprep.subr.bf16.mxu1 %v13251_v1 }
 0x3d2   : > { %10838 = vmatmul.mubr.msk.bf16.gmra.mrb[216].mxu1 %vm1367_vm1, %v2509_v26 }
 0x3d3   : > { %10841 = vmatprep.mubr.msk.bf16.mxu1 %vm13252_vm0, %v13251_v1 }
 0x3d4   : > { %11138 = vmatmul.mubr.msk.bf16.vlgmr.msra.gmra.mrb[0].mxu0 %vm1367_vm1, %v2508_v51  ;;  %v2707_v51 = vld [vmem:[#allocation2 + $0x4f] sm:$0xff] }
 0x3d5   : > { %11174 = vmatpush3.bf16.msra.mxu0 %v13009_v46  ;;  %11141 = vmatprep.mubr.msk.bf16.mxu0 %vm13252_vm0, %v13251_v1  ;;  %v2721_v47 = vpack.c.bf16 %v2708_v44, %v2707_v51  ;;  %v2709_v46 = vld [vmem:[#allocation2 + $0x5f] sm:$0xff] }
 0x3d6   : > { %11175 = vmatprep.subr.bf16.mxu0 %v13251_v1  ;;  %v2722_v60 = vpack.c.bf16 %v2710_v25, %v2709_v46  ;;  %v13178_v51 = vld [vmem:[#allocation2 + $0x60] sm:$0xff] }
 0x3d7   : > { %v13182_v25 = vld [vmem:[#allocation2 + $0x80] sm:$0xff] }
 0x3d9   : > { %11176 = vmatpush3.bf16.msra.mxu0 %v13010_v33  ;;  %v13015_v33 = vld [vmem:[%s16039_s3 + $0x1d0] sm:$0xff]  }
 0x3da   : > { %10842 = vmatmul.mubr.msk.bf16.gmra.mrb[220].mxu1 %vm1367_vm1, %v2510_v34  ;;  %11177 = vmatprep.subr.bf16.mxu0 %v13251_v1 }
 0x3db   : > { %10845 = vmatprep.mubr.msk.bf16.mxu1 %vm13252_vm0, %v13251_v1 }
 0x3dc   : > { %11142 = vmatmul.mubr.msk.bf16.gmra.mrb[4].mxu0 %vm1367_vm1, %v2509_v26  ;;  %v13014_v26 = vld [vmem:[%s16039_s3 + $0x1c8] sm:$0xff]  }
 0x3dd   : > { %11145 = vmatprep.mubr.msk.bf16.mxu0 %vm13252_vm0, %v13251_v1  ;;  %11178 = vmatpush3.bf16.msra.mxu0 %v13011_v19  ;;  %v2711_v19 = vld [vmem:[#allocation2 + $0x6f] sm:$0xff] }
 0x3de   : > { %11179 = vmatprep.subr.bf16.mxu0 %v13251_v1  ;;  %v2723_v21 = vpack.c.bf16 %v2712_v52, %v2711_v19  ;;  %v13184_v19 = vld [vmem:[#allocation2 + $0x90] sm:$0xff] }
 0x3e1   : > { %11180 = vmatpush3.bf16.msra.mxu0 %v13012_v22  ;;  %v2714_v22 = vld [vmem:[#allocation2 + $0x87] sm:$0xff] }
 0x3e2   : > { %10846 = vmatmul.mubr.msk.bf16.gmra.mrb[224].mxu1 %vm1367_vm1, %v2511_v54  ;;  %11217 = vmatprep.subr.bf16.mxu0 %v13251_v1 }
 0x3e3   : > { %10849 = vmatprep.mubr.msk.bf16.mxu1 %vm13252_vm0, %v13251_v1 }
 0x3e4   : > { %11146 = vmatmul.mubr.msk.bf16.gmra.mrb[8].mxu0 %vm1367_vm1, %v2510_v34  ;;  %v13016_v34 = vld [vmem:[%s16039_s3 + $0x1d8] sm:$0xff]  }
 0x3e5   : > { %11149 = vmatprep.mubr.msk.bf16.mxu0 %vm13252_vm0, %v13251_v1 }
 0x3ea   : > { %10850 = vmatmul.mubr.msk.bf16.gmra.mrb[228].mxu1 %vm1367_vm1, %v2512_v31 }
 0x3eb   : > { %10853 = vmatprep.mubr.msk.bf16.mxu1 %vm13252_vm0, %v13251_v1 }
 0x3ec   : > { %11150 = vmatmul.mubr.msk.bf16.gmra.mrb[12].mxu0 %vm1367_vm1, %v2511_v54  ;;  %v2724_v54 = vpack.c.bf16 %v2714_v22, %v2713_v28 }
 0x3ed   : > { %11153 = vmatprep.mubr.msk.bf16.mxu0 %vm13252_vm0, %v13251_v1 }
 0x3f2   : > { %10854 = vmatmul.mubr.msk.bf16.gmra.mrb[232].mxu1 %vm1367_vm1, %v2513_v27 }
 0x3f3   : > { %10857 = vmatprep.mubr.msk.bf16.mxu1 %vm13252_vm0, %v13251_v1 }
 0x3f4   : > { %11154 = vmatmul.mubr.msk.bf16.gmra.mrb[16].mxu0 %vm1367_vm1, %v2512_v31  ;;  %v2725_v31 = vpack.c.bf16 %v2716_v2, %v2715_v4  ;;  %v4396_v4 = vld [vmem:[#allocation2 + $0xa8] sm:$0xf] }
 0x3f5   : > { %11157 = vmatprep.mubr.msk.bf16.mxu0 %vm13252_vm0, %v13251_v1 }
 0x3fa   : > { %10858 = vmatmul.mubr.msk.bf16.gmra.mrb[236].mxu1 %vm1367_vm1, %v2514_v58 }
 0x3fb   : > { %10861 = vmatprep.mubr.msk.bf16.mxu1 %vm13252_vm0, %v13251_v1 }
 0x3fc   : > { %11158 = vmatmul.mubr.msk.bf16.gmra.mrb[20].mxu0 %vm1367_vm1, %v2513_v27  ;;  %v4186_v27 = vld [vmem:[#allocation2 + $0xa7] sm:$0xf] }
 0x3fd   : > { %11161 = vmatprep.mubr.msk.bf16.mxu0 %vm13252_vm0, %v13251_v1  ;;  %v4195_v59 = vpack.c.bf16 %v4186_v27, %v4185_v23  ;;  %v4590_v27 = vld [vmem:[#allocation2 + $0x32] sm:$0xff]  ;;  %v4589_v23 = vld [vmem:[#allocation2 + $0x2a] sm:$0xff] }
 0x402   : > { %10862 = vmatmul.mubr.msk.bf16.gmra.mrb[240].mxu1 %vm1367_vm1, %v2515_v12 }
 0x403   : > { %10881 = vmatprep.mubr.msk.bf16.mxu1 %vm13252_vm0, %v13251_v1 }
 0x404   : > { %11162 = vmatmul.mubr.msk.bf16.gmra.mrb[24].mxu0 %vm1367_vm1, %v2514_v58  ;;  %v4380_v58 = vld [vmem:[#allocation2 + $0x28] sm:$0xff] }
 0x405   : > { %11165 = vmatprep.mubr.msk.bf16.mxu0 %vm13252_vm0, %v13251_v1  ;;  %v4397_v12 = vpack.c.bf16 %v4380_v58, %v4379_v32  ;;  %v4607_v58 = vpack.c.bf16 %v4590_v27, %v4589_v23  ;;  %v13022_v32 = vld [vmem:[%s16039_s3 + $0x208] sm:$0xff]  }
 0x40a   : > { %10882 = vmatmul.mubr.msk.bf16.vlgmr.msra.gmra.mrb[216].mxu1 %vm1367_vm1, %v2719_v45 }
 0x40b   : > { %10885 = vmatprep.mubr.msk.bf16.mxu1 %vm13252_vm0, %v13251_v1 }
 0x40c   : > { %11166 = vmatmul.mubr.msk.bf16.gmra.mrb[28].mxu0 %vm1367_vm1, %v3984_v8 }
 0x40d   : > { %11169 = vmatprep.mubr.msk.bf16.mxu0 %vm13252_vm0, %v13251_v1 }
 0x412   : > { %10886 = vmatmul.mubr.msk.bf16.gmra.mrb[220].mxu1 %vm1367_vm1, %v2720_v13 }
 0x413   : > { %10889 = vmatprep.mubr.msk.bf16.mxu1 %vm13252_vm0, %v13251_v1 }
 0x414   : > { %11170 = vmatmul.mubr.msk.bf16.gmra.mrb[32].mxu0 %vm1367_vm1, %v3985_v5  ;;  %v13177_v5 = vld [vmem:[#allocation2 + $0x58] sm:$0xff] }
 0x415   : > { %11181 = vmatprep.mubr.msk.bf16.mxu0 %vm13252_vm0, %v13251_v1  ;;  %v4400_v44 = vpack.c.bf16 %v13177_v5, %v13176_v11  ;;  %v4598_v11 = vld [vmem:[#allocation2 + $0x72] sm:$0xff]  ;;  %v4597_v5 = vld [vmem:[#allocation2 + $0x6a] sm:$0xff] }
 0x41a   : > { %10890 = vmatmul.mubr.msk.bf16.gmra.mrb[224].mxu1 %vm1367_vm1, %v2721_v47 }
 0x41b   : > { %10893 = vmatprep.mubr.msk.bf16.mxu1 %vm13252_vm0, %v13251_v1 }
 0x41c   : > { %11182 = vmatmul.mubr.msk.bf16.vlgmr.msra.gmra.mrb[0].mxu0 %vm1367_vm1, %v4187_v43 }
 0x41d   : > { %11218 = vmatpush3.bf16.msra.mxu0 %v13013_v18  ;;  %11185 = vmatprep.mubr.msk.bf16.mxu0 %vm13252_vm0, %v13251_v1  ;;  %v13181_v18 = vld [vmem:[#allocation2 + $0x78] sm:$0xff] }
 0x41e   : > { %11219 = vmatprep.subr.bf16.mxu0 %v13251_v1  ;;  %v4402_v43 = vpack.c.bf16 %v13181_v18, %v13180_v38  ;;  %v4602_v38 = vld [vmem:[#allocation2 + $0x92] sm:$0xff]  ;;  %v4601_v18 = vld [vmem:[#allocation2 + $0x8a] sm:$0xff] }
 0x421   : > { %11220 = vmatpush3.bf16.msra.mxu0 %v13014_v26  ;;  %v13183_v26 = vld [vmem:[#allocation2 + $0x88] sm:$0xff] }
 0x422   : > { %10894 = vmatmul.mubr.msk.bf16.gmra.mrb[228].mxu1 %vm1367_vm1, %v2722_v60  ;;  %11221 = vmatprep.subr.bf16.mxu0 %v13251_v1  ;;  %v4403_v46 = vpack.c.bf16 %v13183_v26, %v13182_v25 }
 0x423   : > { %10897 = vmatprep.mubr.msk.bf16.mxu1 %vm13252_vm0, %v13251_v1 }
 0x424   : > { %11186 = vmatmul.mubr.msk.bf16.gmra.mrb[4].mxu0 %vm1367_vm1, %v2719_v45  ;;  %v13173_v45 = vld [vmem:[#allocation2 + $0x38] sm:$0xff] }
 0x425   : > { %11189 = vmatprep.mubr.msk.bf16.mxu0 %vm13252_vm0, %v13251_v1  ;;  %11222 = vmatpush3.bf16.msra.mxu0 %v13015_v33  ;;  %v4398_v8 = vpack.c.bf16 %v13173_v45, %v4381_v20  ;;  %v4594_v45 = vld [vmem:[#allocation2 + $0x52] sm:$0xff] }
 0x426   : > { %11223 = vmatprep.subr.bf16.mxu0 %v13251_v1 }
 0x429   : > { %11224 = vmatpush3.bf16.msra.mxu0 %v13016_v34 }
 0x42a   : > { %10898 = vmatmul.mubr.msk.bf16.gmra.mrb[232].mxu1 %vm1367_vm1, %v2723_v21  ;;  %11261 = vmatprep.subr.bf16.mxu0 %v13251_v1 }
 0x42b   : > { %10901 = vmatprep.mubr.msk.bf16.mxu1 %vm13252_vm0, %v13251_v1 }
 0x42c   : > { %11190 = vmatmul.mubr.msk.bf16.gmra.mrb[8].mxu0 %vm1367_vm1, %v2720_v13  ;;  %v4399_v13 = vpack.c.bf16 %v13175_v37, %v13174_v40  ;;  %v4596_v40 = vld [vmem:[#allocation2 + $0x62] sm:$0xff]  ;;  %v4595_v37 = vld [vmem:[#allocation2 + $0x5a] sm:$0xff] }
 0x42d   : > { %11193 = vmatprep.mubr.msk.bf16.mxu0 %vm13252_vm0, %v13251_v1 }
 0x432   : > { %10902 = vmatmul.mubr.msk.bf16.gmra.mrb[236].mxu1 %vm1367_vm1, %v2724_v54 }
 0x433   : > { %10905 = vmatprep.mubr.msk.bf16.mxu1 %vm13252_vm0, %v13251_v1 }
 0x434   : > { %11194 = vmatmul.mubr.msk.bf16.gmra.mrb[12].mxu0 %vm1367_vm1, %v2721_v47  ;;  %v4401_v47 = vpack.c.bf16 %v13179_v49, %v13178_v51  ;;  %v4600_v51 = vld [vmem:[#allocation2 + $0x82] sm:$0xff]  ;;  %v4599_v49 = vld [vmem:[#allocation2 + $0x7a] sm:$0xff] }
 0x435   : > { %11197 = vmatprep.mubr.msk.bf16.mxu0 %vm13252_vm0, %v13251_v1 }
 0x43a   : > { %10906 = vmatmul.mubr.msk.bf16.gmra.mrb[240].mxu1 %vm1367_vm1, %v2725_v31 }
 0x43b   : > { %11709 = vmatprep.mubr.msk.bf16.mxu1 %vm13252_vm0, %v13251_v1 }
 0x43c   : > { %11198 = vmatmul.mubr.msk.bf16.gmra.mrb[16].mxu0 %vm1367_vm1, %v2722_v60 }
 0x43d   : > { %11201 = vmatprep.mubr.msk.bf16.mxu0 %vm13252_vm0, %v13251_v1 }
 0x444   : > { %11202 = vmatmul.mubr.msk.bf16.gmra.mrb[20].mxu0 %vm1367_vm1, %v2723_v21  ;;  %v13185_v21 = vld [vmem:[#allocation2 + $0x98] sm:$0xff] }
 0x445   : > { %11205 = vmatprep.mubr.msk.bf16.mxu0 %vm13252_vm0, %v13251_v1  ;;  %v4404_v22 = vpack.c.bf16 %v13185_v21, %v13184_v19  ;;  %v4603_v19 = vld [vmem:[#allocation2 + $0x9a] sm:$0xff] }
 0x44c   : > { %11206 = vmatmul.mubr.msk.bf16.gmra.mrb[24].mxu0 %vm1367_vm1, %v2724_v54 }
 0x44d   : > { %11209 = vmatprep.mubr.msk.bf16.mxu0 %vm13252_vm0, %v13251_v1 }
 0x454   : > { %11210 = vmatmul.mubr.msk.bf16.gmra.mrb[28].mxu0 %vm1367_vm1, %v4194_v7  ;;  %v4405_v7 = vpack.c.bf16 %v4396_v4, %v13186_v16  ;;  %v4606_v16 = vld [vmem:[#allocation2 + $0xb2] sm:$0xf] }
 0x455   : > { %11213 = vmatprep.mubr.msk.bf16.mxu0 %vm13252_vm0, %v13251_v1 }
 0x45c   : > { %11214 = vmatmul.mubr.msk.bf16.gmra.mrb[32].mxu0 %vm1367_vm1, %v4195_v59  ;;  %v13021_v59 = vld [vmem:[%s16039_s3 + $0x200] sm:$0xff]  }
 0x45d   : > { %11225 = vmatprep.mubr.msk.bf16.mxu0 %vm13252_vm0, %v13251_v1 }
 0x464   : > { %11226 = vmatmul.mubr.msk.bf16.vlgmr.msra.gmra.mrb[0].mxu0 %vm1367_vm1, %v4397_v12  ;;  %v4591_v12 = vld [vmem:[#allocation2 + $0x3a] sm:$0xff] }
 0x465   : > { %11262 = vmatpush3.bf16.msra.mxu0 %v13017_v30  ;;  %11229 = vmatprep.mubr.msk.bf16.mxu0 %vm13252_vm0, %v13251_v1  ;;  %v4592_v30 = vld [vmem:[#allocation2 + $0x42] sm:$0xff] }
 0x466   : > { %11263 = vmatprep.subr.bf16.mxu0 %v13251_v1  ;;  %v14895_v20 = vpack.c.bf16 %v4592_v30, %v4591_v12  ;;  %v4799_v12 = vld [vmem:[#allocation2 + $0x2b] sm:$0xff] }
 0x469   : > { %11264 = vmatpush3.bf16.msra.mxu0 %v13018_v56  ;;  %v13023_v56 = vld [vmem:[%s16039_s3 + $0x210] sm:$0xff]  }
 0x46a   : > { %11265 = vmatprep.subr.bf16.mxu0 %v13251_v1 }
 0x46c   : > { %11230 = vmatmul.mubr.msk.bf16.gmra.mrb[4].mxu0 %vm1367_vm1, %v4398_v8  ;;  %v4593_v8 = vld [vmem:[#allocation2 + $0x4a] sm:$0xff] }
 0x46d   : > { %11233 = vmatprep.mubr.msk.bf16.mxu0 %vm13252_vm0, %v13251_v1  ;;  %11266 = vmatpush3.bf16.msra.mxu0 %v13019_v57  ;;  %v13024_v57 = vld [vmem:[%s16039_s3 + $0x218] sm:$0xff]  }
 0x46e   : > { %11267 = vmatprep.subr.bf16.mxu0 %v13251_v1 }
 0x471   : > { %11268 = vmatpush3.bf16.msra.mxu0 %v13020_v39  ;;  %v14906_v39 = vpack.c.bf16 %v4594_v45, %v4593_v8  ;;  %v13026_v8 = vld [vmem:[%s16039_s3 + $0x228] sm:$0xff]  }
 0x472   : > { %11305 = vmatprep.subr.bf16.mxu0 %v13251_v1 }
 0x474   : > { %11234 = vmatmul.mubr.msk.bf16.gmra.mrb[8].mxu0 %vm1367_vm1, %v4399_v13  ;;  %v14913_v13 = vpack.c.bf16 %v4596_v40, %v4595_v37 }
 0x475   : > { %11237 = vmatprep.mubr.msk.bf16.mxu0 %vm13252_vm0, %v13251_v1 }
 0x47c   : > { %11238 = vmatmul.mubr.msk.bf16.gmra.mrb[12].mxu0 %vm1367_vm1, %v4400_v44  ;;  %v14919_v44 = vpack.c.bf16 %v4598_v11, %v4597_v5  ;;  %v4802_v11 = vld [vmem:[#allocation2 + $0x43] sm:$0xff] }
 0x47d   : > { %11241 = vmatprep.mubr.msk.bf16.mxu0 %vm13252_vm0, %v13251_v1 }
 0x484   : > { %11242 = vmatmul.mubr.msk.bf16.gmra.mrb[16].mxu0 %vm1367_vm1, %v4401_v47  ;;  %v14925_v47 = vpack.c.bf16 %v4600_v51, %v4599_v49  ;;  %v4801_v51 = vld [vmem:[#allocation2 + $0x3b] sm:$0xff]  ;;  %v13027_v49 = vld [vmem:[%s16039_s3 + $0x230] sm:$0xff]  }
 0x485   : > { %11245 = vmatprep.mubr.msk.bf16.mxu0 %vm13252_vm0, %v13251_v1 }
 0x48c   : > { %11246 = vmatmul.mubr.msk.bf16.gmra.mrb[20].mxu0 %vm1367_vm1, %v4402_v43  ;;  %v14931_v43 = vpack.c.bf16 %v4602_v38, %v4601_v18  ;;  %v14978_v38 = vpack.c.bf16 %v4802_v11, %v4801_v51 }
 0x48d   : > { %11249 = vmatprep.mubr.msk.bf16.mxu0 %vm13252_vm0, %v13251_v1 }
 0x494   : > { %11250 = vmatmul.mubr.msk.bf16.gmra.mrb[24].mxu0 %vm1367_vm1, %v4403_v46 }
 0x495   : > { %v14866_v60 = vpop.f32.mrb[208].mxu1  ;;  %11253 = vmatprep.mubr.msk.bf16.mxu0 %vm13252_vm0, %v13251_v1 }
 0x496   : > { %v10831_v33 = vpop.f32.mrb[209].mxu1 }
 0x497   : > { %v14870_v52 = vpop.f32.mrb[210].mxu1  ;;  %v4604_v33 = vld [vmem:[#allocation2 + $0xa2] sm:$0xff] }
 0x498   : > { %v10832_v34 = vpop.f32.mrb[211].mxu1  ;;  %v14941_v21 = vpack.c.bf16 %v4604_v33, %v4603_v19  ;;  %v4804_v19 = vld [vmem:[#allocation2 + $0x53] sm:$0xff] }
 0x49c   : > { %11254 = vmatmul.mubr.msk.bf16.gmra.mrb[28].mxu0 %vm1367_vm1, %v4404_v22 }
 0x49d   : > { %v14873_v28 = vpop.f32.mrb[212].mxu1  ;;  %11257 = vmatprep.mubr.msk.bf16.mxu0 %vm13252_vm0, %v13251_v1 }
 0x49e   : > { %v10835_v54 = vpop.f32.mrb[213].mxu1 }
 0x49f   : > { %v14877_v2 = vpop.f32.mrb[214].mxu1 }
 0x4a0   : > { %v10836_v31 = vpop.f32.mrb[215].mxu1 }
 0x4a1   : > { %v14951_v31 = vld [vmem:[#allocation2 + $0xaa] sm:$0xff] }
 0x4a2   : > { %v4615_v27 = vpack.c.bf16 %v4606_v16, %v14951_v31  ;;  %v4803_v16 = vld [vmem:[#allocation2 + $0x4b] sm:$0xff] }
 0x4a4   : > { %11258 = vmatmul.mubr.msk.bf16.gmra.mrb[32].mxu0 %vm1367_vm1, %v4405_v7 }
 0x4a5   : > { %11269 = vmatprep.mubr.msk.bf16.mxu0 %vm13252_vm0, %v13251_v1 }
 0x4ac   : > { %11270 = vmatmul.mubr.msk.bf16.vlgmr.msra.gmra.mrb[0].mxu0 %vm1367_vm1, %v4607_v58 }
 0x4ad   : > { %11306 = vmatpush3.bf16.msra.mxu0 %v13021_v59  ;;  %11273 = vmatprep.mubr.msk.bf16.mxu0 %vm13252_vm0, %v13251_v1 }
 0x4ae   : > { %11307 = vmatprep.subr.bf16.mxu0 %v13251_v1 }
 0x4b1   : > { %11308 = vmatpush3.bf16.msra.mxu0 %v13022_v32  ;;  %v4800_v32 = vld [vmem:[#allocation2 + $0x33] sm:$0xff] }
 0x4b2   : > { %11309 = vmatprep.subr.bf16.mxu0 %v13251_v1 }
 0x4b4   : > { %11274 = vmatmul.mubr.msk.bf16.gmra.mrb[4].mxu0 %vm1367_vm1, %v14895_v20 }
 0x4b5   : > { %11277 = vmatprep.mubr.msk.bf16.mxu0 %vm13252_vm0, %v13251_v1  ;;  %11310 = vmatpush3.bf16.msra.mxu0 %v13023_v56  ;;  %v13025_v56 = vld [vmem:[%s16039_s3 + $0x220] sm:$0xff]  }
 0x4b6   : > { %11311 = vmatprep.subr.bf16.mxu0 %v13251_v1 }
 0x4b9   : > { %11312 = vmatpush3.bf16.msra.mxu0 %v13024_v57  ;;  %v4817_v57 = vpack.c.bf16 %v4800_v32, %v4799_v12 }
 0x4ba   : > { %11349 = vmatprep.subr.bf16.mxu0 %v13251_v1 }
 0x4bc   : > { %11278 = vmatmul.mubr.msk.bf16.gmra.mrb[8].mxu0 %vm1367_vm1, %v14906_v39 }
 0x4bd   : > { %11281 = vmatprep.mubr.msk.bf16.mxu0 %vm13252_vm0, %v13251_v1 }
 0x4c4   : > { %11282 = vmatmul.mubr.msk.bf16.gmra.mrb[12].mxu0 %vm1367_vm1, %v14913_v13 }
 0x4c5   : > { %11285 = vmatprep.mubr.msk.bf16.mxu0 %vm13252_vm0, %v13251_v1 }
 0x4cc   : > { %11286 = vmatmul.mubr.msk.bf16.gmra.mrb[16].mxu0 %vm1367_vm1, %v14919_v44 }
 0x4cd   : > { %11289 = vmatprep.mubr.msk.bf16.mxu0 %vm13252_vm0, %v13251_v1 }
 0x4d4   : > { %11290 = vmatmul.mubr.msk.bf16.gmra.mrb[20].mxu0 %vm1367_vm1, %v14925_v47 }
 0x4d5   : > { %11293 = vmatprep.mubr.msk.bf16.mxu0 %vm13252_vm0, %v13251_v1 }
 0x4dc   : > { %11294 = vmatmul.mubr.msk.bf16.gmra.mrb[24].mxu0 %vm1367_vm1, %v14931_v43 }
 0x4dd   : > { %v14935_v25 = vpop.f32.mrb[216].mxu1  ;;  %11297 = vmatprep.mubr.msk.bf16.mxu0 %vm13252_vm0, %v13251_v1 }
 0x4de   : > { %v10883_v26 = vpop.f32.mrb[217].mxu1 }
 0x4df   : > { %v14939_v46 = vpop.f32.mrb[218].mxu1  ;;  %v13028_v26 = vld [vmem:[%s16039_s3 + $0x238] sm:$0xff]  }
 0x4e0   : > { %v10884_v34 = vpop.f32.mrb[219].mxu1 }
 0x4e4   : > { %11298 = vmatmul.mubr.msk.bf16.gmra.mrb[28].mxu0 %vm1367_vm1, %v14941_v21 }
 0x4e5   : > { %v14945_v22 = vpop.f32.mrb[220].mxu1  ;;  %11301 = vmatprep.mubr.msk.bf16.mxu0 %vm13252_vm0, %v13251_v1 }
 0x4e6   : > { %v10887_v54 = vpop.f32.mrb[221].mxu1 }
 0x4e7   : > { %v14949_v4 = vpop.f32.mrb[222].mxu1 }
 0x4e8   : > { %v10888_v7 = vpop.f32.mrb[223].mxu1 }
 0x4e9   : > { %v14993_v7 = vpack.c.bf16 %v4804_v19, %v4803_v16  ;;  %v4809_v19 = vld [vmem:[#allocation2 + $0x7b] sm:$0xff]  ;;  %v4812_v16 = vld [vmem:[#allocation2 + $0x93] sm:$0xff] }
 0x4ec   : > { %11302 = vmatmul.mubr.msk.bf16.gmra.mrb[32].mxu0 %vm1367_vm1, %v4615_v27 }
 0x4ed   : > { %v14955_v23 = vpop.f32.mrb[224].mxu1  ;;  %11313 = vmatprep.mubr.msk.bf16.mxu0 %vm13252_vm0, %v13251_v1 }
 0x4ee   : > { %v10891_v59 = vpop.f32.mrb[225].mxu1 }
 0x4ef   : > { %v14959_v58 = vpop.f32.mrb[226].mxu1 }
 0x4f0   : > { %v10892_v30 = vpop.f32.mrb[227].mxu1 }
 0x4f1   : > { %v4806_v30 = vld [vmem:[#allocation2 + $0x63] sm:$0xff] }
 0x4f4   : > { %11314 = vmatmul.mubr.msk.bf16.vlgmr.msra.gmra.mrb[0].mxu0 %vm1367_vm1, %v4817_v57 }
 0x4f5   : > { %v14965_v45 = vpop.f32.mrb[228].mxu1  ;;  %11350 = vmatpush3.bf16.msra.mxu0 %v13025_v56  ;;  %11317 = vmatprep.mubr.msk.bf16.mxu0 %vm13252_vm0, %v13251_v1  ;;  %v4805_v56 = vld [vmem:[#allocation2 + $0x5b] sm:$0xff] }
 0x4f6   : > { %v10895_v40 = vpop.f32.mrb[229].mxu1  ;;  %11351 = vmatprep.subr.bf16.mxu0 %v13251_v1  ;;  %v15004_v57 = vpack.c.bf16 %v4806_v30, %v4805_v56  ;;  %v4813_v56 = vld [vmem:[#allocation2 + $0x9b] sm:$0xff] }
 0x4f7   : > { %v14973_v37 = vpop.f32.mrb[230].mxu1 }
 0x4f8   : > { %v10896_v5 = vpop.f32.mrb[231].mxu1 }
 0x4f9   : > { %11352 = vmatpush3.bf16.msra.mxu0 %v13026_v8  ;;  %v4808_v5 = vld [vmem:[#allocation2 + $0x73] sm:$0xff] }
 0x4fa   : > { %11353 = vmatprep.subr.bf16.mxu0 %v13251_v1 }
 0x4fc   : > { %11318 = vmatmul.mubr.msk.bf16.gmra.mrb[4].mxu0 %vm1367_vm1, %v14978_v38 }
 0x4fd   : > { %v14983_v18 = vpop.f32.mrb[232].mxu1  ;;  %11321 = vmatprep.mubr.msk.bf16.mxu0 %vm13252_vm0, %v13251_v1  ;;  %11354 = vmatpush3.bf16.msra.mxu0 %v13027_v49  ;;  %v4807_v49 = vld [vmem:[#allocation2 + $0x6b] sm:$0xff] }
 0x4fe   : > { %v10899_v33 = vpop.f32.mrb[233].mxu1  ;;  %11355 = vmatprep.subr.bf16.mxu0 %v13251_v1 }
 0x4ff   : > { %v14991_v34 = vpop.f32.mrb[234].mxu1  ;;  %v4810_v33 = vld [vmem:[#allocation2 + $0x83] sm:$0xff] }
 0x500   : > { %v10900_v54 = vpop.f32.mrb[235].mxu1 }
 0x501   : > { %11356 = vmatpush3.bf16.msra.mxu0 %v13028_v26  ;;  %v15012_v26 = vpack.c.bf16 %v4808_v5, %v4807_v49  ;;  %v15018_v54 = vpack.c.bf16 %v4810_v33, %v4809_v19  ;;  %v4816_v5 = vld [vmem:[#allocation2 + $0xb3] sm:$0xf]  ;;  %v13029_v19 = vld [vmem:[%s16039_s3 + $0x240] sm:$0xff]  }
 0x502   : > { %11393 = vmatprep.subr.bf16.mxu0 %v13251_v1  ;;  %v5010_v49 = vld [vmem:[#allocation2 + $0x34] sm:$0xff]  ;;  %v5009_v33 = vld [vmem:[#allocation2 + $0x2c] sm:$0xff] }
 0x504   : > { %11322 = vmatmul.mubr.msk.bf16.gmra.mrb[8].mxu0 %vm1367_vm1, %v14993_v7 }
 0x505   : > { %v14998_v27 = vpop.f32.mrb[236].mxu1  ;;  %11325 = vmatprep.mubr.msk.bf16.mxu0 %vm13252_vm0, %v13251_v1 }
 0x506   : > { %v10903_v59 = vpop.f32.mrb[237].mxu1 }
 0x507   : > { %v15002_v32 = vpop.f32.mrb[238].mxu1  ;;  %v4811_v59 = vld [vmem:[#allocation2 + $0x8b] sm:$0xff] }
 0x508   : > { %16067 = vst [vmem:[#allocation7_spill] sm:$0xff] %v15002_v32  ;;  %v10904_v12 = vpop.f32.mrb[239].mxu1  ;;  %v15024_v30 = vpack.c.bf16 %v4812_v16, %v4811_v59  ;;  %v5027_v16 = vpack.c.bf16 %v5010_v49, %v5009_v33  ;;  %v13030_v59 = vld [vmem:[%s16039_s3 + $0x248] sm:$0xff]   ;;  %v13032_v49 = vld [vmem:[%s16039_s3 + $0x258] sm:$0xff]  }
 0x509   : > { %v4814_v12 = vld [vmem:[#allocation2 + $0xa3] sm:$0xff]  ;;  %v5014_v33 = vld [vmem:[#allocation2 + $0x54] sm:$0xff] }
 0x50c   : > { %11326 = vmatmul.mubr.msk.bf16.gmra.mrb[12].mxu0 %vm1367_vm1, %v15004_v57 }
 0x50d   : > { %v15008_v8 = vpop.f32.mrb[240].mxu1  ;;  %11329 = vmatprep.mubr.msk.bf16.mxu0 %vm13252_vm0, %v13251_v1 }
 0x50e   : > { %16068 = vst [vmem:[#allocation8_spill] sm:$0xff] %v15008_v8  ;;  %v10907_v40 = vpop.f32.mrb[241].mxu1  ;;  %v5227_v8 = vld [vmem:[#allocation2 + $0x6d] sm:$0xff] }
 0x50f   : > { %v2887_v11 = vpop.f32.mrb[242].mxu1  ;;  %v15030_v40 = vpack.c.bf16 %v4814_v12, %v4813_v56  ;;  %v5012_v12 = vld [vmem:[#allocation2 + $0x44] sm:$0xff]  ;;  %v5011_v56 = vld [vmem:[#allocation2 + $0x3c] sm:$0xff] }
 0x510   : > { %v10908_v51 = vpop.f32.mrb[243].mxu1  ;;  %v15036_v11 = vld [vmem:[#allocation2 + $0xab] sm:$0xff] }
 0x511   : > { %v4825_v51 = vpack.c.bf16 %v4816_v5, %v15036_v11  ;;  %v13031_v5 = vld [vmem:[%s16039_s3 + $0x250] sm:$0xff]  }
 0x514   : > { %11330 = vmatmul.mubr.msk.bf16.gmra.mrb[16].mxu0 %vm1367_vm1, %v15012_v26 }
 0x515   : > { %11333 = vmatprep.mubr.msk.bf16.mxu0 %vm13252_vm0, %v13251_v1 }
 0x51c   : > { %11334 = vmatmul.mubr.msk.bf16.gmra.mrb[20].mxu0 %vm1367_vm1, %v15018_v54 }
 0x51d   : > { %11337 = vmatprep.mubr.msk.bf16.mxu0 %vm13252_vm0, %v13251_v1 }
 0x524   : > { %11338 = vmatmul.mubr.msk.bf16.gmra.mrb[24].mxu0 %vm1367_vm1, %v15024_v30 }
 0x525   : > { %11341 = vmatprep.mubr.msk.bf16.mxu0 %vm13252_vm0, %v13251_v1 }
 0x52c   : > { %11342 = vmatmul.mubr.msk.bf16.gmra.mrb[28].mxu0 %vm1367_vm1, %v15030_v40 }
 0x52d   : > { %11345 = vmatprep.mubr.msk.bf16.mxu0 %vm13252_vm0, %v13251_v1 }
 0x534   : > { %11346 = vmatmul.mubr.msk.bf16.gmra.mrb[32].mxu0 %vm1367_vm1, %v4825_v51  ;;  %v15055_v51 = vpack.c.bf16 %v5012_v12, %v5011_v56  ;;  %v5015_v12 = vld [vmem:[#allocation2 + $0x5c] sm:$0xff] }
 0x535   : > { %11357 = vmatprep.mubr.msk.bf16.mxu0 %vm13252_vm0, %v13251_v1 }
 0x53c   : > { %11358 = vmatmul.mubr.msk.bf16.vlgmr.msra.gmra.mrb[0].mxu0 %vm1367_vm1, %v5027_v16 }
 0x53d   : > { %11394 = vmatpush3.bf16.msra.mxu0 %v13029_v19  ;;  %11361 = vmatprep.mubr.msk.bf16.mxu0 %vm13252_vm0, %v13251_v1  ;;  %v5013_v19 = vld [vmem:[#allocation2 + $0x4c] sm:$0xff] }
 0x53e   : > { %11395 = vmatprep.subr.bf16.mxu0 %v13251_v1  ;;  %v15066_v16 = vpack.c.bf16 %v5014_v33, %v5013_v19  ;;  %v5020_v19 = vld [vmem:[#allocation2 + $0x84] sm:$0xff] }
 0x541   : > { %11396 = vmatpush3.bf16.msra.mxu0 %v13030_v59  ;;  %v5016_v59 = vld [vmem:[#allocation2 + $0x64] sm:$0xff] }
 0x542   : > { %11397 = vmatprep.subr.bf16.mxu0 %v13251_v1  ;;  %v15073_v56 = vpack.c.bf16 %v5016_v59, %v5015_v12  ;;  %v15085_v59 = vpack.c.bf16 %v5020_v19, %v5019_v6  ;;  %v5022_v12 = vld [vmem:[#allocation2 + $0x94] sm:$0xff]  ;;  %v15103_v19 = vld [vmem:[#allocation2 + $0xac] sm:$0xff] }
 0x544   : > { %11362 = vmatmul.mubr.msk.bf16.gmra.mrb[4].mxu0 %vm1367_vm1, %v15055_v51 }
 0x545   : > { %11365 = vmatprep.mubr.msk.bf16.mxu0 %vm13252_vm0, %v13251_v1  ;;  %11398 = vmatpush3.bf16.msra.mxu0 %v13031_v5  ;;  %v5018_v5 = vld [vmem:[#allocation2 + $0x74] sm:$0xff] }
 0x546   : > { %11399 = vmatprep.subr.bf16.mxu0 %v13251_v1 }
 0x549   : > { %11400 = vmatpush3.bf16.msra.mxu0 %v13032_v49  ;;  %v5017_v49 = vld [vmem:[#allocation2 + $0x6c] sm:$0xff] }
 0x54a   : > { %11437 = vmatprep.subr.bf16.mxu0 %v13251_v1  ;;  %v15079_v33 = vpack.c.bf16 %v5018_v5, %v5017_v49  ;;  %v15091_v5 = vpack.c.bf16 %v5022_v12, %v5021_v53  ;;  %v5024_v49 = vld [vmem:[#allocation2 + $0xa4] sm:$0xff]  ;;  %v5026_v53 = vld [vmem:[#allocation2 + $0xb4] sm:$0xf] }
 0x54b   : > { %v15097_v6 = vpack.c.bf16 %v5024_v49, %v5023_v35  ;;  %v5035_v12 = vpack.c.bf16 %v5026_v53, %v15103_v19  ;;  %v13033_v35 = vld [vmem:[%s16039_s3 + $0x260] sm:$0xff]   ;;  %v5237_v49 = vpack.c.bf16 %v5220_v61, %v5219_v41  ;;  %v13034_v53 = vld [vmem:[%s16039_s3 + $0x268] sm:$0xff]   ;;  %v13036_v61 = vld [vmem:[%s16039_s3 + $0x278] sm:$0xff]  }
 0x54c   : > { %11366 = vmatmul.mubr.msk.bf16.gmra.mrb[8].mxu0 %vm1367_vm1, %v15066_v16 }
 0x54d   : > { %11369 = vmatprep.mubr.msk.bf16.mxu0 %vm13252_vm0, %v13251_v1 }
 0x554   : > { %11370 = vmatmul.mubr.msk.bf16.gmra.mrb[12].mxu0 %vm1367_vm1, %v15073_v56 }
 0x555   : > { %11373 = vmatprep.mubr.msk.bf16.mxu0 %vm13252_vm0, %v13251_v1 }
 0x55c   : > { %11374 = vmatmul.mubr.msk.bf16.gmra.mrb[16].mxu0 %vm1367_vm1, %v15079_v33 }
 0x55d   : > { %11377 = vmatprep.mubr.msk.bf16.mxu0 %vm13252_vm0, %v13251_v1 }
 0x564   : > { %11378 = vmatmul.mubr.msk.bf16.gmra.mrb[20].mxu0 %vm1367_vm1, %v15085_v59 }
 0x565   : > { %11381 = vmatprep.mubr.msk.bf16.mxu0 %vm13252_vm0, %v13251_v1 }
 0x56c   : > { %11382 = vmatmul.mubr.msk.bf16.gmra.mrb[24].mxu0 %vm1367_vm1, %v15091_v5 }
 0x56d   : > { %11385 = vmatprep.mubr.msk.bf16.mxu0 %vm13252_vm0, %v13251_v1 }
 0x574   : > { %11386 = vmatmul.mubr.msk.bf16.gmra.mrb[28].mxu0 %vm1367_vm1, %v15097_v6 }
 0x575   : > { %11389 = vmatprep.mubr.msk.bf16.mxu0 %vm13252_vm0, %v13251_v1 }
 0x57c   : > { %11390 = vmatmul.mubr.msk.bf16.gmra.mrb[32].mxu0 %vm1367_vm1, %v5035_v12  ;;  %v5222_v12 = vld [vmem:[#allocation2 + $0x45] sm:$0xff] }
 0x57d   : > { %11401 = vmatprep.mubr.msk.bf16.mxu0 %vm13252_vm0, %v13251_v1  ;;  %v5238_v41 = vpack.c.bf16 %v5222_v12, %v5221_v50  ;;  %v5226_v50 = vld [vmem:[#allocation2 + $0x65] sm:$0xff]  ;;  %v5225_v12 = vld [vmem:[#allocation2 + $0x5d] sm:$0xff] }
 0x584   : > { %11402 = vmatmul.mubr.msk.bf16.vlgmr.msra.gmra.mrb[0].mxu0 %vm1367_vm1, %v5237_v49  ;;  %v5223_v49 = vld [vmem:[#allocation2 + $0x4d] sm:$0xff] }
 0x585   : > { %11438 = vmatpush3.bf16.msra.mxu0 %v13033_v35  ;;  %11405 = vmatprep.mubr.msk.bf16.mxu0 %vm13252_vm0, %v13251_v1  ;;  %v5224_v35 = vld [vmem:[#allocation2 + $0x55] sm:$0xff] }
 0x586   : > { %11439 = vmatprep.subr.bf16.mxu0 %v13251_v1 }
 0x589   : > { %11440 = vmatpush3.bf16.msra.mxu0 %v13034_v53  ;;  %v5239_v53 = vpack.c.bf16 %v5224_v35, %v5223_v49  ;;  %v5229_v35 = vld [vmem:[#allocation2 + $0x7d] sm:$0xff] }
 0x58a   : > { %11441 = vmatprep.subr.bf16.mxu0 %v13251_v1 }
 0x58c   : > { %11406 = vmatmul.mubr.msk.bf16.gmra.mrb[4].mxu0 %vm1367_vm1, %v5238_v41  ;;  %v5228_v41 = vld [vmem:[#allocation2 + $0x75] sm:$0xff] }
 0x58d   : > { %11409 = vmatprep.mubr.msk.bf16.mxu0 %vm13252_vm0, %v13251_v1  ;;  %11442 = vmatpush3.bf16.msra.mxu0 %v13035_v55  ;;  %v5240_v55 = vpack.c.bf16 %v5226_v50, %v5225_v12  ;;  %v5241_v32 = vpack.c.bf16 %v5228_v41, %v5227_v8  ;;  %v5231_v50 = vld [vmem:[#allocation2 + $0x8d] sm:$0xff]  ;;  %v5233_v8 = vld [vmem:[#allocation2 + $0x9d] sm:$0xff]  ;;  %v5236_v41 = vld [vmem:[#allocation2 + $0xb5] sm:$0xf] }
 0x58e   : > { %11443 = vmatprep.subr.bf16.mxu0 %v13251_v1 }
 0x591   : > { %11444 = vmatpush3.bf16.msra.mxu0 %v13036_v61  ;;  %v5230_v61 = vld [vmem:[#allocation2 + $0x85] sm:$0xff] }
 0x592   : > { %11481 = vmatprep.subr.bf16.mxu0 %v13251_v1  ;;  %v5242_v49 = vpack.c.bf16 %v5230_v61, %v5229_v35  ;;  %v5235_v61 = vld [vmem:[#allocation2 + $0xad] sm:$0xff] }
 0x593   : > { %v5245_v35 = vpack.c.bf16 %v5236_v41, %v5235_v61  ;;  %v13039_v41 = vld [vmem:[%s16039_s3 + $0x290] sm:$0xff]  }
 0x594   : > { %11410 = vmatmul.mubr.msk.bf16.gmra.mrb[8].mxu0 %vm1367_vm1, %v5239_v53  ;;  %v5232_v53 = vld [vmem:[#allocation2 + $0x95] sm:$0xff] }
 0x595   : > { %11413 = vmatprep.mubr.msk.bf16.mxu0 %vm13252_vm0, %v13251_v1  ;;  %v5243_v12 = vpack.c.bf16 %v5232_v53, %v5231_v50  ;;  %v5429_v53 = vld [vmem:[#allocation2 + $0x2e] sm:$0xff]  ;;  %v13037_v50 = vld [vmem:[%s16039_s3 + $0x280] sm:$0xff]  }
 0x59c   : > { %11414 = vmatmul.mubr.msk.bf16.gmra.mrb[12].mxu0 %vm1367_vm1, %v5240_v55 }
 0x59d   : > { %11417 = vmatprep.mubr.msk.bf16.mxu0 %vm13252_vm0, %v13251_v1 }
 0x5a4   : > { %11418 = vmatmul.mubr.msk.bf16.gmra.mrb[16].mxu0 %vm1367_vm1, %v5241_v32  ;;  %v5234_v32 = vld [vmem:[#allocation2 + $0xa5] sm:$0xff] }
 0x5a5   : > { %11421 = vmatprep.mubr.msk.bf16.mxu0 %vm13252_vm0, %v13251_v1  ;;  %v5244_v55 = vpack.c.bf16 %v5234_v32, %v5233_v8  ;;  %v13038_v32 = vld [vmem:[%s16039_s3 + $0x288] sm:$0xff]  }
 0x5a6   : > { %v5432_v8 = vld [vmem:[#allocation2 + $0x46] sm:$0xff] }
 0x5ac   : > { %11422 = vmatmul.mubr.msk.bf16.gmra.mrb[20].mxu0 %vm1367_vm1, %v5242_v49  ;;  %v5430_v49 = vld [vmem:[#allocation2 + $0x36] sm:$0xff] }
 0x5ad   : > { %11425 = vmatprep.mubr.msk.bf16.mxu0 %vm13252_vm0, %v13251_v1 }
 0x5b4   : > { %11426 = vmatmul.mubr.msk.bf16.gmra.mrb[24].mxu0 %vm1367_vm1, %v5243_v12  ;;  %v5447_v12 = vpack.c.bf16 %v5430_v49, %v5429_v53  ;;  %v5434_v49 = vld [vmem:[#allocation2 + $0x56] sm:$0xff]  ;;  %v5433_v53 = vld [vmem:[#allocation2 + $0x4e] sm:$0xff] }
 0x5b5   : > { %11429 = vmatprep.mubr.msk.bf16.mxu0 %vm13252_vm0, %v13251_v1 }
 0x5bc   : > { %11430 = vmatmul.mubr.msk.bf16.gmra.mrb[28].mxu0 %vm1367_vm1, %v5244_v55  ;;  %v5431_v55 = vld [vmem:[#allocation2 + $0x3e] sm:$0xff] }
 0x5bd   : > { %11433 = vmatprep.mubr.msk.bf16.mxu0 %vm13252_vm0, %v13251_v1  ;;  %v5448_v61 = vpack.c.bf16 %v5432_v8, %v5431_v55  ;;  %v5438_v55 = vld [vmem:[#allocation2 + $0x76] sm:$0xff] }
 0x5c4   : > { %11434 = vmatmul.mubr.msk.bf16.gmra.mrb[32].mxu0 %vm1367_vm1, %v5245_v35  ;;  %v13040_v35 = vld [vmem:[%s16039_s3 + $0x298] sm:$0xff]  }
 0x5c5   : > { %11445 = vmatprep.mubr.msk.bf16.mxu0 %vm13252_vm0, %v13251_v1 }
 0x5cc   : > { %11446 = vmatmul.mubr.msk.bf16.vlgmr.msra.gmra.mrb[0].mxu0 %vm1367_vm1, %v5447_v12  ;;  %v5436_v12 = vld [vmem:[#allocation2 + $0x66] sm:$0xff] }
 0x5cd   : > { %11482 = vmatpush3.bf16.msra.mxu0 %v13037_v50  ;;  %11449 = vmatprep.mubr.msk.bf16.mxu0 %vm13252_vm0, %v13251_v1  ;;  %v5449_v50 = vpack.c.bf16 %v5434_v49, %v5433_v53  ;;  %v5439_v49 = vld [vmem:[#allocation2 + $0x7e] sm:$0xff] }
 0x5ce   : > { %11483 = vmatprep.subr.bf16.mxu0 %v13251_v1 }
 0x5d1   : > { %11484 = vmatpush3.bf16.msra.mxu0 %v13038_v32  ;;  %v5435_v32 = vld [vmem:[#allocation2 + $0x5e] sm:$0xff] }
 0x5d2   : > { %11485 = vmatprep.subr.bf16.mxu0 %v13251_v1  ;;  %v5450_v8 = vpack.c.bf16 %v5436_v12, %v5435_v32  ;;  %v5441_v12 = vld [vmem:[#allocation2 + $0x8e] sm:$0xff] }
 0x5d4   : > { %11450 = vmatmul.mubr.msk.bf16.gmra.mrb[4].mxu0 %vm1367_vm1, %v5448_v61 }
 0x5d5   : > { %11453 = vmatprep.mubr.msk.bf16.mxu0 %vm13252_vm0, %v13251_v1  ;;  %11486 = vmatpush3.bf16.msra.mxu0 %v13039_v41  ;;  %v5437_v41 = vld [vmem:[#allocation2 + $0x6e] sm:$0xff] }
 0x5d6   : > { %11487 = vmatprep.subr.bf16.mxu0 %v13251_v1  ;;  %v5451_v61 = vpack.c.bf16 %v5438_v55, %v5437_v41  ;;  %v5443_v55 = vld [vmem:[#allocation2 + $0x9e] sm:$0xff] }
 0x5d9   : > { %11488 = vmatpush3.bf16.msra.mxu0 %v13040_v35  ;;  %v5440_v35 = vld [vmem:[#allocation2 + $0x86] sm:$0xff] }
 0x5da   : > { %11525 = vmatprep.subr.bf16.mxu0 %v13251_v1  ;;  %v5452_v53 = vpack.c.bf16 %v5440_v35, %v5439_v49  ;;  %v5445_v35 = vld [vmem:[#allocation2 + $0xae] sm:$0xff] }
 0x5dc   : > { %11454 = vmatmul.mubr.msk.bf16.gmra.mrb[8].mxu0 %vm1367_vm1, %v5449_v50  ;;  %v5442_v50 = vld [vmem:[#allocation2 + $0x96] sm:$0xff] }
 0x5dd   : > { %11457 = vmatprep.mubr.msk.bf16.mxu0 %vm13252_vm0, %v13251_v1  ;;  %v5453_v32 = vpack.c.bf16 %v5442_v50, %v5441_v12  ;;  %v16069_v50 = vpack.c.bf16 %v14114_v14, %v14112_v10  ;;  %v13042_v12 = vld [vmem:[%s16039_s3 + $0x2a8] sm:$0xff]   ;;  %v16070_v10 = vpack.c.bf16 %v14143_v0, %v14141_v24  ;;  %v13044_v14 = vld [vmem:[%s16039_s3 + $0x2b8] sm:$0xff]   ;;  %v16072_v24 = vpack.c.bf16 %v14191_v48, %v14189_v15  ;;  %v5654_v15 = vld [vmem:[#allocation2 + $0xb0] sm:$0xff] }
 0x5de   : > { %v16073_v0 = vpack.c.bf16 %v14220_v3, %v14218_v9  ;;  %v5653_v48 = vld [vmem:[#allocation2 + $0xa8] sm:$0xff]  ;;  %v5656_v3 = vld [vmem:[#allocation2 + $0xc0] sm:$0xf] }
 0x5df   : > { %v5664_v9 = vpack.c.bf16 %v5654_v15, %v5653_v48  ;;  %v5860_v48 = vld [vmem:[#allocation2 + $0x91] sm:$0xff] }
 0x5e4   : > { %11458 = vmatmul.mubr.msk.bf16.gmra.mrb[12].mxu0 %vm1367_vm1, %v5450_v8  ;;  %v5444_v8 = vld [vmem:[#allocation2 + $0xa6] sm:$0xff] }
 0x5e5   : > { %11461 = vmatprep.mubr.msk.bf16.mxu0 %vm13252_vm0, %v13251_v1  ;;  %v5454_v41 = vpack.c.bf16 %v5444_v8, %v5443_v55  ;;  %v16071_v8 = vpack.c.bf16 %v14167_v17, %v14165_v36  ;;  %v16074_v36 = vpack.c.bf16 %v14239_v62, %v14242_v42  ;;  %v16075_v17 = vpack.c.bf16 %v14252_v63, %v14250_v29  ;;  %v5655_v62 = vld [vmem:[#allocation2 + $0xb8] sm:$0xff]  ;;  %v5850_v29 = vld [vmem:[#allocation2 + $0x41] sm:$0xff] }
 0x5e6   : > { %v5665_v42 = vpack.c.bf16 %v5656_v3, %v5655_v62  ;;  %v5849_v63 = vld [vmem:[#allocation2 + $0x39] sm:$0xff]  ;;  %v5862_v62 = vld [vmem:[#allocation2 + $0xa1] sm:$0xff] }
 0x5e7   : > { %v13045_v55 = vld [vmem:[%s16039_s3 + $0x2c0] sm:$0xff]  }
 0x5ec   : > { %11462 = vmatmul.mubr.msk.bf16.gmra.mrb[16].mxu0 %vm1367_vm1, %v5451_v61  ;;  %v5446_v61 = vld [vmem:[#allocation2 + $0xb6] sm:$0xf] }
 0x5ed   : > { %11465 = vmatprep.mubr.msk.bf16.mxu0 %vm13252_vm0, %v13251_v1  ;;  %v5455_v49 = vpack.c.bf16 %v5446_v61, %v5445_v35  ;;  %v13046_v61 = vld [vmem:[%s16039_s3 + $0x2c8] sm:$0xff]   ;;  %v5852_v35 = vld [vmem:[#allocation2 + $0x51] sm:$0xff] }
 0x5f4   : > { %11466 = vmatmul.mubr.msk.bf16.gmra.mrb[20].mxu0 %vm1367_vm1, %v5452_v53  ;;  %v13041_v53 = vld [vmem:[%s16039_s3 + $0x2a0] sm:$0xff]  }
 0x5f5   : > { %11469 = vmatprep.mubr.msk.bf16.mxu0 %vm13252_vm0, %v13251_v1 }
 0x5fc   : > { %11470 = vmatmul.mubr.msk.bf16.gmra.mrb[24].mxu0 %vm1367_vm1, %v5453_v32  ;;  %v13043_v32 = vld [vmem:[%s16039_s3 + $0x2b0] sm:$0xff]  }
 0x5fd   : > { %11473 = vmatprep.mubr.msk.bf16.mxu0 %vm13252_vm0, %v13251_v1 }
 0x604   : > { %11474 = vmatmul.mubr.msk.bf16.gmra.mrb[28].mxu0 %vm1367_vm1, %v5454_v41  ;;  %v5867_v41 = vpack.c.bf16 %v5850_v29, %v5849_v63  ;;  %v5864_v63 = vld [vmem:[#allocation2 + $0xb1] sm:$0xff] }
 0x605   : > { %11477 = vmatprep.mubr.msk.bf16.mxu0 %vm13252_vm0, %v13251_v1 }
 0x60c   : > { %11478 = vmatmul.mubr.msk.bf16.gmra.mrb[32].mxu0 %vm1367_vm1, %v5455_v49  ;;  %v5851_v49 = vld [vmem:[#allocation2 + $0x49] sm:$0xff] }
 0x60d   : > { %11489 = vmatprep.mubr.msk.bf16.mxu0 %vm13252_vm0, %v13251_v1 }
 0x614   : > { %11490 = vmatmul.mubr.msk.bf16.vlgmr.msra.gmra.mrb[0].mxu0 %vm1367_vm1, %v16069_v50  ;;  %v5868_v50 = vpack.c.bf16 %v5852_v35, %v5851_v49  ;;  %v5866_v35 = vld [vmem:[#allocation2 + $0xc1] sm:$0xf] }
 0x615   : > { %11526 = vmatpush3.bf16.msra.mxu0 %v13041_v53  ;;  %11493 = vmatprep.mubr.msk.bf16.mxu0 %vm13252_vm0, %v13251_v1  ;;  %v13047_v53 = vld [vmem:[%s16039_s3 + $0x2d0] sm:$0xff]  }
 0x616   : > { %11527 = vmatprep.subr.bf16.mxu0 %v13251_v1 }
 0x619   : > { %11528 = vmatpush3.bf16.msra.mxu0 %v13042_v12  ;;  %v13048_v12 = vld [vmem:[%s16039_s3 + $0x2d8] sm:$0xff]  }
 0x61a   : > { %11529 = vmatprep.subr.bf16.mxu0 %v13251_v1 }
 0x61c   : > { %11494 = vmatmul.mubr.msk.bf16.gmra.mrb[4].mxu0 %vm1367_vm1, %v16070_v10  ;;  %v5853_v10 = vld [vmem:[#allocation2 + $0x59] sm:$0xff] }
 0x61d   : > { %11497 = vmatprep.mubr.msk.bf16.mxu0 %vm13252_vm0, %v13251_v1  ;;  %11530 = vmatpush3.bf16.msra.mxu0 %v13043_v32  ;;  %v5854_v32 = vld [vmem:[#allocation2 + $0x61] sm:$0xff] }
 0x61e   : > { %11531 = vmatprep.subr.bf16.mxu0 %v13251_v1 }
 0x621   : > { %11532 = vmatpush3.bf16.msra.mxu0 %v13044_v14  ;;  %v5869_v14 = vpack.c.bf16 %v5854_v32, %v5853_v10  ;;  %v13055_v32 = vld [vmem:[%s16039_s3 + $0x310] sm:$0xff]   ;;  %v13056_v10 = vld [vmem:[%s16039_s3 + $0x318] sm:$0xff]  }
 0x622   : > { %11569 = vmatprep.subr.bf16.mxu0 %v13251_v1 }
 0x624   : > { %11498 = vmatmul.mubr.msk.bf16.gmra.mrb[8].mxu0 %vm1367_vm1, %v16071_v8  ;;  %v5856_v8 = vld [vmem:[#allocation2 + $0x71] sm:$0xff] }
 0x625   : > { %11501 = vmatprep.mubr.msk.bf16.mxu0 %vm13252_vm0, %v13251_v1 }
 0x62c   : > { %11502 = vmatmul.mubr.msk.bf16.gmra.mrb[12].mxu0 %vm1367_vm1, %v16072_v24  ;;  %v5855_v24 = vld [vmem:[#allocation2 + $0x69] sm:$0xff] }
 0x62d   : > { %11505 = vmatprep.mubr.msk.bf16.mxu0 %vm13252_vm0, %v13251_v1 }
 0x634   : > { %11506 = vmatmul.mubr.msk.bf16.gmra.mrb[16].mxu0 %vm1367_vm1, %v16073_v0  ;;  %v5870_v0 = vpack.c.bf16 %v5856_v8, %v5855_v24 }
 0x635   : > { %11509 = vmatprep.mubr.msk.bf16.mxu0 %vm13252_vm0, %v13251_v1 }
 0x63c   : > { %11510 = vmatmul.mubr.msk.bf16.gmra.mrb[20].mxu0 %vm1367_vm1, %v16074_v36  ;;  %v5858_v36 = vld [vmem:[#allocation2 + $0x81] sm:$0xff] }
 0x63d   : > { %11513 = vmatprep.mubr.msk.bf16.mxu0 %vm13252_vm0, %v13251_v1 }
 0x644   : > { %11514 = vmatmul.mubr.msk.bf16.gmra.mrb[24].mxu0 %vm1367_vm1, %v16075_v17  ;;  %v5857_v17 = vld [vmem:[#allocation2 + $0x79] sm:$0xff] }
 0x645   : > { %11517 = vmatprep.mubr.msk.bf16.mxu0 %vm13252_vm0, %v13251_v1  ;;  %v5871_v15 = vpack.c.bf16 %v5858_v36, %v5857_v17 }
 0x64c   : > { %11518 = vmatmul.mubr.msk.bf16.gmra.mrb[28].mxu0 %vm1367_vm1, %v5664_v9  ;;  %v5859_v9 = vld [vmem:[#allocation2 + $0x89] sm:$0xff] }
 0x64d   : > { %11521 = vmatprep.mubr.msk.bf16.mxu0 %vm13252_vm0, %v13251_v1  ;;  %v5872_v3 = vpack.c.bf16 %v5860_v48, %v5859_v9 }
 0x654   : > { %11522 = vmatmul.mubr.msk.bf16.gmra.mrb[32].mxu0 %vm1367_vm1, %v5665_v42  ;;  %v5861_v42 = vld [vmem:[#allocation2 + $0x99] sm:$0xff] }
 0x655   : > { %11533 = vmatprep.mubr.msk.bf16.mxu0 %vm13252_vm0, %v13251_v1  ;;  %v5873_v29 = vpack.c.bf16 %v5862_v62, %v5861_v42 }
 0x65c   : > { %11534 = vmatmul.mubr.msk.bf16.vlgmr.msra.gmra.mrb[0].mxu0 %vm1367_vm1, %v5867_v41 }
 0x65d   : > { %11570 = vmatpush3.bf16.msra.mxu0 %v13045_v55  ;;  %11537 = vmatprep.mubr.msk.bf16.mxu0 %vm13252_vm0, %v13251_v1  ;;  %v5863_v55 = vld [vmem:[#allocation2 + $0xa9] sm:$0xff] }
 0x65e   : > { %11571 = vmatprep.subr.bf16.mxu0 %v13251_v1  ;;  %v5874_v41 = vpack.c.bf16 %v5864_v63, %v5863_v55 }
 0x661   : > { %11572 = vmatpush3.bf16.msra.mxu0 %v13046_v61  ;;  %v5865_v61 = vld [vmem:[#allocation2 + $0xb9] sm:$0xff] }
 0x662   : > { %11573 = vmatprep.subr.bf16.mxu0 %v13251_v1  ;;  %v5875_v49 = vpack.c.bf16 %v5866_v35, %v5865_v61 }
 0x664   : > { %11538 = vmatmul.mubr.msk.bf16.gmra.mrb[4].mxu0 %vm1367_vm1, %v5868_v50  ;;  %v13050_v50 = vld [vmem:[%s16039_s3 + $0x2e8] sm:$0xff]  }
 0x665   : > { %11541 = vmatprep.mubr.msk.bf16.mxu0 %vm13252_vm0, %v13251_v1  ;;  %11574 = vmatpush3.bf16.msra.mxu0 %v13047_v53  ;;  %v13049_v53 = vld [vmem:[%s16039_s3 + $0x2e0] sm:$0xff]  }
 0x666   : > { %11575 = vmatprep.subr.bf16.mxu0 %v13251_v1 }
 0x669   : > { %11576 = vmatpush3.bf16.msra.mxu0 %v13048_v12  ;;  %v13051_v12 = vld [vmem:[%s16039_s3 + $0x2f0] sm:$0xff]  }
 0x66a   : > { %11613 = vmatprep.subr.bf16.mxu0 %v13251_v1 }
 0x66c   : > { %11542 = vmatmul.mubr.msk.bf16.gmra.mrb[8].mxu0 %vm1367_vm1, %v5869_v14  ;;  %v13058_v14 = vld [vmem:[%s16041_s5 + $0x28] sm:$0xff]  }
 0x66d   : > { %11545 = vmatprep.mubr.msk.bf16.mxu0 %vm13252_vm0, %v13251_v1 }
 0x674   : > { %11546 = vmatmul.mubr.msk.bf16.gmra.mrb[12].mxu0 %vm1367_vm1, %v5870_v0 }
 0x675   : > { %11549 = vmatprep.mubr.msk.bf16.mxu0 %vm13252_vm0, %v13251_v1 }
 0x67c   : > { %11550 = vmatmul.mubr.msk.bf16.gmra.mrb[16].mxu0 %vm1367_vm1, %v5871_v15 }
 0x67d   : > { %11553 = vmatprep.mubr.msk.bf16.mxu0 %vm13252_vm0, %v13251_v1 }
 0x684   : > { %11554 = vmatmul.mubr.msk.bf16.gmra.mrb[20].mxu0 %vm1367_vm1, %v5872_v3 }
 0x685   : > { %11557 = vmatprep.mubr.msk.bf16.mxu0 %vm13252_vm0, %v13251_v1 }
 0x68c   : > { %11558 = vmatmul.mubr.msk.bf16.gmra.mrb[24].mxu0 %vm1367_vm1, %v5873_v29 }
 0x68d   : > { %11561 = vmatprep.mubr.msk.bf16.mxu0 %vm13252_vm0, %v13251_v1 }
 0x694   : > { %11562 = vmatmul.mubr.msk.bf16.gmra.mrb[28].mxu0 %vm1367_vm1, %v5874_v41 }
 0x695   : > { %11565 = vmatprep.mubr.msk.bf16.mxu0 %vm13252_vm0, %v13251_v1 }
 0x69c   : > { %11566 = vmatmul.mubr.msk.bf16.gmra.mrb[32].mxu0 %vm1367_vm1, %v5875_v49 }
 0x69d   : > { %11577 = vmatprep.mubr.msk.bf16.mxu0 %vm13252_vm0, %v13251_v1 }
 0x6a4   : > { %11578 = vmatmul.mubr.msk.bf16.vlgmr.msra.gmra.mrb[0].mxu0 %vm1367_vm1, %v14895_v20  ;;  %v13052_v20 = vld [vmem:[%s16039_s3 + $0x2f8] sm:$0xff]  }
 0x6a5   : > { %11614 = vmatpush3.bf16.msra.mxu0 %v13049_v53  ;;  %11581 = vmatprep.mubr.msk.bf16.mxu0 %vm13252_vm0, %v13251_v1 }
 0x6a6   : > { %11615 = vmatprep.subr.bf16.mxu0 %v13251_v1 }
 0x6a9   : > { %11616 = vmatpush3.bf16.msra.mxu0 %v13050_v50 }
 0x6aa   : > { %11617 = vmatprep.subr.bf16.mxu0 %v13251_v1 }
 0x6ac   : > { %11582 = vmatmul.mubr.msk.bf16.gmra.mrb[4].mxu0 %vm1367_vm1, %v14906_v39  ;;  %v6074_v39 = vld [vmem:[#allocation2 + $0xb2] sm:$0xff] }
 0x6ad   : > { %11585 = vmatprep.mubr.msk.bf16.mxu0 %vm13252_vm0, %v13251_v1  ;;  %11618 = vmatpush3.bf16.msra.mxu0 %v13051_v12 }
 0x6ae   : > { %11619 = vmatprep.subr.bf16.mxu0 %v13251_v1 }
 0x6b1   : > { %11620 = vmatpush3.bf16.msra.mxu0 %v13052_v20 }
 0x6b2   : > { %11657 = vmatprep.subr.bf16.mxu0 %v13251_v1 }
 0x6b4   : > { %11586 = vmatmul.mubr.msk.bf16.gmra.mrb[8].mxu0 %vm1367_vm1, %v14913_v13  ;;  %v6084_v13 = vpack.c.bf16 %v6074_v39, %v14951_v31  ;;  %v13054_v31 = vld [vmem:[%s16039_s3 + $0x308] sm:$0xff]  }
 0x6b5   : > { %11589 = vmatprep.mubr.msk.bf16.mxu0 %vm13252_vm0, %v13251_v1 }
 0x6bc   : > { %11590 = vmatmul.mubr.msk.bf16.gmra.mrb[12].mxu0 %vm1367_vm1, %v14919_v44  ;;  %v6075_v44 = vld [vmem:[#allocation2 + $0xba] sm:$0xff] }
 0x6bd   : > { %11593 = vmatprep.mubr.msk.bf16.mxu0 %vm13252_vm0, %v13251_v1 }
 0x6c4   : > { %11594 = vmatmul.mubr.msk.bf16.gmra.mrb[16].mxu0 %vm1367_vm1, %v14925_v47  ;;  %v6076_v47 = vld [vmem:[#allocation2 + $0xc2] sm:$0xf] }
 0x6c5   : > { %11597 = vmatprep.mubr.msk.bf16.mxu0 %vm13252_vm0, %v13251_v1 }
 0x6cc   : > { %11598 = vmatmul.mubr.msk.bf16.gmra.mrb[20].mxu0 %vm1367_vm1, %v14931_v43  ;;  %v6085_v43 = vpack.c.bf16 %v6076_v47, %v6075_v44 }
 0x6cd   : > { %11601 = vmatprep.mubr.msk.bf16.mxu0 %vm13252_vm0, %v13251_v1 }
 0x6d4   : > { %11602 = vmatmul.mubr.msk.bf16.gmra.mrb[24].mxu0 %vm1367_vm1, %v14941_v21  ;;  %v13053_v21 = vld [vmem:[%s16039_s3 + $0x300] sm:$0xff]  }
 0x6d5   : > { %11605 = vmatprep.mubr.msk.bf16.mxu0 %vm13252_vm0, %v13251_v1 }
 0x6dc   : > { %11606 = vmatmul.mubr.msk.bf16.gmra.mrb[28].mxu0 %vm1367_vm1, %v6084_v13 }
 0x6dd   : > { %11609 = vmatprep.mubr.msk.bf16.mxu0 %vm13252_vm0, %v13251_v1 }
 0x6e4   : > { %11610 = vmatmul.mubr.msk.bf16.gmra.mrb[32].mxu0 %vm1367_vm1, %v6085_v43  ;;  %v13061_v43 = vld [vmem:[%s16041_s5] sm:$0xff]  }
 0x6e5   : > { %11621 = vmatprep.mubr.msk.bf16.mxu0 %vm13252_vm0, %v13251_v1 }
 0x6ec   : > { %11622 = vmatmul.mubr.msk.bf16.vlgmr.msra.gmra.mrb[0].mxu0 %vm1367_vm1, %v14978_v38  ;;  %v13057_v38 = vld [vmem:[%s16041_s5 + $0x20] sm:$0xff]  }
 0x6ed   : > { %11658 = vmatpush3.bf16.msra.mxu0 %v13053_v21  ;;  %11625 = vmatprep.mubr.msk.bf16.mxu0 %vm13252_vm0, %v13251_v1 }
 0x6ee   : > { %11659 = vmatprep.subr.bf16.mxu0 %v13251_v1  ;;  %11702 = vmatpush3.bf16.msra.mxu1 %v13057_v38 }
 0x6ef   : > { %11703 = vmatprep.subr.bf16.mxu1 %v13251_v1 }
 0x6f1   : > { %11660 = vmatpush3.bf16.msra.mxu0 %v13054_v31 }
 0x6f2   : > { %11661 = vmatprep.subr.bf16.mxu0 %v13251_v1  ;;  %11704 = vmatpush3.bf16.msra.mxu1 %v13058_v14 }
 0x6f3   : > { %11705 = vmatprep.subr.bf16.mxu1 %v13251_v1 }
 0x6f4   : > { %11626 = vmatmul.mubr.msk.bf16.gmra.mrb[4].mxu0 %vm1367_vm1, %v14993_v7  ;;  %v6284_v7 = vld [vmem:[#allocation2 + $0xb3] sm:$0xff] }
 0x6f5   : > { %11629 = vmatprep.mubr.msk.bf16.mxu0 %vm13252_vm0, %v13251_v1  ;;  %11662 = vmatpush3.bf16.msra.mxu0 %v13055_v32 }
 0x6f6   : > { %11663 = vmatprep.subr.bf16.mxu0 %v13251_v1 }
 0x6f9   : > { %11664 = vmatpush3.bf16.msra.mxu0 %v13056_v10 }
 0x6fc   : > { %11630 = vmatmul.mubr.msk.bf16.gmra.mrb[8].mxu0 %vm1367_vm1, %v15004_v57  ;;  %v6294_v57 = vpack.c.bf16 %v6284_v7, %v15036_v11 }
 0x6fd   : > { %11633 = vmatprep.mubr.msk.bf16.mxu0 %vm13252_vm0, %v13251_v1 }
 0x704   : > { %11634 = vmatmul.mubr.msk.bf16.gmra.mrb[12].mxu0 %vm1367_vm1, %v15012_v26  ;;  %v6285_v26 = vld [vmem:[#allocation2 + $0xbb] sm:$0xff] }
 0x705   : > { %11637 = vmatprep.mubr.msk.bf16.mxu0 %vm13252_vm0, %v13251_v1 }
 0x70c   : > { %11638 = vmatmul.mubr.msk.bf16.gmra.mrb[16].mxu0 %vm1367_vm1, %v15018_v54  ;;  %v6286_v54 = vld [vmem:[#allocation2 + $0xc3] sm:$0xf] }
 0x70d   : > { %11641 = vmatprep.mubr.msk.bf16.mxu0 %vm13252_vm0, %v13251_v1 }
 0x714   : > { %11642 = vmatmul.mubr.msk.bf16.gmra.mrb[20].mxu0 %vm1367_vm1, %v15024_v30  ;;  %v6295_v30 = vpack.c.bf16 %v6286_v54, %v6285_v26  ;;  %v13064_v54 = vld [vmem:[%s16041_s5 + $0x18] sm:$0xff]  }
 0x715   : > { %11645 = vmatprep.mubr.msk.bf16.mxu0 %vm13252_vm0, %v13251_v1 }
 0x71c   : > { %11646 = vmatmul.mubr.msk.bf16.gmra.mrb[24].mxu0 %vm1367_vm1, %v15030_v40  ;;  %v6494_v40 = vld [vmem:[#allocation2 + $0xb4] sm:$0xff] }
 0x71d   : > { %11649 = vmatprep.mubr.msk.bf16.mxu0 %vm13252_vm0, %v13251_v1  ;;  %v6504_v11 = vpack.c.bf16 %v6494_v40, %v15103_v19 }
 0x724   : > { %11650 = vmatmul.mubr.msk.bf16.gmra.mrb[28].mxu0 %vm1367_vm1, %v6294_v57 }
 0x725   : > { %11653 = vmatprep.mubr.msk.bf16.mxu0 %vm13252_vm0, %v13251_v1 }
 0x72c   : > { %11654 = vmatmul.mubr.msk.bf16.gmra.mrb[32].mxu0 %vm1367_vm1, %v6295_v30 }
 0x72d   : > { %11665 = vmatprep.mubr.msk.bf16.mxu0 %vm13252_vm0, %v13251_v1 }
 0x734   : > { %11666 = vmatmul.mubr.msk.bf16.vlgmr.msra.gmra.mrb[0].mxu0 %vm1367_vm1, %v15055_v51  ;;  %v6495_v51 = vld [vmem:[#allocation2 + $0xbc] sm:$0xff] }
 0x735   : > { %11669 = vmatprep.mubr.msk.bf16.mxu0 %vm13252_vm0, %v13251_v1 }
 0x73c   : > { %11670 = vmatmul.mubr.msk.bf16.gmra.mrb[4].mxu0 %vm1367_vm1, %v15066_v16  ;;  %v6496_v16 = vld [vmem:[#allocation2 + $0xc4] sm:$0xf] }
 0x73d   : > { %11673 = vmatprep.mubr.msk.bf16.mxu0 %vm13252_vm0, %v13251_v1 }
 0x744   : > { %11674 = vmatmul.mubr.msk.bf16.gmra.mrb[8].mxu0 %vm1367_vm1, %v15073_v56  ;;  %v6505_v56 = vpack.c.bf16 %v6496_v16, %v6495_v51 }
 0x745   : > { %11677 = vmatprep.mubr.msk.bf16.mxu0 %vm13252_vm0, %v13251_v1 }
 0x74c   : > { %11678 = vmatmul.mubr.msk.bf16.gmra.mrb[12].mxu0 %vm1367_vm1, %v15079_v33  ;;  %v13059_v33 = vld [vmem:[%s16041_s5 + $0x30] sm:$0xff]  }
 0x74d   : > { %11681 = vmatprep.mubr.msk.bf16.mxu0 %vm13252_vm0, %v13251_v1  ;;  %11706 = vmatpush3.bf16.msra.mxu1 %v13059_v33 }
 0x74e   : > { %11707 = vmatprep.subr.bf16.mxu1 %v13251_v1 }
 0x754   : > { %11682 = vmatmul.mubr.msk.bf16.gmra.mrb[16].mxu0 %vm1367_vm1, %v15085_v59  ;;  %v13060_v59 = vld [vmem:[%s16041_s5 + $0x38] sm:$0xff]  }
 0x755   : > { %11685 = vmatprep.mubr.msk.bf16.mxu0 %vm13252_vm0, %v13251_v1  ;;  %11708 = vmatpush3.bf16.msra.mxu1 %v13060_v59 }
 0x756   : > { %11713 = vmatprep.subr.bf16.mxu1 %v13251_v1 }
 0x75c   : > { %11686 = vmatmul.mubr.msk.bf16.gmra.mrb[20].mxu0 %vm1367_vm1, %v15091_v5 }
 0x75d   : > { %11689 = vmatprep.mubr.msk.bf16.mxu0 %vm13252_vm0, %v13251_v1 }
 0x764   : > { %11690 = vmatmul.mubr.msk.bf16.gmra.mrb[24].mxu0 %vm1367_vm1, %v15097_v6 }
 0x765   : > { %11693 = vmatprep.mubr.msk.bf16.mxu0 %vm13252_vm0, %v13251_v1 }
 0x76c   : > { %11694 = vmatmul.mubr.msk.bf16.gmra.mrb[28].mxu0 %vm1367_vm1, %v6504_v11 }
 0x76d   : > { %11697 = vmatprep.mubr.msk.bf16.mxu0 %vm13252_vm0, %v13251_v1 }
 0x774   : > { %11698 = vmatmul.mubr.msk.bf16.gmra.mrb[32].mxu0 %vm1367_vm1, %v6505_v56 }
 0x807   : > { %v6600_v5 = vpop.f32.mrb[0].mxu0 }
 0x808   : > { %v12009_v6 = vadd.f32 %v6600_v5, %v14866_v60  ;;  %v11667_v19 = vpop.f32.mrb[1].mxu0 }
 0x809   : > { %v6603_v8 = vpop.f32.mrb[2].mxu0 }
 0x80a   : > { %6689 = vst.msk [vmem:[#allocation3] sm:$0xff] %vm1367_vm1, %v12009_v6  ;;  %v12010_v24 = vadd.f32 %v6603_v8, %v14870_v52  ;;  %v11668_v0 = vpop.f32.mrb[3].mxu0 }
 0x80c   : > { %6690 = vst.msk [vmem:[#allocation3 + $0x8] sm:$0xff] %vm1367_vm1, %v12010_v24  ;;  %v16076_v24 = vld [vmem:[#allocation7_spill] sm:$0xff] }
 0x80f   : > { %v6608_v36 = vpop.f32.mrb[4].mxu0 }
 0x810   : > { %v12011_v17 = vadd.f32 %v6608_v36, %v14873_v28  ;;  %v11671_v15 = vpop.f32.mrb[5].mxu0 }
 0x811   : > { %v6611_v48 = vpop.f32.mrb[6].mxu0 }
 0x812   : > { %6691 = vst.msk [vmem:[#allocation3 + $0x10] sm:$0xff] %vm1367_vm1, %v12011_v17  ;;  %v12012_v9 = vadd.f32 %v6611_v48, %v14877_v2  ;;  %v11672_v3 = vpop.f32.mrb[7].mxu0  ;;  %v15467_v2 = vld [vmem:[%s16040_s4] ss:$0 sm:$0xff]  ;;  %v16077_v48 = vld [vmem:[#allocation8_spill] sm:$0xff] }
 0x813   : > { %v6707_v62 = vld [vmem:[#allocation3] ss:$2 sm:$0x1f]  ;;  %v6709_v29 = vld [vmem:[#allocation3 + $0x1] ss:$2 sm:$0x1f] }
 0x814   : > { %6692 = vst.msk [vmem:[#allocation3 + $0x18] sm:$0xff] %vm1367_vm1, %v12012_v9  ;;  %v6714_v35 = vmax.f32 %v6707_v62, %v6709_v29  ;;  %v13070_v62 = vld [vmem:[%s16041_s5 + $0x68] sm:$0xff]   ;;  %v13072_v29 = vld [vmem:[%s16041_s5 + $0x78] sm:$0xff]  }
 0x817   : > { %v6616_v60 = vpop.f32.mrb[8].mxu0 }
 0x818   : > { %v12013_v42 = vadd.f32 %v6616_v60, %v14935_v25  ;;  %v11675_v52 = vpop.f32.mrb[9].mxu0 }
 0x819   : > { %v6619_v63 = vpop.f32.mrb[10].mxu0  ;;  %v6711_v55 = vld [vmem:[#allocation3 + $0xe] ss:$2 sm:$0x1f] }
 0x81a   : > { %6693 = vst.msk [vmem:[#allocation3 + $0x20] sm:$0xff] %vm1367_vm1, %v12013_v42  ;;  %v12014_v28 = vadd.f32 %v6619_v63, %v14939_v46  ;;  %v11676_v41 = vpop.f32.mrb[11].mxu0  ;;  %v6713_v61 = vld [vmem:[#allocation3 + $0xf] ss:$2 sm:$0x1f]  ;;  %v13073_v63 = vld [vmem:[%s16041_s5 + $0x80] sm:$0xff]  }
 0x81b   : > { %v6715_v49 = vmax.f32 %v6711_v55, %v6713_v61  ;;  %v13071_v52 = vld [vmem:[%s16041_s5 + $0x70] sm:$0xff]   ;;  %v13076_v61 = vld [vmem:[%s16041_s5 + $0x98] sm:$0xff]  }
 0x81c   : > { %6694 = vst.msk [vmem:[#allocation3 + $0x28] sm:$0xff] %vm1367_vm1, %v12014_v28  ;;  %v13074_v28 = vld [vmem:[%s16041_s5 + $0x88] sm:$0xff]   ;;  %v13075_v41 = vld [vmem:[%s16041_s5 + $0x90] sm:$0xff]  }
 0x81d   : > { %v6716_v25 = vmax.f32 %v6714_v35, %v6715_v49 }
 0x81f   : > { %v6624_v53 = vpop.f32.mrb[12].mxu0  ;;  %v6724_v50 = vadd.f32 %v15467_v2, %v6716_v25  ;;  %v13077_v25 = vld [vmem:[%s16041_s5 + $0xa0] sm:$0xff]  }
 0x820   : > { %v12015_v12 = vadd.f32 %v6624_v53, %v14945_v22  ;;  %v11679_v20 = vpop.f32.mrb[13].mxu0 }
 0x821   : > { %v6627_v46 = vpop.f32.mrb[14].mxu0  ;;  %v6725_v39 = vmax.f32 %v6724_v50, 0.0  ;;  %v7116_v53 = vld [vmem:[#allocation3 + $0x1c] ss:$2 sm:$0x1f] }
 0x822   : > { %6695 = vst.msk [vmem:[#allocation3 + $0x30] sm:$0xff] %vm1367_vm1, %v12015_v12  ;;  %v12016_v13 = vadd.f32 %v6627_v46, %v14949_v4  ;;  %v11680_v44 = vpop.f32.mrb[15].mxu0  ;;  %v13062_v4 = vld [vmem:[%s16041_s5 + $0x8] sm:$0xff]  }
 0x823   : > { %v15473_v47 = vpack.c.bf16 %v6725_v39, %v6725_v39  ;;  %v7118_v50 = vld [vmem:[#allocation3 + $0x1d] ss:$2 sm:$0x1f]  ;;  %v13079_v44 = vld [vmem:[%s16041_s5 + $0xb0] sm:$0xff]  }
 0x824   : > { %6696 = vst.msk [vmem:[#allocation3 + $0x38] sm:$0xff] %vm1367_vm1, %v12016_v13  ;;  %v7123_v46 = vmax.f32 %v7116_v53, %v7118_v50  ;;  %v13078_v39 = vld [vmem:[%s16041_s5 + $0xa8] sm:$0xff]  }
 0x825   : > { %v6745_v21 = vshrl.u32 %v15473_v47, 16  ;;  %v6890_v17 = vrot.slane %v15473_v47, 1  ;;  %v7046_v20 = vrot.slane %v15473_v47, 2  ;;  %v13114_v53 = vld [vmem:[%s16041_s5 + $0x1c8] sm:$0xff]  }
 0x827   : > { %v6632_v31 = vpop.f32.mrb[16].mxu0  ;;  %11710 = vmatmul.mubr.msk.bf16.vlgmr.msra.gmra.mrb[244].mxu1 %vm1367_vm1, %v6745_v21  ;;  %v6968_v55 = vrot.slane %v6745_v21, 1 }
 0x828   : > { %v12017_v22 = vadd.f32 %v6632_v31, %v14955_v23  ;;  %v11683_v32 = vpop.f32.mrb[17].mxu0  ;;  %11714 = vmatpush3.bf16.msra.mxu1 %v13061_v43  ;;  %11721 = vmatprep.mubr.msk.bf16.mxu1 %vm13252_vm0, %v13251_v1  ;;  %v13063_v23 = vld [vmem:[%s16041_s5 + $0x10] sm:$0xff]   ;;  %v13080_v43 = vld [vmem:[%s16041_s5 + $0xb8] sm:$0xff]   ;;  %v13081_v31 = vld [vmem:[%s16041_s5 + $0xc0] sm:$0xff]  }
 0x829   : > { %v6635_v38 = vpop.f32.mrb[18].mxu0  ;;  %11715 = vmatprep.subr.bf16.mxu1 %v13251_v1  ;;  %v7120_v35 = vld [vmem:[#allocation3 + $0x2a] ss:$2 sm:$0x1f]  ;;  %v13082_v32 = vld [vmem:[%s16041_s5 + $0xc8] sm:$0xff]  }
 0x82a   : > { %6697 = vst.msk [vmem:[#allocation3 + $0x40] sm:$0xff] %vm1367_vm1, %v12017_v22  ;;  %v12018_v10 = vadd.f32 %v6635_v38, %v14959_v58  ;;  %v11684_v14 = vpop.f32.mrb[19].mxu0  ;;  %v7122_v49 = vld [vmem:[#allocation3 + $0x2b] ss:$2 sm:$0x1f] }
 0x82b   : > { %v7124_v12 = vmax.f32 %v7120_v35, %v7122_v49  ;;  %v13084_v38 = vld [vmem:[%s16041_s5 + $0xd8] sm:$0xff]   ;;  %v13113_v49 = vld [vmem:[%s16041_s5 + $0x1c0] sm:$0xff]  }
 0x82c   : > { %6698 = vst.msk [vmem:[#allocation3 + $0x48] sm:$0xff] %vm1367_vm1, %v12018_v10  ;;  %11716 = vmatpush3.bf16.msra.mxu1 %v13062_v4  ;;  %v13083_v4 = vld [vmem:[%s16041_s5 + $0xd0] sm:$0xff]   ;;  %v13085_v10 = vld [vmem:[%s16041_s5 + $0xe0] sm:$0xff]   ;;  %v13112_v35 = vld [vmem:[%s16041_s5 + $0x1b8] sm:$0xff]  }
 0x82d   : > { %11717 = vmatprep.subr.bf16.mxu1 %v13251_v1  ;;  %v7125_v13 = vmax.f32 %v7123_v46, %v7124_v12  ;;  %v13115_v46 = vld [vmem:[%s16041_s5 + $0x1d0] sm:$0xff]  }
 0x82f   : > { %v6640_v7 = vpop.f32.mrb[20].mxu0 }
 0x830   : > { %v12019_v57 = vadd.f32 %v6640_v7, %v14965_v45  ;;  %v11687_v26 = vpop.f32.mrb[21].mxu0  ;;  %11718 = vmatpush3.bf16.msra.mxu1 %v13063_v23  ;;  %v13065_v45 = vld [vmem:[%s16041_s5 + $0x40] sm:$0xff]   ;;  %v13086_v23 = vld [vmem:[%s16041_s5 + $0xe8] sm:$0xff]   ;;  %v13087_v7 = vld [vmem:[%s16041_s5 + $0xf0] sm:$0xff]  }
 0x831   : > { %v6643_v58 = vpop.f32.mrb[22].mxu0  ;;  %11719 = vmatprep.subr.bf16.mxu1 %v13251_v1  ;;  %v13089_v26 = vld [vmem:[%s16041_s5 + $0x100] sm:$0xff]  }
 0x832   : > { %6699 = vst.msk [vmem:[#allocation3 + $0x50] sm:$0xff] %vm1367_vm1, %v12019_v57  ;;  %v12020_v30 = vadd.f32 %v6643_v58, %v14973_v37  ;;  %v11688_v40 = vpop.f32.mrb[23].mxu0  ;;  %v13066_v37 = vld [vmem:[%s16041_s5 + $0x48] sm:$0xff]   ;;  %v13088_v57 = vld [vmem:[%s16041_s5 + $0xf8] sm:$0xff]  }
 0x833   : > { %v13090_v58 = vld [vmem:[%s16041_s5 + $0x108] sm:$0xff]   ;;  %v13092_v40 = vld [vmem:[%s16041_s5 + $0x118] sm:$0xff]  }
 0x834   : > { %6700 = vst.msk [vmem:[#allocation3 + $0x58] sm:$0xff] %vm1367_vm1, %v12020_v30  ;;  %11720 = vmatpush3.bf16.msra.mxu1 %v13064_v54  ;;  %v13091_v30 = vld [vmem:[%s16041_s5 + $0x110] sm:$0xff]  }
 0x835   : > { %11725 = vmatprep.subr.bf16.mxu1 %v13251_v1 }
 0x837   : > { %v6648_v11 = vpop.f32.mrb[24].mxu0  ;;  %11722 = vmatmul.mubr.msk.bf16.vlgmr.msra.gmra.mrb[248].mxu1 %vm1367_vm1, %v15473_v47  ;;  %v7126_v47 = vadd.f32 %v15467_v2, %v7125_v13  ;;  %v13116_v13 = vld [vmem:[%s16041_s5 + $0x1d8] sm:$0xff]  }
 0x838   : > { %v12021_v51 = vadd.f32 %v6648_v11, %v14983_v18  ;;  %v11691_v16 = vpop.f32.mrb[25].mxu0  ;;  %11726 = vmatpush3.bf16.msra.mxu1 %v13065_v45  ;;  %11733 = vmatprep.mubr.msk.bf16.mxu1 %vm13252_vm0, %v13251_v1  ;;  %v13067_v18 = vld [vmem:[%s16041_s5 + $0x50] sm:$0xff]   ;;  %v13093_v45 = vld [vmem:[%s16041_s5 + $0x120] sm:$0xff]  }
 0x839   : > { %v6651_v56 = vpop.f32.mrb[26].mxu0  ;;  %11727 = vmatprep.subr.bf16.mxu1 %v13251_v1  ;;  %v7127_v21 = vmax.f32 %v7126_v47, 0.0  ;;  %v13095_v16 = vld [vmem:[%s16041_s5 + $0x130] sm:$0xff]  }
 0x83a   : > { %6701 = vst.msk [vmem:[#allocation3 + $0x60] sm:$0xff] %vm1367_vm1, %v12021_v51  ;;  %v12022_v33 = vadd.f32 %v6651_v56, %v14991_v34  ;;  %v11692_v59 = vpop.f32.mrb[27].mxu0  ;;  %v13068_v34 = vld [vmem:[%s16041_s5 + $0x58] sm:$0xff]   ;;  %v13094_v51 = vld [vmem:[%s16041_s5 + $0x128] sm:$0xff]  }
 0x83b   : > { %v15600_v22 = vpack.c.bf16 %v7127_v21, %v7127_v21  ;;  %v13096_v56 = vld [vmem:[%s16041_s5 + $0x138] sm:$0xff]   ;;  %v7521_v59 = vld [vmem:[#allocation3 + $0x38] ss:$2 sm:$0x1f] }
 0x83c   : > { %6702 = vst.msk [vmem:[#allocation3 + $0x68] sm:$0xff] %vm1367_vm1, %v12022_v33  ;;  %11728 = vmatpush3.bf16.msra.mxu1 %v13066_v37  ;;  %v7525_v37 = vld [vmem:[#allocation3 + $0x46] ss:$2 sm:$0x1f] }
 0x83d   : > { %11729 = vmatprep.subr.bf16.mxu1 %v13251_v1  ;;  %v7215_v14 = vshrl.u32 %v15600_v22, 16  ;;  %v7295_v54 = vrot.slane %v15600_v22, 1  ;;  %v7527_v33 = vld [vmem:[#allocation3 + $0x47] ss:$2 sm:$0x1f] }
 0x83e   : > { %v7928_v21 = vld [vmem:[#allocation3 + $0x55] ss:$2 sm:$0x1f] }
 0x83f   : > { %v6656_v5 = vpop.f32.mrb[28].mxu0  ;;  %v7373_v11 = vrot.slane %v7215_v14, 1 }
 0x840   : > { %v12023_v6 = vadd.f32 %v6656_v5, %v14998_v27  ;;  %v11695_v19 = vpop.f32.mrb[29].mxu0  ;;  %11730 = vmatpush3.bf16.msra.mxu1 %v13067_v18  ;;  %v13069_v27 = vld [vmem:[%s16041_s5 + $0x60] sm:$0xff]  }
 0x841   : > { %v6659_v8 = vpop.f32.mrb[30].mxu0  ;;  %11731 = vmatprep.subr.bf16.mxu1 %v13251_v1  ;;  %v7523_v18 = vld [vmem:[#allocation3 + $0x39] ss:$2 sm:$0x1f]  ;;  %v7451_v19 = vrot.slane %v15600_v22, 2 }
 0x842   : > { %6703 = vst.msk [vmem:[#allocation3 + $0x70] sm:$0xff] %vm1367_vm1, %v12023_v6  ;;  %v12024_v0 = vadd.f32 %v6659_v8, %v16076_v24  ;;  %v11696_v36 = vpop.f32.mrb[31].mxu0  ;;  %v13097_v5 = vld [vmem:[%s16041_s5 + $0x140] sm:$0xff]   ;;  %v7529_v6 = vmax.f32 %v7525_v37, %v7527_v33  ;;  %v7528_v8 = vmax.f32 %v7521_v59, %v7523_v18  ;;  %v13123_v59 = vld [vmem:[%s16041_s5 + $0x210] sm:$0xff]  }
 0x843   : > { %v7932_v47 = vld [vmem:[#allocation3 + $0x63] ss:$2 sm:$0x1f] }
 0x844   : > { %6704 = vst.msk [vmem:[#allocation3 + $0x78] sm:$0xff] %vm1367_vm1, %v12024_v0  ;;  %11732 = vmatpush3.bf16.msra.mxu1 %v13068_v34  ;;  %v13098_v34 = vld [vmem:[%s16041_s5 + $0x148] sm:$0xff]   ;;  %v7530_v24 = vmax.f32 %v7528_v8, %v7529_v6  ;;  %v13099_v0 = vld [vmem:[%s16041_s5 + $0x150] sm:$0xff]   ;;  %v13125_v6 = vld [vmem:[%s16041_s5 + $0x220] sm:$0xff]  }
 0x845   : > { %11737 = vmatprep.subr.bf16.mxu1 %v13251_v1  ;;  %v13126_v8 = vld [vmem:[%s16041_s5 + $0x228] sm:$0xff]  }
 0x846   : > { %v7531_v36 = vadd.f32 %v15467_v2, %v7530_v24 }
 0x847   : > { %v6664_v15 = vpop.f32.mrb[32].mxu0  ;;  %11734 = vmatmul.mubr.msk.bf16.vlgmr.msra.gmra.mrb[252].mxu1 %vm1367_vm1, %v6890_v17 }
 0x848   : > { %v12025_v9 = vadd.f32 %v6664_v15, %v16077_v48  ;;  %v11699_v3 = vpop.f32.mrb[33].mxu0  ;;  %11738 = vmatpush3.bf16.msra.mxu1 %v13069_v27  ;;  %11745 = vmatprep.mubr.msk.bf16.mxu1 %vm13252_vm0, %v13251_v1  ;;  %v13100_v27 = vld [vmem:[%s16041_s5 + $0x158] sm:$0xff]   ;;  %v7532_v17 = vmax.f32 %v7531_v36, 0.0  ;;  %v13101_v15 = vld [vmem:[%s16041_s5 + $0x160] sm:$0xff]  }
 0x849   : > { %v6667_v60 = vpop.f32.mrb[34].mxu0  ;;  %11739 = vmatprep.subr.bf16.mxu1 %v13251_v1  ;;  %v13103_v3 = vld [vmem:[%s16041_s5 + $0x170] sm:$0xff]  }
 0x84a   : > { %6705 = vst.msk [vmem:[#allocation3 + $0x80] sm:$0xff] %vm1367_vm1, %v12025_v9  ;;  %v11700_v42 = vpop.f32.mrb[35].mxu0  ;;  %v15702_v48 = vpack.c.bf16 %v7532_v17, %v7532_v17  ;;  %v13102_v9 = vld [vmem:[%s16041_s5 + $0x168] sm:$0xff]   ;;  %v13104_v60 = vld [vmem:[%s16041_s5 + $0x178] sm:$0xff]  }
 0x84c   : > { %11740 = vmatpush3.bf16.msra.mxu1 %v13070_v62  ;;  %v13105_v62 = vld [vmem:[%s16041_s5 + $0x180] sm:$0xff]   ;;  %v7620_v42 = vshrl.u32 %v15702_v48, 16 }
 0x84d   : > { %11741 = vmatprep.subr.bf16.mxu1 %v13251_v1 }
 0x850   : > { %11742 = vmatpush3.bf16.msra.mxu1 %v13071_v52  ;;  %v13106_v52 = vld [vmem:[%s16041_s5 + $0x188] sm:$0xff]  }
 0x851   : > { %11743 = vmatprep.subr.bf16.mxu1 %v13251_v1 }
 0x854   : > { %11744 = vmatpush3.bf16.msra.mxu1 %v13072_v29  ;;  %v13107_v29 = vld [vmem:[%s16041_s5 + $0x190] sm:$0xff]  }
 0x855   : > { %11749 = vmatprep.subr.bf16.mxu1 %v13251_v1 }
 0x857   : > { %11746 = vmatmul.mubr.msk.bf16.vlgmr.msra.gmra.mrb[0].mxu1 %vm1367_vm1, %v6968_v55  ;;  %v13109_v55 = vld [vmem:[%s16041_s5 + $0x1a0] sm:$0xff]  }
 0x858   : > { %11750 = vmatpush3.bf16.msra.mxu1 %v13073_v63  ;;  %11757 = vmatprep.mubr.msk.bf16.mxu1 %vm13252_vm0, %v13251_v1  ;;  %v13108_v63 = vld [vmem:[%s16041_s5 + $0x198] sm:$0xff]  }
 0x859   : > { %11751 = vmatprep.subr.bf16.mxu1 %v13251_v1 }
 0x85c   : > { %11752 = vmatpush3.bf16.msra.mxu1 %v13074_v28  ;;  %v7700_v28 = vrot.slane %v15702_v48, 1 }
 0x85d   : > { %11753 = vmatprep.subr.bf16.mxu1 %v13251_v1 }
 0x860   : > { %11754 = vmatpush3.bf16.msra.mxu1 %v13075_v41  ;;  %v13110_v41 = vld [vmem:[%s16041_s5 + $0x1a8] sm:$0xff]  }
 0x861   : > { %11755 = vmatprep.subr.bf16.mxu1 %v13251_v1 }
 0x864   : > { %11756 = vmatpush3.bf16.msra.mxu1 %v13076_v61  ;;  %v13111_v61 = vld [vmem:[%s16041_s5 + $0x1b0] sm:$0xff]  }
 0x865   : > { %11761 = vmatprep.subr.bf16.mxu1 %v13251_v1 }
 0x867   : > { %11758 = vmatmul.mubr.msk.bf16.vlgmr.msra.gmra.mrb[4].mxu1 %vm1367_vm1, %v7046_v20 }
 0x868   : > { %11762 = vmatpush3.bf16.msra.mxu1 %v13077_v25  ;;  %11769 = vmatprep.mubr.msk.bf16.mxu1 %vm13252_vm0, %v13251_v1  ;;  %v7778_v25 = vrot.slane %v7620_v42, 1 }
 0x869   : > { %11763 = vmatprep.subr.bf16.mxu1 %v13251_v1 }
 0x86c   : > { %11764 = vmatpush3.bf16.msra.mxu1 %v13078_v39 }
 0x86d   : > { %11765 = vmatprep.subr.bf16.mxu1 %v13251_v1 }
 0x870   : > { %11766 = vmatpush3.bf16.msra.mxu1 %v13079_v44  ;;  %v7930_v44 = vld [vmem:[#allocation3 + $0x62] ss:$2 sm:$0x1f] }
 0x871   : > { %11767 = vmatprep.subr.bf16.mxu1 %v13251_v1 }
 0x874   : > { %11768 = vmatpush3.bf16.msra.mxu1 %v13080_v43  ;;  %v7926_v43 = vld [vmem:[#allocation3 + $0x54] ss:$2 sm:$0x1f] }
 0x875   : > { %11773 = vmatprep.subr.bf16.mxu1 %v13251_v1 }
 0x877   : > { %11770 = vmatmul.mubr.msk.bf16.vlgmr.msra.gmra.mrb[8].mxu1 %vm1367_vm1, %v15600_v22  ;;  %v7934_v22 = vmax.f32 %v7930_v44, %v7932_v47  ;;  %v8333_v44 = vld [vmem:[#allocation3 + $0x71] ss:$2 sm:$0x1f] }
 0x878   : > { %11774 = vmatpush3.bf16.msra.mxu1 %v13081_v31  ;;  %11781 = vmatprep.mubr.msk.bf16.mxu1 %vm13252_vm0, %v13251_v1  ;;  %v13117_v31 = vld [vmem:[%s16041_s5 + $0x1e0] sm:$0xff]  }
 0x879   : > { %11775 = vmatprep.subr.bf16.mxu1 %v13251_v1  ;;  %v13137_v47 = vld [vmem:[%s16041_s5 + $0x280] sm:$0xff]  }
 0x87c   : > { %11776 = vmatpush3.bf16.msra.mxu1 %v13082_v32  ;;  %v7856_v32 = vrot.slane %v15702_v48, 2 }
 0x87d   : > { %11777 = vmatprep.subr.bf16.mxu1 %v13251_v1 }
 0x880   : > { %11778 = vmatpush3.bf16.msra.mxu1 %v13083_v4  ;;  %v7933_v4 = vmax.f32 %v7926_v43, %v7928_v21 }
 0x881   : > { %11779 = vmatprep.subr.bf16.mxu1 %v13251_v1 }
 0x884   : > { %11780 = vmatpush3.bf16.msra.mxu1 %v13084_v38  ;;  %v13118_v38 = vld [vmem:[%s16041_s5 + $0x1e8] sm:$0xff]  }
 0x885   : > { %11785 = vmatprep.subr.bf16.mxu1 %v13251_v1 }
 0x887   : > { %11782 = vmatmul.mubr.msk.bf16.vlgmr.msra.gmra.mrb[12].mxu1 %vm1367_vm1, %v7215_v14 }
 0x888   : > { %11786 = vmatpush3.bf16.msra.mxu1 %v13085_v10  ;;  %11793 = vmatprep.mubr.msk.bf16.mxu1 %vm13252_vm0, %v13251_v1  ;;  %v7935_v10 = vmax.f32 %v7933_v4, %v7934_v22  ;;  %v13138_v22 = vld [vmem:[%s16041_s5 + $0x288] sm:$0xff]  }
 0x889   : > { %11787 = vmatprep.subr.bf16.mxu1 %v13251_v1 }
 0x88c   : > { %11788 = vmatpush3.bf16.msra.mxu1 %v13086_v23 }
 0x88d   : > { %11789 = vmatprep.subr.bf16.mxu1 %v13251_v1 }
 0x890   : > { %11790 = vmatpush3.bf16.msra.mxu1 %v13087_v7 }
 0x891   : > { %11791 = vmatprep.subr.bf16.mxu1 %v13251_v1 }
 0x894   : > { %11792 = vmatpush3.bf16.msra.mxu1 %v13088_v57 }
 0x895   : > { %11797 = vmatprep.subr.bf16.mxu1 %v13251_v1 }
 0x897   : > { %11794 = vmatmul.mubr.msk.bf16.vlgmr.msra.gmra.mrb[16].mxu1 %vm1367_vm1, %v7295_v54  ;;  %v7936_v54 = vadd.f32 %v15467_v2, %v7935_v10 }
 0x898   : > { %11798 = vmatpush3.bf16.msra.mxu1 %v13089_v26  ;;  %11805 = vmatprep.mubr.msk.bf16.mxu1 %vm13252_vm0, %v13251_v1  ;;  %v13119_v26 = vld [vmem:[%s16041_s5 + $0x1f0] sm:$0xff]  }
 0x899   : > { %11799 = vmatprep.subr.bf16.mxu1 %v13251_v1 }
 0x89c   : > { %11800 = vmatpush3.bf16.msra.mxu1 %v13090_v58 }
 0x89d   : > { %11801 = vmatprep.subr.bf16.mxu1 %v13251_v1 }
 0x8a0   : > { %11802 = vmatpush3.bf16.msra.mxu1 %v13091_v30  ;;  %v13120_v30 = vld [vmem:[%s16041_s5 + $0x1f8] sm:$0xff]  }
 0x8a1   : > { %11803 = vmatprep.subr.bf16.mxu1 %v13251_v1 }
 0x8a4   : > { %11804 = vmatpush3.bf16.msra.mxu1 %v13092_v40  ;;  %v7937_v40 = vmax.f32 %v7936_v54, 0.0 }
 0x8a5   : > { %11809 = vmatprep.subr.bf16.mxu1 %v13251_v1 }
 0x8a7   : > { %11806 = vmatmul.mubr.msk.bf16.vlgmr.msra.gmra.mrb[20].mxu1 %vm1367_vm1, %v7373_v11  ;;  %v15804_v11 = vpack.c.bf16 %v7937_v40, %v7937_v40 }
 0x8a8   : > { %11810 = vmatpush3.bf16.msra.mxu1 %v13093_v45  ;;  %11817 = vmatprep.mubr.msk.bf16.mxu1 %vm13252_vm0, %v13251_v1  ;;  %v13121_v45 = vld [vmem:[%s16041_s5 + $0x200] sm:$0xff]  }
 0x8a9   : > { %11811 = vmatprep.subr.bf16.mxu1 %v13251_v1  ;;  %v8261_v21 = vrot.slane %v15804_v11, 2 }
 0x8ac   : > { %11812 = vmatpush3.bf16.msra.mxu1 %v13094_v51  ;;  %v13122_v51 = vld [vmem:[%s16041_s5 + $0x208] sm:$0xff]  }
 0x8ad   : > { %11813 = vmatprep.subr.bf16.mxu1 %v13251_v1 }
 0x8b0   : > { %11814 = vmatpush3.bf16.msra.mxu1 %v13095_v16 }
 0x8b1   : > { %11815 = vmatprep.subr.bf16.mxu1 %v13251_v1 }
 0x8b4   : > { %11816 = vmatpush3.bf16.msra.mxu1 %v13096_v56 }
 0x8b5   : > { %11821 = vmatprep.subr.bf16.mxu1 %v13251_v1 }
 0x8b7   : > { %11818 = vmatmul.mubr.msk.bf16.vlgmr.msra.gmra.mrb[24].mxu1 %vm1367_vm1, %v7451_v19  ;;  %v8025_v19 = vshrl.u32 %v15804_v11, 16 }
 0x8b8   : > { %11822 = vmatpush3.bf16.msra.mxu1 %v13097_v5  ;;  %11829 = vmatprep.mubr.msk.bf16.mxu1 %vm13252_vm0, %v13251_v1  ;;  %v13124_v5 = vld [vmem:[%s16041_s5 + $0x218] sm:$0xff]  }
 0x8b9   : > { %11823 = vmatprep.subr.bf16.mxu1 %v13251_v1 }
 0x8bc   : > { %11824 = vmatpush3.bf16.msra.mxu1 %v13098_v34 }
 0x8bd   : > { %11825 = vmatprep.subr.bf16.mxu1 %v13251_v1 }
 0x8c0   : > { %11826 = vmatpush3.bf16.msra.mxu1 %v13099_v0 }
 0x8c1   : > { %11827 = vmatprep.subr.bf16.mxu1 %v13251_v1 }
 0x8c4   : > { %11828 = vmatpush3.bf16.msra.mxu1 %v13100_v27  ;;  %v13127_v27 = vld [vmem:[%s16041_s5 + $0x230] sm:$0xff]  }
 0x8c5   : > { %11833 = vmatprep.subr.bf16.mxu1 %v13251_v1 }
 0x8c7   : > { %11830 = vmatmul.mubr.msk.bf16.vlgmr.msra.gmra.mrb[28].mxu1 %vm1367_vm1, %v15702_v48  ;;  %v13129_v48 = vld [vmem:[%s16041_s5 + $0x240] sm:$0xff]  }
 0x8c8   : > { %11834 = vmatpush3.bf16.msra.mxu1 %v13101_v15  ;;  %11841 = vmatprep.mubr.msk.bf16.mxu1 %vm13252_vm0, %v13251_v1  ;;  %v13128_v15 = vld [vmem:[%s16041_s5 + $0x238] sm:$0xff]  }
 0x8c9   : > { %11835 = vmatprep.subr.bf16.mxu1 %v13251_v1 }
 0x8cc   : > { %11836 = vmatpush3.bf16.msra.mxu1 %v13102_v9  ;;  %v8105_v9 = vrot.slane %v15804_v11, 1 }
 0x8cd   : > { %11837 = vmatprep.subr.bf16.mxu1 %v13251_v1 }
 0x8d0   : > { %11838 = vmatpush3.bf16.msra.mxu1 %v13103_v3  ;;  %v13130_v3 = vld [vmem:[%s16041_s5 + $0x248] sm:$0xff]  }
 0x8d1   : > { %11839 = vmatprep.subr.bf16.mxu1 %v13251_v1 }
 0x8d4   : > { %11840 = vmatpush3.bf16.msra.mxu1 %v13104_v60 }
 0x8d5   : > { %11845 = vmatprep.subr.bf16.mxu1 %v13251_v1 }
 0x8d7   : > { %11842 = vmatmul.mubr.msk.bf16.vlgmr.msra.gmra.mrb[32].mxu1 %vm1367_vm1, %v7620_v42 }
 0x8d8   : > { %11846 = vmatpush3.bf16.msra.mxu1 %v13105_v62  ;;  %11853 = vmatprep.mubr.msk.bf16.mxu1 %vm13252_vm0, %v13251_v1 }
 0x8d9   : > { %11847 = vmatprep.subr.bf16.mxu1 %v13251_v1 }
 0x8dc   : > { %11848 = vmatpush3.bf16.msra.mxu1 %v13106_v52 }
 0x8dd   : > { %11849 = vmatprep.subr.bf16.mxu1 %v13251_v1 }
 0x8e0   : > { %11850 = vmatpush3.bf16.msra.mxu1 %v13107_v29  ;;  %v13131_v29 = vld [vmem:[%s16041_s5 + $0x250] sm:$0xff]  }
 0x8e1   : > { %11851 = vmatprep.subr.bf16.mxu1 %v13251_v1 }
 0x8e4   : > { %11852 = vmatpush3.bf16.msra.mxu1 %v13108_v63 }
 0x8e5   : > { %11857 = vmatprep.subr.bf16.mxu1 %v13251_v1 }
 0x8e7   : > { %11854 = vmatmul.mubr.msk.bf16.vlgmr.msra.gmra.mrb[36].mxu1 %vm1367_vm1, %v7700_v28  ;;  %v13133_v28 = vld [vmem:[%s16041_s5 + $0x260] sm:$0xff]  }
 0x8e8   : > { %11858 = vmatpush3.bf16.msra.mxu1 %v13109_v55  ;;  %11865 = vmatprep.mubr.msk.bf16.mxu1 %vm13252_vm0, %v13251_v1  ;;  %v13132_v55 = vld [vmem:[%s16041_s5 + $0x258] sm:$0xff]  }
 0x8e9   : > { %11859 = vmatprep.subr.bf16.mxu1 %v13251_v1 }
 0x8ec   : > { %11860 = vmatpush3.bf16.msra.mxu1 %v13110_v41  ;;  %v8183_v41 = vrot.slane %v8025_v19, 1 }
 0x8ed   : > { %11861 = vmatprep.subr.bf16.mxu1 %v13251_v1 }
 0x8f0   : > { %11862 = vmatpush3.bf16.msra.mxu1 %v13111_v61  ;;  %v13134_v61 = vld [vmem:[%s16041_s5 + $0x268] sm:$0xff]  }
 0x8f1   : > { %11863 = vmatprep.subr.bf16.mxu1 %v13251_v1 }
 0x8f4   : > { %11864 = vmatpush3.bf16.msra.mxu1 %v13112_v35 }
 0x8f5   : > { %11869 = vmatprep.subr.bf16.mxu1 %v13251_v1 }
 0x8f7   : > { %11866 = vmatmul.mubr.msk.bf16.vlgmr.msra.gmra.mrb[40].mxu1 %vm1367_vm1, %v7778_v25 }
 0x8f8   : > { %11870 = vmatpush3.bf16.msra.mxu1 %v13113_v49  ;;  %11877 = vmatprep.mubr.msk.bf16.mxu1 %vm13252_vm0, %v13251_v1 }
 0x8f9   : > { %11871 = vmatprep.subr.bf16.mxu1 %v13251_v1 }
 0x8fa   : > { %v6808_v50 = vpop.f32.mrb[244].mxu1 }
 0x8fb   : > { %v11711_v12 = vpop.f32.mrb[245].mxu1 }
 0x8fc   : > { %11872 = vmatpush3.bf16.msra.mxu1 %v13114_v53  ;;  %v6811_v20 = vpop.f32.mrb[246].mxu1 }
 0x8fd   : > { %v11712_v39 = vpop.f32.mrb[247].mxu1  ;;  %11873 = vmatprep.subr.bf16.mxu1 %v13251_v1  ;;  %v13136_v20 = vld [vmem:[%s16041_s5 + $0x278] sm:$0xff]  }
 0x8fe   : > { %v8337_v39 = vld [vmem:[#allocation3 + $0x7f] ss:$2 sm:$0x1f] }
 0x900   : > { %11874 = vmatpush3.bf16.msra.mxu1 %v13115_v46  ;;  %v8335_v46 = vld [vmem:[#allocation3 + $0x7e] ss:$2 sm:$0x1f] }
 0x901   : > { %11875 = vmatprep.subr.bf16.mxu1 %v13251_v1  ;;  %v8339_v43 = vmax.f32 %v8335_v46, %v8337_v39 }
 0x904   : > { %11876 = vmatpush3.bf16.msra.mxu1 %v13116_v13  ;;  %v8331_v13 = vld [vmem:[#allocation3 + $0x70] ss:$2 sm:$0x1f] }
 0x905   : > { %11881 = vmatprep.subr.bf16.mxu1 %v13251_v1 }
 0x907   : > { %11878 = vmatmul.mubr.msk.bf16.vlgmr.msra.gmra.mrb[44].mxu1 %vm1367_vm1, %v7856_v32 }
 0x908   : > { %11882 = vmatpush3.bf16.msra.mxu1 %v13117_v31  ;;  %11889 = vmatprep.mubr.msk.bf16.mxu1 %vm13252_vm0, %v13251_v1  ;;  %v8338_v31 = vmax.f32 %v8331_v13, %v8333_v44 }
 0x909   : > { %11883 = vmatprep.subr.bf16.mxu1 %v13251_v1 }
 0x90a   : > { %v6874_v14 = vpop.f32.mrb[248].mxu1  ;;  %v8340_v32 = vmax.f32 %v8338_v31, %v8339_v43 }
 0x90b   : > { %v6875_v23 = vadd.f32 %v6874_v14, %v6808_v50  ;;  %v11723_v7 = vpop.f32.mrb[249].mxu1  ;;  %v13135_v50 = vld [vmem:[%s16041_s5 + $0x270] sm:$0xff]  }
 0x90c   : > { %v6877_v57 = vpop.f32.mrb[250].mxu1  ;;  %11884 = vmatpush3.bf16.msra.mxu1 %v13118_v38  ;;  %v8341_v7 = vadd.f32 %v15467_v2, %v8340_v32  ;;  %v13142_v2 = vld [vmem:[%s16041_s5 + $0x2a8] sm:$0xff]  }
 0x90d   : > { %v11724_v58 = vpop.f32.mrb[251].mxu1  ;;  %11885 = vmatprep.subr.bf16.mxu1 %v13251_v1 }
 0x90e   : > { %v8342_v54 = vmax.f32 %v8341_v7, 0.0  ;;  %v13141_v58 = vld [vmem:[%s16041_s5 + $0x2a0] sm:$0xff]  }
 0x910   : > { %11886 = vmatpush3.bf16.msra.mxu1 %v13119_v26  ;;  %v13140_v26 = vld [vmem:[%s16041_s5 + $0x298] sm:$0xff]  }
 0x911   : > { %11887 = vmatprep.subr.bf16.mxu1 %v13251_v1 }
 0x914   : > { %11888 = vmatpush3.bf16.msra.mxu1 %v13120_v30  ;;  %v15906_v30 = vpack.c.bf16 %v8342_v54, %v8342_v54 }
 0x915   : > { %11893 = vmatprep.subr.bf16.mxu1 %v13251_v1 }
 0x917   : > { %11890 = vmatmul.mubr.msk.bf16.vlgmr.msra.gmra.mrb[48].mxu1 %vm1367_vm1, %v15804_v11 }
 0x918   : > { %11894 = vmatpush3.bf16.msra.mxu1 %v13121_v45  ;;  %11901 = vmatprep.mubr.msk.bf16.mxu1 %vm13252_vm0, %v13251_v1 }
 0x919   : > { %11895 = vmatprep.subr.bf16.mxu1 %v13251_v1 }
 0x91a   : > { %v6952_v16 = vpop.f32.mrb[252].mxu1 }
 0x91b   : > { %v6958_v56 = vadd.f32 %v6952_v16, %v6875_v23  ;;  %v11735_v37 = vpop.f32.mrb[253].mxu1  ;;  %v13139_v23 = vld [vmem:[%s16041_s5 + $0x290] sm:$0xff]  }
 0x91c   : > { %v6955_v33 = vpop.f32.mrb[254].mxu1  ;;  %11896 = vmatpush3.bf16.msra.mxu1 %v13122_v51  ;;  %v13143_v16 = vld [vmem:[%s16041_s5 + $0x2b0] sm:$0xff]   ;;  %v13144_v37 = vld [vmem:[%s16041_s5 + $0x2b8] sm:$0xff]  }
 0x91d   : > { %v11736_v18 = vpop.f32.mrb[255].mxu1  ;;  %11897 = vmatprep.subr.bf16.mxu1 %v13251_v1  ;;  %v13145_v33 = vld [vmem:[%s16041_s5 + $0x2c0] sm:$0xff]  }
 0x91e   : > { %v13146_v18 = vld [vmem:[%s16041_s5 + $0x2c8] sm:$0xff]  }
 0x920   : > { %11898 = vmatpush3.bf16.msra.mxu1 %v13123_v59  ;;  %v8430_v59 = vshrl.u32 %v15906_v30, 16 }
 0x921   : > { %11899 = vmatprep.subr.bf16.mxu1 %v13251_v1 }
 0x924   : > { %11900 = vmatpush3.bf16.msra.mxu1 %v13124_v5 }
 0x925   : > { %11905 = vmatprep.subr.bf16.mxu1 %v13251_v1 }
 0x927   : > { %11902 = vmatmul.mubr.msk.bf16.vlgmr.msra.gmra.mrb[52].mxu1 %vm1367_vm1, %v8025_v19 }
 0x928   : > { %11906 = vmatpush3.bf16.msra.mxu1 %v13125_v6  ;;  %11913 = vmatprep.mubr.msk.bf16.mxu1 %vm13252_vm0, %v13251_v1 }
 0x929   : > { %11907 = vmatprep.subr.bf16.mxu1 %v13251_v1 }
 0x92a   : > { %v7030_v34 = vpop.f32.mrb[0].mxu1 }
 0x92b   : > { %v7036_v24 = vadd.f32 %v7030_v34, %v6958_v56  ;;  %v11747_v0 = vpop.f32.mrb[1].mxu1  ;;  %v13147_v34 = vld [vmem:[%s16041_s5 + $0x2d0] sm:$0xff]  }
 0x92c   : > { %v7033_v36 = vpop.f32.mrb[2].mxu1  ;;  %11908 = vmatpush3.bf16.msra.mxu1 %v13126_v8  ;;  %v13148_v0 = vld [vmem:[%s16041_s5 + $0x2d8] sm:$0xff]  }
 0x92d   : > { %v11748_v17 = vpop.f32.mrb[3].mxu1  ;;  %11909 = vmatprep.subr.bf16.mxu1 %v13251_v1  ;;  %v13149_v36 = vld [vmem:[%s16041_s5 + $0x2e0] sm:$0xff]  }
 0x92e   : > { %v13150_v17 = vld [vmem:[%s16041_s5 + $0x2e8] sm:$0xff]  }
 0x930   : > { %11910 = vmatpush3.bf16.msra.mxu1 %v13127_v27  ;;  %v8510_v27 = vrot.slane %v15906_v30, 1 }
 0x931   : > { %11911 = vmatprep.subr.bf16.mxu1 %v13251_v1 }
 0x934   : > { %11912 = vmatpush3.bf16.msra.mxu1 %v13128_v15 }
 0x935   : > { %11917 = vmatprep.subr.bf16.mxu1 %v13251_v1 }
 0x937   : > { %11914 = vmatmul.mubr.msk.bf16.vlgmr.msra.gmra.mrb[56].mxu1 %vm1367_vm1, %v8105_v9 }
 0x938   : > { %11918 = vmatpush3.bf16.msra.mxu1 %v13129_v48  ;;  %11925 = vmatprep.mubr.msk.bf16.mxu1 %vm13252_vm0, %v13251_v1 }
 0x939   : > { %11919 = vmatprep.subr.bf16.mxu1 %v13251_v1 }
 0x93a   : > { %v7108_v60 = vpop.f32.mrb[4].mxu1 }
 0x93b   : > { %v7114_v62 = vadd.f32 %v7108_v60, %v7036_v24  ;;  %v11759_v42 = vpop.f32.mrb[5].mxu1  ;;  %v13151_v60 = vld [vmem:[%s16041_s5 + $0x2f0] sm:$0xff]  }
 0x93c   : > { %v7111_v52 = vpop.f32.mrb[6].mxu1  ;;  %11920 = vmatpush3.bf16.msra.mxu1 %v13130_v3  ;;  %v13152_v42 = vld [vmem:[%s16041_s5 + $0x2f8] sm:$0xff]  }
 0x93d   : > { %v11760_v63 = vpop.f32.mrb[7].mxu1  ;;  %11921 = vmatprep.subr.bf16.mxu1 %v13251_v1  ;;  %v13153_v52 = vld [vmem:[%s16041_s5 + $0x300] sm:$0xff]  }
 0x93e   : > { %v13154_v63 = vld [vmem:[%s16041_s5 + $0x308] sm:$0xff]  }
 0x940   : > { %11922 = vmatpush3.bf16.msra.mxu1 %v13131_v29  ;;  %v8588_v29 = vrot.slane %v8430_v59, 1 }
 0x941   : > { %11923 = vmatprep.subr.bf16.mxu1 %v13251_v1 }
 0x944   : > { %11924 = vmatpush3.bf16.msra.mxu1 %v13132_v55 }
 0x945   : > { %11929 = vmatprep.subr.bf16.mxu1 %v13251_v1 }
 0x947   : > { %11926 = vmatmul.mubr.msk.bf16.vlgmr.msra.gmra.mrb[60].mxu1 %vm1367_vm1, %v8183_v41 }
 0x948   : > { %11930 = vmatpush3.bf16.msra.mxu1 %v13133_v28  ;;  %11937 = vmatprep.mubr.msk.bf16.mxu1 %vm13252_vm0, %v13251_v1 }
 0x949   : > { %11931 = vmatprep.subr.bf16.mxu1 %v13251_v1 }
 0x94a   : > { %v7199_v35 = vpop.f32.mrb[8].mxu1 }
 0x94b   : > { %v7205_v49 = vadd.f32 %v7199_v35, %v7114_v62  ;;  %v11771_v25 = vpop.f32.mrb[9].mxu1  ;;  %v13155_v35 = vld [vmem:[%s16041_s5 + $0x310] sm:$0xff]  }
 0x94c   : > { %v7202_v53 = vpop.f32.mrb[10].mxu1  ;;  %11932 = vmatpush3.bf16.msra.mxu1 %v13134_v61  ;;  %v13156_v25 = vld [vmem:[%s16041_s5 + $0x318] sm:$0xff]  }
 0x94d   : > { %v11772_v12 = vpop.f32.mrb[11].mxu1  ;;  %11933 = vmatprep.subr.bf16.mxu1 %v13251_v1  ;;  %v8666_v53 = vrot.slane %v15906_v30, 2 }
 0x950   : > { %11934 = vmatpush3.bf16.msra.mxu1 %v13135_v50 }
 0x951   : > { %11935 = vmatprep.subr.bf16.mxu1 %v13251_v1 }
 0x954   : > { %11936 = vmatpush3.bf16.msra.mxu1 %v13136_v20 }
 0x955   : > { %11941 = vmatprep.subr.bf16.mxu1 %v13251_v1 }
 0x957   : > { %11938 = vmatmul.mubr.msk.bf16.vlgmr.msra.gmra.mrb[64].mxu1 %vm1367_vm1, %v8261_v21 }
 0x958   : > { %11942 = vmatpush3.bf16.msra.mxu1 %v13137_v47  ;;  %11949 = vmatprep.mubr.msk.bf16.mxu1 %vm13252_vm0, %v13251_v1 }
 0x959   : > { %11943 = vmatprep.subr.bf16.mxu1 %v13251_v1 }
 0x95a   : > { %v7278_v4 = vpop.f32.mrb[12].mxu1 }
 0x95b   : > { %v7284_v38 = vadd.f32 %v7278_v4, %v7205_v49  ;;  %v11783_v10 = vpop.f32.mrb[13].mxu1 }
 0x95c   : > { %v7281_v14 = vpop.f32.mrb[14].mxu1  ;;  %11944 = vmatpush3.bf16.msra.mxu1 %v13138_v22 }
 0x95d   : > { %v11784_v57 = vpop.f32.mrb[15].mxu1  ;;  %11945 = vmatprep.subr.bf16.mxu1 %v13251_v1 }
 0x960   : > { %11946 = vmatpush3.bf16.msra.mxu1 %v13139_v23 }
 0x961   : > { %11947 = vmatprep.subr.bf16.mxu1 %v13251_v1 }
 0x964   : > { %11948 = vmatpush3.bf16.msra.mxu1 %v13140_v26 }
 0x965   : > { %11953 = vmatprep.subr.bf16.mxu1 %v13251_v1 }
 0x967   : > { %11950 = vmatmul.mubr.msk.bf16.vlgmr.msra.gmra.mrb[68].mxu1 %vm1367_vm1, %v15906_v30 }
 0x968   : > { %11954 = vmatpush3.bf16.msra.mxu1 %v13141_v58  ;;  %11961 = vmatprep.mubr.msk.bf16.mxu1 %vm13252_vm0, %v13251_v1 }
 0x969   : > { %11955 = vmatprep.subr.bf16.mxu1 %v13251_v1 }
 0x96a   : > { %v7357_v40 = vpop.f32.mrb[16].mxu1 }
 0x96b   : > { %v7363_v45 = vadd.f32 %v7357_v40, %v7284_v38  ;;  %v11795_v11 = vpop.f32.mrb[17].mxu1 }
 0x96c   : > { %v7360_v51 = vpop.f32.mrb[18].mxu1  ;;  %11956 = vmatpush3.bf16.msra.mxu1 %v13142_v2 }
 0x96d   : > { %v11796_v56 = vpop.f32.mrb[19].mxu1  ;;  %11957 = vmatprep.subr.bf16.mxu1 %v13251_v1 }
 0x970   : > { %11958 = vmatpush3.bf16.msra.mxu1 %v13143_v16 }
 0x971   : > { %11959 = vmatprep.subr.bf16.mxu1 %v13251_v1 }
 0x974   : > { %11960 = vmatpush3.bf16.msra.mxu1 %v13144_v37 }
 0x975   : > { %11965 = vmatprep.subr.bf16.mxu1 %v13251_v1 }
 0x977   : > { %11962 = vmatmul.mubr.msk.bf16.vlgmr.msra.gmra.mrb[72].mxu1 %vm1367_vm1, %v8430_v59 }
 0x978   : > { %11966 = vmatpush3.bf16.msra.mxu1 %v13145_v33  ;;  %11973 = vmatprep.mubr.msk.bf16.mxu1 %vm13252_vm0, %v13251_v1 }
 0x979   : > { %11967 = vmatprep.subr.bf16.mxu1 %v13251_v1 }
 0x97a   : > { %v7435_v5 = vpop.f32.mrb[20].mxu1 }
 0x97b   : > { %v7441_v6 = vadd.f32 %v7435_v5, %v7363_v45  ;;  %v11807_v19 = vpop.f32.mrb[21].mxu1 }
 0x97c   : > { %v7438_v8 = vpop.f32.mrb[22].mxu1  ;;  %11968 = vmatpush3.bf16.msra.mxu1 %v13146_v18 }
 0x97d   : > { %v11808_v24 = vpop.f32.mrb[23].mxu1  ;;  %11969 = vmatprep.subr.bf16.mxu1 %v13251_v1 }
 0x980   : > { %11970 = vmatpush3.bf16.msra.mxu1 %v13147_v34 }
 0x981   : > { %11971 = vmatprep.subr.bf16.mxu1 %v13251_v1 }
 0x984   : > { %11972 = vmatpush3.bf16.msra.mxu1 %v13148_v0 }
 0x985   : > { %11977 = vmatprep.subr.bf16.mxu1 %v13251_v1 }
 0x987   : > { %11974 = vmatmul.mubr.msk.bf16.vlgmr.msra.gmra.mrb[76].mxu1 %vm1367_vm1, %v8510_v27 }
 0x988   : > { %11978 = vmatpush3.bf16.msra.mxu1 %v13149_v36  ;;  %11985 = vmatprep.mubr.msk.bf16.mxu1 %vm13252_vm0, %v13251_v1 }
 0x989   : > { %11979 = vmatprep.subr.bf16.mxu1 %v13251_v1 }
 0x98a   : > { %v7513_v15 = vpop.f32.mrb[24].mxu1 }
 0x98b   : > { %v7519_v48 = vadd.f32 %v7513_v15, %v7441_v6  ;;  %v11819_v9 = vpop.f32.mrb[25].mxu1 }
 0x98c   : > { %v7516_v3 = vpop.f32.mrb[26].mxu1  ;;  %11980 = vmatpush3.bf16.msra.mxu1 %v13150_v17 }
 0x98d   : > { %v11820_v62 = vpop.f32.mrb[27].mxu1  ;;  %11981 = vmatprep.subr.bf16.mxu1 %v13251_v1 }
 0x990   : > { %11982 = vmatpush3.bf16.msra.mxu1 %v13151_v60 }
 0x991   : > { %11983 = vmatprep.subr.bf16.mxu1 %v13251_v1 }
 0x994   : > { %11984 = vmatpush3.bf16.msra.mxu1 %v13152_v42 }
 0x995   : > { %11989 = vmatprep.subr.bf16.mxu1 %v13251_v1 }
 0x997   : > { %11986 = vmatmul.mubr.msk.bf16.vlgmr.msra.gmra.mrb[80].mxu1 %vm1367_vm1, %v8588_v29 }
 0x998   : > { %11990 = vmatpush3.bf16.msra.mxu1 %v13153_v52  ;;  %11997 = vmatprep.mubr.msk.bf16.mxu1 %vm13252_vm0, %v13251_v1 }
 0x999   : > { %11991 = vmatprep.subr.bf16.mxu1 %v13251_v1 }
 0x99a   : > { %v7604_v55 = vpop.f32.mrb[28].mxu1 }
 0x99b   : > { %v7610_v28 = vadd.f32 %v7604_v55, %v7519_v48  ;;  %v11831_v41 = vpop.f32.mrb[29].mxu1 }
 0x99c   : > { %v7607_v61 = vpop.f32.mrb[30].mxu1  ;;  %11992 = vmatpush3.bf16.msra.mxu1 %v13154_v63 }
 0x99d   : > { %v11832_v49 = vpop.f32.mrb[31].mxu1  ;;  %11993 = vmatprep.subr.bf16.mxu1 %v13251_v1 }
 0x9a0   : > { %11994 = vmatpush3.bf16.msra.mxu1 %v13155_v35 }
 0x9a1   : > { %11995 = vmatprep.subr.bf16.mxu1 %v13251_v1 }
 0x9a4   : > { %11996 = vmatpush3.bf16.msra.mxu1 %v13156_v25 }
 0x9a7   : > { %11998 = vmatmul.mubr.msk.bf16.vlgmr.msra.gmra.mrb[84].mxu1 %vm1367_vm1, %v8666_v53 }
 0x9aa   : > { %v7683_v50 = vpop.f32.mrb[32].mxu1 }
 0x9ab   : > { %v7689_v12 = vadd.f32 %v7683_v50, %v7610_v28  ;;  %v11843_v20 = vpop.f32.mrb[33].mxu1 }
 0x9ac   : > { %v7686_v46 = vpop.f32.mrb[34].mxu1  ;;  %v8735_v20 = vld [vmem:[%s16042_s6] sm:$0x1] }
 0x9ad   : > { %v11844_v39 = vpop.f32.mrb[35].mxu1 }
 0x9ba   : > { %v7762_v13 = vpop.f32.mrb[36].mxu1 }
 0x9bb   : > { %v7768_v44 = vadd.f32 %v7762_v13, %v7689_v12  ;;  %v11855_v47 = vpop.f32.mrb[37].mxu1 }
 0x9bc   : > { %v7765_v43 = vpop.f32.mrb[38].mxu1 }
 0x9bd   : > { %v11856_v21 = vpop.f32.mrb[39].mxu1 }
 0x9ca   : > { %v7840_v31 = vpop.f32.mrb[40].mxu1 }
 0x9cb   : > { %v7846_v22 = vadd.f32 %v7840_v31, %v7768_v44  ;;  %v11867_v32 = vpop.f32.mrb[41].mxu1 }
 0x9cc   : > { %v7843_v4 = vpop.f32.mrb[42].mxu1 }
 0x9cd   : > { %v11868_v1 = vpop.f32.mrb[43].mxu1 }
 0x9da   : > { %v7918_v38 = vpop.f32.mrb[44].mxu1 }
 0x9db   : > { %v7924_v10 = vadd.f32 %v7918_v38, %v7846_v22  ;;  %v11879_v14 = vpop.f32.mrb[45].mxu1 }
 0x9dc   : > { %v7921_v23 = vpop.f32.mrb[46].mxu1 }
 0x9dd   : > { %v11880_v7 = vpop.f32.mrb[47].mxu1 }
 0x9ea   : > { %v8009_v57 = vpop.f32.mrb[48].mxu1 }
 0x9eb   : > { %v8015_v26 = vadd.f32 %v8009_v57, %v7924_v10  ;;  %v11891_v54 = vpop.f32.mrb[49].mxu1 }
 0x9ec   : > { %v8012_v58 = vpop.f32.mrb[50].mxu1 }
 0x9ed   : > { %v11892_v30 = vpop.f32.mrb[51].mxu1 }
 0x9fa   : > { %v8088_v2 = vpop.f32.mrb[52].mxu1 }
 0x9fb   : > { %v8094_v40 = vadd.f32 %v8088_v2, %v8015_v26  ;;  %v11903_v45 = vpop.f32.mrb[53].mxu1 }
 0x9fc   : > { %v8091_v11 = vpop.f32.mrb[54].mxu1 }
 0x9fd   : > { %v11904_v51 = vpop.f32.mrb[55].mxu1 }
 0xa0a   : > { %v8167_v16 = vpop.f32.mrb[56].mxu1 }
 0xa0b   : > { %v8173_v56 = vadd.f32 %v8167_v16, %v8094_v40  ;;  %v11915_v37 = vpop.f32.mrb[57].mxu1 }
 0xa0c   : > { %v8170_v33 = vpop.f32.mrb[58].mxu1 }
 0xa0d   : > { %v11916_v59 = vpop.f32.mrb[59].mxu1 }
 0xa1a   : > { %v8245_v18 = vpop.f32.mrb[60].mxu1 }
 0xa1b   : > { %v8251_v5 = vadd.f32 %v8245_v18, %v8173_v56  ;;  %v11927_v6 = vpop.f32.mrb[61].mxu1 }
 0xa1c   : > { %v8248_v19 = vpop.f32.mrb[62].mxu1 }
 0xa1d   : > { %v11928_v8 = vpop.f32.mrb[63].mxu1 }
 0xa2a   : > { %v8323_v34 = vpop.f32.mrb[64].mxu1 }
 0xa2b   : > { %v8329_v24 = vadd.f32 %v8323_v34, %v8251_v5  ;;  %v11939_v0 = vpop.f32.mrb[65].mxu1 }
 0xa2c   : > { %v8326_v36 = vpop.f32.mrb[66].mxu1 }
 0xa2d   : > { %v11940_v27 = vpop.f32.mrb[67].mxu1 }
 0xa3a   : > { %v8414_v17 = vpop.f32.mrb[68].mxu1 }
 0xa3b   : > { %v8420_v15 = vadd.f32 %v8414_v17, %v8329_v24  ;;  %v11951_v48 = vpop.f32.mrb[69].mxu1 }
 0xa3c   : > { %v8417_v9 = vpop.f32.mrb[70].mxu1 }
 0xa3d   : > { %v11952_v3 = vpop.f32.mrb[71].mxu1 }
 0xa4a   : > { %v8493_v60 = vpop.f32.mrb[72].mxu1 }
 0xa4b   : > { %v8499_v62 = vadd.f32 %v8493_v60, %v8420_v15  ;;  %v11963_v42 = vpop.f32.mrb[73].mxu1 }
 0xa4c   : > { %v8496_v52 = vpop.f32.mrb[74].mxu1 }
 0xa4d   : > { %v11964_v29 = vpop.f32.mrb[75].mxu1 }
 0xa5a   : > { %v8572_v63 = vpop.f32.mrb[76].mxu1 }
 0xa5b   : > { %v8578_v55 = vadd.f32 %v8572_v63, %v8499_v62  ;;  %v11975_v28 = vpop.f32.mrb[77].mxu1 }
 0xa5c   : > { %v8575_v41 = vpop.f32.mrb[78].mxu1 }
 0xa5d   : > { %v11976_v61 = vpop.f32.mrb[79].mxu1 }
 0xa6a   : > { %v8650_v35 = vpop.f32.mrb[80].mxu1 }
 0xa6b   : > { %v8656_v49 = vadd.f32 %v8650_v35, %v8578_v55  ;;  %v11987_v25 = vpop.f32.mrb[81].mxu1 }
 0xa6c   : > { %v8653_v53 = vpop.f32.mrb[82].mxu1 }
 0xa6d   : > { %v11988_v50 = vpop.f32.mrb[83].mxu1 }
 0xa7a   : > { %v8728_v12 = vpop.f32.mrb[84].mxu1 }
 0xa7b   : > { %v8734_v46 = vadd.f32 %v8728_v12, %v8656_v49  ;;  %v11999_v39 = vpop.f32.mrb[85].mxu1 }
 0xa7c   : > { %v8731_v13 = vpop.f32.mrb[86].mxu1 }
 0xa7d   : > { %v8736_v44 = vadd.f32 %v8735_v20, %v8734_v46  ;;  %v12000_v47 = vpop.f32.mrb[87].mxu1 }
 0xa7f   : > { %v8737_v43 = vand.u32 2147483647, %v8736_v44  ;;  %vm8741_vm3 = vcmp.ge.f32.partialorder %v8736_v44, 0.0 }
 0xa81   : > { %v8738_v21 = vsub.f32 0.0, %v8737_v43 }
 0xa83   : > { %v8739_v31 = vmul.f32 1.442695, %v8738_v21 }
 0xa85   : > { %13157 = vpow2.f32 %v8739_v31 }
 0xa8f   : > { %v13158_v22 = vpop.eup %13157 }
 0xa90   : > { %v8742_v32 = vadd.f32 1.0, %v13158_v22 }
 0xa92   : > { %13159 = vrcp.f32 %v8742_v32 }
 0xa9c   : > { %v13160_v4 = vpop.eup %13159 }
 0xa9d   : > { %v8745_v1 = vmul.f32 %v13160_v4, %v13158_v22 }
 0xa9f   : > { %v8746_v38 = vsel %vm8741_vm3, %v13160_v4, %v8745_v1 }
 0xaa0   : > { %8747 = vst [vmem:[%s270_s19] sm:$0x1] %v8746_v38 }
 0xaa1   : > { %13200 = shalt.err (!%p13197_p3)
}
 0xaa2   : > { %s13201_s15 = scalar_lea.hbm %s15994_s29, 16  ;;  %s13205_s17 = scalar_lea.hbm %s16043_s7, 32 }
 0xaa3   : > { %p13202_p4 = scmp.ne.s32.totalorder %s15994_s29, %s13201_s15  ;;  %p13206_p9 = scmp.lt.u32.totalorder %s15994_s29, %s16043_s7 }
 0xaa4   : > { %p13207_p10 = scmp.lt.u32.totalorder %s13205_s17, %s13201_s15  ;;  %p13209_p12 = scmp.lt.u32.totalorder %s13201_s15, %s15994_s29 }
 0xaa5   : > { %p13203_p7 = pnand %p13202_p4, %p13332_p5 }
 0xaa6   : > { %p13208_p11 = por %p13207_p10, %p13206_p9 }
 0xaa7   : > { %p13204_p8 = pneg %p13203_p7 }
 0xaa8   : > { %p13210_p13 = por %p13209_p12, %p13208_p11 }
 0xaaa   : > { %p13211_p0 = pnand %p13210_p13, %p13204_p8 }
 0xaac   : > { %13214 = shalt.err (!%p13211_p0)
}
 0xaad   : > { %12856 = dma.vmem_to_hbm [thread:$0]  (%p13332_p5), %s15996_s20, 16, %s15994_s29, %s8749_s8  }
 0xaae PF: > { %p12862_p1 = scmp.ge.s32.totalorder %s13249_s27, 2  ;;  %s8773_s21 = sand.u32 1, %s13237_s24  }
 0xaaf   : > { %s8774_s22 = scalar_lea.sflag [#allocation5], %s8773_s21 }
 0xab0   : > { %p12859_p2 = pnand %p12862_p1, %p13336_p6 }
 0xab2   : > { %13232 = dma.done.wait (!%p12859_p2), %s8774_s22, 16  }
 0xab3   : > { %13234 = vsyncadd (!%p12859_p2), %s8774_s22, 4294967280  ;;  %p17_p3 = scmp.ge.s32.totalorder %s13319_s30, 4   ;;  %s16078_s24 = smov %s13241_s25 }
 0xab4   : > { %s16079_s25 = smov %s13245_s26  ;;  %s16080_s26 = smov %s13330_s10 }
 0xab5   : > { %s16081_s27 = smov %s13319_s30  ;;  %19 = sbr.rel (!%p17_p3) target bundleno = 3 (0x3), region = 153 }
 0xabc   :  { %8778 = vsyncpa [#allocation5], 1 }
 0xabd   :  { %8780 = vsyncpa [#allocation5 + $0x1], 1 }

</bundles_post_ra>
